<compile_context>
chip_gen: v5e
topology: v5e:2x2
jax: 0.10.0
libtpu: 0.0.40
codegen_flags: <defaults>
</compile_context>

<pallas_src>
import math

import jax
import jax.numpy as jnp
from jax.experimental import pallas as pl
from jax.experimental.pallas import tpu as pltpu

# ---------------- configuration (small, consistent with the module) ----------------
B = 32                # batch of titles
B_TILE = 16           # titles per grid step -> 128-row slabs
L = 8                 # title length (seq)
VOCAB = 50            # vocabulary size
D_MODEL = 32          # opt.Glove_dim
H = 4                 # opt.num_head_n
D_HEAD = 16           # opt.head_dim  (d_k == d_v)
OUT_DIM = H * D_HEAD  # MHA output dim == Attention feature_dim (64)
ATT_DIM = OUT_DIM     # Attention attention_dim
R = B_TILE * L        # rows per grid step (128)
V_PAD = H * OUT_DIM   # lane-padded per-head V projection width (256)
QKV_W = 2 * OUT_DIM + V_PAD  # fused projection width (384)
NEG_INF = -1000000000.0
# TODO(synk): nn.Dropout is identity at inference time; no stochastic dropout in-kernel.


# ---------------------------------- Pallas kernel -----------------------------------
def news_encoder_kernel(x_ref, kb_ref, pb_ref, st_ref,
                        wqkv_ref, bqkv_ref, a1w_ref, a1b_ref, a2w_ref,
                        out_ref):
    # Flatten the B_TILE titles into one 128-row slab (leading-dim merge, layout no-op).
    x = x_ref[...].reshape(R, D_MODEL)                               # (128, 32)

    # Fused Q|K|V projection (scale pre-folded into W_Q/b_Q, V lane-padded per head).
    qkv = jnp.dot(x, wqkv_ref[...], preferred_element_type=jnp.float32) + bqkv_ref[...]

    st_bias = st_ref[...]                                            # (128,128) 0 / -1e9
    kb = kb_ref[0]                                                   # (H, 128)  0 / -1e9

    dn = (((1,), (1,)), ((), ()))          # contract last dims of both: q @ k^T, no transpose
    h_acc = None
    for h in range(H):                     # H = 4, static unroll
        qh = qkv[:, h * D_HEAD:(h + 1) * D_HEAD]                     # (128, 16)
        kh = qkv[:, OUT_DIM + h * D_HEAD:OUT_DIM + (h + 1) * D_HEAD] # (128, 16)
        # lane-padded V: head h's values already sit at lanes [h*16, (h+1)*16), zeros else
        vpad = qkv[:, 2 * OUT_DIM + h * OUT_DIM:2 * OUT_DIM + (h + 1) * OUT_DIM]  # (128, 64)
        s = jax.lax.dot_general(qh, kh, dn,
                                preferred_element_type=jnp.float32)  # (128, 128)
        s = s + st_bias + kb[h:h + 1, :]                             # additive masking only
        m = jnp.max(s, axis=-1, keepdims=True)
        p = jnp.exp(s - m)
        denom = jnp.sum(p, axis=-1, keepdims=True)                   # (128, 1)
        oh = jnp.dot(p, vpad, preferred_element_type=jnp.float32)    # (128, 64)
        contrib = oh * pl.reciprocal(denom)                          # deferred normalization
        h_acc = contrib if h_acc is None else h_acc + contrib        # heads fill disjoint lanes
    h_relu = jnp.maximum(h_acc, 0.0)                                 # F.relu, (128, 64)

    # Additive Attention pooling (lane-dense).
    att = jnp.tanh(jnp.dot(h_relu, a1w_ref[...], preferred_element_type=jnp.float32)
                   + a1b_ref[...])                                   # (128, 64)
    # affine2 (ATT_DIM -> 1) produced directly in row form on the MXU (no sublane->lane
    # relayout of the 128 scores); a2w is replicated to 8 rows in the wrapper, take row 0.
    score_row = jax.lax.dot_general(a2w_ref[...], att, dn,
                                    preferred_element_type=jnp.float32)[0:1, :]  # (1, 128)
    scoremat = score_row + pb_ref[0]                                 # (16, 128) masked scores
    m2 = jnp.max(scoremat, axis=-1, keepdims=True)                   # (16, 1) lane reduce
    p2 = jnp.exp(scoremat - m2)
    denom2 = jnp.sum(p2, axis=-1, keepdims=True)                     # (16, 1)
    pooled = jnp.dot(p2, h_relu, preferred_element_type=jnp.float32) # (16, 64) MXU
    out_ref[...] = pooled * pl.reciprocal(denom2)                    # deferred normalization


# ------------------------------------ wrapper ---------------------------------------
def news_encoder_pallas(title_text, title_mask, params):
    """Embedding gather + mask/weight packing in XLA glue, one pallas_call over slabs."""
    assert B % B_TILE == 0
    nb = B // B_TILE
    emb = jnp.take(params["emb"], title_text, axis=0)                # (B, L, D_MODEL)

    # Fold the attention scale into W_Q / b_Q; lane-pad W_V / b_V per head so head outputs
    # land directly at their final lane offsets (no in-kernel concatenate).
    scale = 1.0 / math.sqrt(float(D_HEAD))
    eye_h = jnp.eye(H, dtype=jnp.float32)
    wv_pad = jnp.einsum("dhk,gh->dghk", params["wv"].reshape(D_MODEL, H, D_HEAD),
                        eye_h).reshape(D_MODEL, V_PAD)               # (32, 256) block-diag
    bv_pad = jnp.einsum("hk,gh->ghk", params["bv"].reshape(H, D_HEAD),
                        eye_h).reshape(1, V_PAD)                     # (1, 256)
    wqkv = jnp.concatenate([params["wq"] * scale, params["wk"], wv_pad], axis=1)   # (32, 384)
    bqkv = jnp.concatenate([params["bq"] * scale,
                            jnp.zeros((1, OUT_DIM), jnp.float32), bv_pad], axis=1) # (1, 384)

    # Faithful reproduction of torch's mask.repeat(h, len_k).view(B*h, -1, len_k):
    # attention-batch index i = b*H + h uses title_mask[i % B]. Packed as additive bias.
    idx = (jnp.arange(B)[:, None] * H + jnp.arange(H)[None, :]) % B                # (B, H)
    key_bias = jnp.where(title_mask[idx] == 0.0, NEG_INF, 0.0).astype(jnp.float32) # (B, H, L)
    key_bias = key_bias.reshape(nb, B_TILE, H, L).transpose(0, 2, 1, 3).reshape(nb, H, R)

    # Constant block-diagonal "same title" additive bias (built once, tiny DMA).
    row_t = jnp.arange(R, dtype=jnp.int32) // L
    st_bias = jnp.where(row_t[:, None] == row_t[None, :], 0.0, NEG_INF).astype(jnp.float32)

    # Combined same-title + padding additive bias for the pooling softmax: (nb, 16, 128).
    same = jnp.arange(B_TILE, dtype=jnp.int32)[:, None] == row_t[None, :]          # (16, 128)
    tm_row = title_mask.reshape(nb, R)                                             # (nb, 128)
    pool_bias = jnp.where(jnp.logical_and(same[None, :, :], tm_row[:, None, :] != 0.0),
                          0.0, NEG_INF).astype(jnp.float32)

    a2w_rows = jnp.tile(params["a2w"].reshape(1, ATT_DIM), (8, 1))   # (8, 64) row-replicated

    full = lambda shape: pl.BlockSpec(shape, lambda b: (0,) * len(shape))
    return pl.pallas_call(
        news_encoder_kernel,
        out_shape=jax.ShapeDtypeStruct((B, OUT_DIM), jnp.float32),
        grid=(nb,),
        in_specs=[
            pl.BlockSpec((B_TILE, L, D_MODEL), lambda b: (b, 0, 0)),   # x slab
            pl.BlockSpec((1, H, R), lambda b: (b, 0, 0)),              # per-head key bias
            pl.BlockSpec((1, B_TILE, R), lambda b: (b, 0, 0)),         # pooling bias
            full((R, R)),                                              # same-title bias
            full((D_MODEL, QKV_W)),                                    # fused [W_Q*s|W_K|W_Vpad]
            full((1, QKV_W)),                                          # fused [b_Q*s|0|b_Vpad]
            full((OUT_DIM, ATT_DIM)),                                  # affine1 W^T
            full((1, ATT_DIM)),                                        # affine1 b
            full((8, ATT_DIM)),                                        # affine2 w (row x8)
        ],
        out_specs=pl.BlockSpec((B_TILE, OUT_DIM), lambda b: (b, 0)),
        compiler_params=pltpu.CompilerParams(dimension_semantics=("parallel",)),
    )(emb, key_bias, pool_bias, st_bias, wqkv, bqkv,
      params["a1w"], params["a1b"], a2w_rows)


# ------------------------------ pure-JAX reference ------------------------------
def news_encoder_ref(title_text, title_mask, params):
    x = jnp.take(params["emb"], title_text, axis=0)                  # (B, L, D_MODEL)
    q = x @ params["wq"] + params["bq"]
    k = x @ params["wk"]
    v = x @ params["wv"] + params["bv"]
    qh = q.reshape(B, L, H, D_HEAD).transpose(0, 2, 1, 3).reshape(B * H, L, D_HEAD)
    kh = k.reshape(B, L, H, D_HEAD).transpose(0, 2, 1, 3).reshape(B * H, L, D_HEAD)
    vh = v.reshape(B, L, H, D_HEAD).transpose(0, 2, 1, 3).reshape(B * H, L, D_HEAD)
    a = jnp.einsum("bid,bjd->bij", qh, kh) / math.sqrt(float(D_HEAD))
    mask3 = jnp.tile(title_mask, (H, L)).reshape(B * H, L, L)        # torch repeat/view semantics
    a = jnp.where(mask3 == 0.0, NEG_INF, a)
    alpha = jax.nn.softmax(a, axis=2)
    o = jnp.einsum("bij,bjd->bid", alpha, vh)
    o = o.reshape(B, H, L, D_HEAD).transpose(0, 2, 1, 3).reshape(B, L, OUT_DIM)
    h = jax.nn.relu(o)
    att = jnp.tanh(h @ params["a1w"] + params["a1b"])
    s = (att @ params["a2w"])[..., 0]                                # (B, L)
    s = jnp.where(title_mask == 0.0, NEG_INF, s)
    w = jax.nn.softmax(s, axis=1)[:, None, :]                        # (B, 1, L)
    return jnp.einsum("bql,bld->bqd", w, h)[:, 0, :]                 # (B, OUT_DIM)


# -------------------------------------- main --------------------------------------
if __name__ == "__main__":
    key = jax.random.PRNGKey(0)
    keys = jax.random.split(key, 10)

    params = {
        "emb": jax.random.normal(keys[0], (VOCAB, D_MODEL), jnp.float32) * 0.1,
        "wq": jax.random.normal(keys[1], (D_MODEL, OUT_DIM), jnp.float32) * 0.1,
        "bq": jax.random.normal(keys[2], (1, OUT_DIM), jnp.float32) * 0.1,
        "wk": jax.random.normal(keys[3], (D_MODEL, OUT_DIM), jnp.float32) * 0.1,
        "wv": jax.random.normal(keys[4], (D_MODEL, OUT_DIM), jnp.float32) * 0.1,
        "bv": jax.random.normal(keys[5], (1, OUT_DIM), jnp.float32) * 0.1,
        "a1w": jax.random.normal(keys[6], (OUT_DIM, ATT_DIM), jnp.float32) * 0.1,
        "a1b": jax.random.normal(keys[7], (1, ATT_DIM), jnp.float32) * 0.1,
        "a2w": jax.random.normal(keys[8], (ATT_DIM, 1), jnp.float32) * 0.1,
    }

    title_text = jax.random.randint(keys[9], (B, L), 0, VOCAB, dtype=jnp.int32)
    # variable-length titles: at least 1 valid token each, rest padding
    lengths = jax.random.randint(jax.random.PRNGKey(1), (B,), 1, L + 1)
    title_mask = (jnp.arange(L)[None, :] < lengths[:, None]).astype(jnp.float32)

    out = news_encoder_pallas(title_text, title_mask, params)
    out = jax.block_until_ready(out)

    ref = news_encoder_ref(title_text, title_mask, params)
    assert out.shape == (B, OUT_DIM), out.shape
    err = float(jnp.max(jnp.abs(out - ref)))
    assert jnp.allclose(out, ref, rtol=1e-4, atol=1e-4), ("mismatch", err)

    print("KERNEL_OK")
</pallas_src>

<mosaic_0001>
module attributes {stable_mosaic.version = 11 : i64} {
  func.func @news_encoder_kernel(%arg0: i32, %arg1: memref<16x8x32xf32, #tpu.memory_space<vmem>>, %arg2: memref<1x4x128xf32, #tpu.memory_space<vmem>>, %arg3: memref<1x16x128xf32, #tpu.memory_space<vmem>>, %arg4: memref<128x128xf32, #tpu.memory_space<vmem>>, %arg5: memref<32x384xf32, #tpu.memory_space<vmem>>, %arg6: memref<1x384xf32, #tpu.memory_space<vmem>>, %arg7: memref<64x64xf32, #tpu.memory_space<vmem>>, %arg8: memref<1x64xf32, #tpu.memory_space<vmem>>, %arg9: memref<8x64xf32, #tpu.memory_space<vmem>>, %arg10: memref<16x64xf32, #tpu.memory_space<vmem>>) attributes {dimension_semantics = [#tpu.dimension_semantics<parallel>], iteration_bounds = array<i64: 2>, scalar_prefetch = 0 : i64, scratch_operands = 0 : i64, tpu.core_type = #tpu.core_type<tc>, window_params = [{transform_indices = @transform_0, window_bounds = array<i64: 16, 8, 32>}, {transform_indices = @transform_1, window_bounds = array<i64: 1, 4, 128>}, {transform_indices = @transform_2, window_bounds = array<i64: 1, 16, 128>}, {pipeline_mode = #tpu.pipeline_mode<synchronous>, transform_indices = @transform_3, window_bounds = array<i64: 128, 128>}, {pipeline_mode = #tpu.pipeline_mode<synchronous>, transform_indices = @transform_4, window_bounds = array<i64: 32, 384>}, {pipeline_mode = #tpu.pipeline_mode<synchronous>, transform_indices = @transform_5, window_bounds = array<i64: 1, 384>}, {pipeline_mode = #tpu.pipeline_mode<synchronous>, transform_indices = @transform_6, window_bounds = array<i64: 64, 64>}, {pipeline_mode = #tpu.pipeline_mode<synchronous>, transform_indices = @transform_7, window_bounds = array<i64: 1, 64>}, {pipeline_mode = #tpu.pipeline_mode<synchronous>, transform_indices = @transform_8, window_bounds = array<i64: 8, 64>}, {transform_indices = @transform_9, window_bounds = array<i64: 16, 64>}]} {
    %c0 = arith.constant 0 : index
    %c0_0 = arith.constant 0 : index
    %c0_1 = arith.constant 0 : index
    %0 = vector.load %arg1[%c0, %c0_0, %c0_1] : memref<16x8x32xf32, #tpu.memory_space<vmem>>, vector<16x8x32xf32>
    %1 = vector.shape_cast %0 : vector<16x8x32xf32> to vector<128x32xf32>
    %c0_2 = arith.constant 0 : index
    %c0_3 = arith.constant 0 : index
    %2 = vector.load %arg5[%c0_2, %c0_3] : memref<32x384xf32, #tpu.memory_space<vmem>>, vector<32x384xf32>
    %cst = arith.constant dense<0.000000e+00> : vector<128x384xf32>
    %3 = tpu.matmul %1, %2, %cst {dimension_numbers = #tpu.dot_dimension_numbers<[1], [0], [0], [1], [0, 0, 1, 1], [], []>} : vector<128x32xf32>, vector<32x384xf32>, vector<128x384xf32> -> vector<128x384xf32>
    %c0_4 = arith.constant 0 : index
    %c0_5 = arith.constant 0 : index
    %4 = vector.load %arg6[%c0_4, %c0_5] : memref<1x384xf32, #tpu.memory_space<vmem>>, vector<1x384xf32>
    %5 = vector.broadcast %4 : vector<1x384xf32> to vector<128x384xf32>
    %6 = arith.addf %3, %5 : vector<128x384xf32>
    %c0_6 = arith.constant 0 : index
    %c0_7 = arith.constant 0 : index
    %7 = vector.load %arg4[%c0_6, %c0_7] : memref<128x128xf32, #tpu.memory_space<vmem>>, vector<128x128xf32>
    %c0_8 = arith.constant 0 : index
    %c0_9 = arith.constant 0 : index
    %c0_10 = arith.constant 0 : index
    %8 = vector.load %arg2[%c0_8, %c0_9, %c0_10] : memref<1x4x128xf32, #tpu.memory_space<vmem>>, vector<1x4x128xf32>
    %9 = vector.shape_cast %8 : vector<1x4x128xf32> to vector<4x128xf32>
    %10 = vector.extract_strided_slice %6 {offsets = [0, 0], sizes = [128, 16], strides = [1, 1]} : vector<128x384xf32> to vector<128x16xf32>
    %11 = vector.extract_strided_slice %6 {offsets = [0, 64], sizes = [128, 16], strides = [1, 1]} : vector<128x384xf32> to vector<128x16xf32>
    %12 = vector.extract_strided_slice %6 {offsets = [0, 128], sizes = [128, 64], strides = [1, 1]} : vector<128x384xf32> to vector<128x64xf32>
    %cst_11 = arith.constant dense<0.000000e+00> : vector<128x128xf32>
    %13 = tpu.matmul %10, %11, %cst_11 {dimension_numbers = #tpu.dot_dimension_numbers<[1], [1], [0], [0], [0, 0, 1, 0], [], []>} : vector<128x16xf32>, vector<128x16xf32>, vector<128x128xf32> -> vector<128x128xf32>
    %14 = arith.addf %13, %7 : vector<128x128xf32>
    %15 = vector.extract_strided_slice %9 {offsets = [0, 0], sizes = [1, 128], strides = [1, 1]} : vector<4x128xf32> to vector<1x128xf32>
    %16 = vector.broadcast %15 : vector<1x128xf32> to vector<128x128xf32>
    %17 = arith.addf %14, %16 : vector<128x128xf32>
    %cst_12 = arith.constant dense<0xFF800000> : vector<128xf32>
    %18 = vector.multi_reduction <maximumf>, %17, %cst_12 [1] : vector<128x128xf32> to vector<128xf32>
    %19 = vector.shape_cast %18 : vector<128xf32> to vector<128x1xf32>
    %20 = vector.broadcast %19 : vector<128x1xf32> to vector<128x128xf32>
    %21 = arith.subf %17, %20 : vector<128x128xf32>
    %22 = math.exp %21 : vector<128x128xf32>
    %cst_13 = arith.constant dense<0.000000e+00> : vector<128xf32>
    %23 = vector.multi_reduction <add>, %22, %cst_13 [1] : vector<128x128xf32> to vector<128xf32>
    %24 = vector.shape_cast %23 : vector<128xf32> to vector<128x1xf32>
    %cst_14 = arith.constant dense<0.000000e+00> : vector<128x64xf32>
    %25 = tpu.matmul %22, %12, %cst_14 {dimension_numbers = #tpu.dot_dimension_numbers<[1], [0], [0], [1], [0, 0, 1, 1], [], []>} : vector<128x128xf32>, vector<128x64xf32>, vector<128x64xf32> -> vector<128x64xf32>
    %26 = tpu.reciprocal %24 : vector<128x1xf32> -> vector<128x1xf32>
    %27 = vector.broadcast %26 : vector<128x1xf32> to vector<128x64xf32>
    %28 = arith.mulf %25, %27 : vector<128x64xf32>
    %29 = vector.extract_strided_slice %6 {offsets = [0, 16], sizes = [128, 16], strides = [1, 1]} : vector<128x384xf32> to vector<128x16xf32>
    %30 = vector.extract_strided_slice %6 {offsets = [0, 80], sizes = [128, 16], strides = [1, 1]} : vector<128x384xf32> to vector<128x16xf32>
    %31 = vector.extract_strided_slice %6 {offsets = [0, 192], sizes = [128, 64], strides = [1, 1]} : vector<128x384xf32> to vector<128x64xf32>
    %cst_15 = arith.constant dense<0.000000e+00> : vector<128x128xf32>
    %32 = tpu.matmul %29, %30, %cst_15 {dimension_numbers = #tpu.dot_dimension_numbers<[1], [1], [0], [0], [0, 0, 1, 0], [], []>} : vector<128x16xf32>, vector<128x16xf32>, vector<128x128xf32> -> vector<128x128xf32>
    %33 = arith.addf %32, %7 : vector<128x128xf32>
    %34 = vector.extract_strided_slice %9 {offsets = [1, 0], sizes = [1, 128], strides = [1, 1]} : vector<4x128xf32> to vector<1x128xf32>
    %35 = vector.broadcast %34 : vector<1x128xf32> to vector<128x128xf32>
    %36 = arith.addf %33, %35 : vector<128x128xf32>
    %cst_16 = arith.constant dense<0xFF800000> : vector<128xf32>
    %37 = vector.multi_reduction <maximumf>, %36, %cst_16 [1] : vector<128x128xf32> to vector<128xf32>
    %38 = vector.shape_cast %37 : vector<128xf32> to vector<128x1xf32>
    %39 = vector.broadcast %38 : vector<128x1xf32> to vector<128x128xf32>
    %40 = arith.subf %36, %39 : vector<128x128xf32>
    %41 = math.exp %40 : vector<128x128xf32>
    %cst_17 = arith.constant dense<0.000000e+00> : vector<128xf32>
    %42 = vector.multi_reduction <add>, %41, %cst_17 [1] : vector<128x128xf32> to vector<128xf32>
    %43 = vector.shape_cast %42 : vector<128xf32> to vector<128x1xf32>
    %cst_18 = arith.constant dense<0.000000e+00> : vector<128x64xf32>
    %44 = tpu.matmul %41, %31, %cst_18 {dimension_numbers = #tpu.dot_dimension_numbers<[1], [0], [0], [1], [0, 0, 1, 1], [], []>} : vector<128x128xf32>, vector<128x64xf32>, vector<128x64xf32> -> vector<128x64xf32>
    %45 = tpu.reciprocal %43 : vector<128x1xf32> -> vector<128x1xf32>
    %46 = vector.broadcast %45 : vector<128x1xf32> to vector<128x64xf32>
    %47 = arith.mulf %44, %46 : vector<128x64xf32>
    %48 = arith.addf %28, %47 : vector<128x64xf32>
    %49 = vector.extract_strided_slice %6 {offsets = [0, 32], sizes = [128, 16], strides = [1, 1]} : vector<128x384xf32> to vector<128x16xf32>
    %50 = vector.extract_strided_slice %6 {offsets = [0, 96], sizes = [128, 16], strides = [1, 1]} : vector<128x384xf32> to vector<128x16xf32>
    %51 = vector.extract_strided_slice %6 {offsets = [0, 256], sizes = [128, 64], strides = [1, 1]} : vector<128x384xf32> to vector<128x64xf32>
    %cst_19 = arith.constant dense<0.000000e+00> : vector<128x128xf32>
    %52 = tpu.matmul %49, %50, %cst_19 {dimension_numbers = #tpu.dot_dimension_numbers<[1], [1], [0], [0], [0, 0, 1, 0], [], []>} : vector<128x16xf32>, vector<128x16xf32>, vector<128x128xf32> -> vector<128x128xf32>
    %53 = arith.addf %52, %7 : vector<128x128xf32>
    %54 = vector.extract_strided_slice %9 {offsets = [2, 0], sizes = [1, 128], strides = [1, 1]} : vector<4x128xf32> to vector<1x128xf32>
    %55 = vector.broadcast %54 : vector<1x128xf32> to vector<128x128xf32>
    %56 = arith.addf %53, %55 : vector<128x128xf32>
    %cst_20 = arith.constant dense<0xFF800000> : vector<128xf32>
    %57 = vector.multi_reduction <maximumf>, %56, %cst_20 [1] : vector<128x128xf32> to vector<128xf32>
    %58 = vector.shape_cast %57 : vector<128xf32> to vector<128x1xf32>
    %59 = vector.broadcast %58 : vector<128x1xf32> to vector<128x128xf32>
    %60 = arith.subf %56, %59 : vector<128x128xf32>
    %61 = math.exp %60 : vector<128x128xf32>
    %cst_21 = arith.constant dense<0.000000e+00> : vector<128xf32>
    %62 = vector.multi_reduction <add>, %61, %cst_21 [1] : vector<128x128xf32> to vector<128xf32>
    %63 = vector.shape_cast %62 : vector<128xf32> to vector<128x1xf32>
    %cst_22 = arith.constant dense<0.000000e+00> : vector<128x64xf32>
    %64 = tpu.matmul %61, %51, %cst_22 {dimension_numbers = #tpu.dot_dimension_numbers<[1], [0], [0], [1], [0, 0, 1, 1], [], []>} : vector<128x128xf32>, vector<128x64xf32>, vector<128x64xf32> -> vector<128x64xf32>
    %65 = tpu.reciprocal %63 : vector<128x1xf32> -> vector<128x1xf32>
    %66 = vector.broadcast %65 : vector<128x1xf32> to vector<128x64xf32>
    %67 = arith.mulf %64, %66 : vector<128x64xf32>
    %68 = arith.addf %48, %67 : vector<128x64xf32>
    %69 = vector.extract_strided_slice %6 {offsets = [0, 48], sizes = [128, 16], strides = [1, 1]} : vector<128x384xf32> to vector<128x16xf32>
    %70 = vector.extract_strided_slice %6 {offsets = [0, 112], sizes = [128, 16], strides = [1, 1]} : vector<128x384xf32> to vector<128x16xf32>
    %71 = vector.extract_strided_slice %6 {offsets = [0, 320], sizes = [128, 64], strides = [1, 1]} : vector<128x384xf32> to vector<128x64xf32>
    %cst_23 = arith.constant dense<0.000000e+00> : vector<128x128xf32>
    %72 = tpu.matmul %69, %70, %cst_23 {dimension_numbers = #tpu.dot_dimension_numbers<[1], [1], [0], [0], [0, 0, 1, 0], [], []>} : vector<128x16xf32>, vector<128x16xf32>, vector<128x128xf32> -> vector<128x128xf32>
    %73 = arith.addf %72, %7 : vector<128x128xf32>
    %74 = vector.extract_strided_slice %9 {offsets = [3, 0], sizes = [1, 128], strides = [1, 1]} : vector<4x128xf32> to vector<1x128xf32>
    %75 = vector.broadcast %74 : vector<1x128xf32> to vector<128x128xf32>
    %76 = arith.addf %73, %75 : vector<128x128xf32>
    %cst_24 = arith.constant dense<0xFF800000> : vector<128xf32>
    %77 = vector.multi_reduction <maximumf>, %76, %cst_24 [1] : vector<128x128xf32> to vector<128xf32>
    %78 = vector.shape_cast %77 : vector<128xf32> to vector<128x1xf32>
    %79 = vector.broadcast %78 : vector<128x1xf32> to vector<128x128xf32>
    %80 = arith.subf %76, %79 : vector<128x128xf32>
    %81 = math.exp %80 : vector<128x128xf32>
    %cst_25 = arith.constant dense<0.000000e+00> : vector<128xf32>
    %82 = vector.multi_reduction <add>, %81, %cst_25 [1] : vector<128x128xf32> to vector<128xf32>
    %83 = vector.shape_cast %82 : vector<128xf32> to vector<128x1xf32>
    %cst_26 = arith.constant dense<0.000000e+00> : vector<128x64xf32>
    %84 = tpu.matmul %81, %71, %cst_26 {dimension_numbers = #tpu.dot_dimension_numbers<[1], [0], [0], [1], [0, 0, 1, 1], [], []>} : vector<128x128xf32>, vector<128x64xf32>, vector<128x64xf32> -> vector<128x64xf32>
    %85 = tpu.reciprocal %83 : vector<128x1xf32> -> vector<128x1xf32>
    %86 = vector.broadcast %85 : vector<128x1xf32> to vector<128x64xf32>
    %87 = arith.mulf %84, %86 : vector<128x64xf32>
    %88 = arith.addf %68, %87 : vector<128x64xf32>
    %cst_27 = arith.constant 0.000000e+00 : f32
    %89 = vector.broadcast %cst_27 : f32 to vector<128x64xf32>
    %90 = arith.maximumf %88, %89 : vector<128x64xf32>
    %c0_28 = arith.constant 0 : index
    %c0_29 = arith.constant 0 : index
    %91 = vector.load %arg7[%c0_28, %c0_29] : memref<64x64xf32, #tpu.memory_space<vmem>>, vector<64x64xf32>
    %cst_30 = arith.constant dense<0.000000e+00> : vector<128x64xf32>
    %92 = tpu.matmul %90, %91, %cst_30 {dimension_numbers = #tpu.dot_dimension_numbers<[1], [0], [0], [1], [0, 0, 1, 1], [], []>} : vector<128x64xf32>, vector<64x64xf32>, vector<128x64xf32> -> vector<128x64xf32>
    %c0_31 = arith.constant 0 : index
    %c0_32 = arith.constant 0 : index
    %93 = vector.load %arg8[%c0_31, %c0_32] : memref<1x64xf32, #tpu.memory_space<vmem>>, vector<1x64xf32>
    %94 = vector.broadcast %93 : vector<1x64xf32> to vector<128x64xf32>
    %95 = arith.addf %92, %94 : vector<128x64xf32>
    %96 = math.tanh %95 : vector<128x64xf32>
    %c0_33 = arith.constant 0 : index
    %c0_34 = arith.constant 0 : index
    %97 = vector.load %arg9[%c0_33, %c0_34] : memref<8x64xf32, #tpu.memory_space<vmem>>, vector<8x64xf32>
    %cst_35 = arith.constant dense<0.000000e+00> : vector<8x128xf32>
    %98 = tpu.matmul %97, %96, %cst_35 {dimension_numbers = #tpu.dot_dimension_numbers<[1], [1], [0], [0], [0, 0, 1, 0], [], []>} : vector<8x64xf32>, vector<128x64xf32>, vector<8x128xf32> -> vector<8x128xf32>
    %99 = vector.extract_strided_slice %98 {offsets = [0, 0], sizes = [1, 128], strides = [1, 1]} : vector<8x128xf32> to vector<1x128xf32>
    %c0_36 = arith.constant 0 : index
    %c0_37 = arith.constant 0 : index
    %c0_38 = arith.constant 0 : index
    %100 = vector.load %arg3[%c0_36, %c0_37, %c0_38] : memref<1x16x128xf32, #tpu.memory_space<vmem>>, vector<1x16x128xf32>
    %101 = vector.shape_cast %100 : vector<1x16x128xf32> to vector<16x128xf32>
    %102 = vector.broadcast %99 : vector<1x128xf32> to vector<16x128xf32>
    %103 = arith.addf %102, %101 : vector<16x128xf32>
    %cst_39 = arith.constant dense<0xFF800000> : vector<16xf32>
    %104 = vector.multi_reduction <maximumf>, %103, %cst_39 [1] : vector<16x128xf32> to vector<16xf32>
    %105 = vector.shape_cast %104 : vector<16xf32> to vector<16x1xf32>
    %106 = vector.broadcast %105 : vector<16x1xf32> to vector<16x128xf32>
    %107 = arith.subf %103, %106 : vector<16x128xf32>
    %108 = math.exp %107 : vector<16x128xf32>
    %cst_40 = arith.constant dense<0.000000e+00> : vector<16xf32>
    %109 = vector.multi_reduction <add>, %108, %cst_40 [1] : vector<16x128xf32> to vector<16xf32>
    %110 = vector.shape_cast %109 : vector<16xf32> to vector<16x1xf32>
    %cst_41 = arith.constant dense<0.000000e+00> : vector<16x64xf32>
    %111 = tpu.matmul %108, %90, %cst_41 {dimension_numbers = #tpu.dot_dimension_numbers<[1], [0], [0], [1], [0, 0, 1, 1], [], []>} : vector<16x128xf32>, vector<128x64xf32>, vector<16x64xf32> -> vector<16x64xf32>
    %112 = tpu.reciprocal %110 : vector<16x1xf32> -> vector<16x1xf32>
    %113 = vector.broadcast %112 : vector<16x1xf32> to vector<16x64xf32>
    %114 = arith.mulf %111, %113 : vector<16x64xf32>
    %c0_42 = arith.constant 0 : index
    %c0_43 = arith.constant 0 : index
    %115 = vector.load %arg10[%c0_42, %c0_43] : memref<16x64xf32, #tpu.memory_space<vmem>>, vector<16x64xf32>
    tpu.vector_store %arg10[%c0_42, %c0_43], %114 {strides = array<i32>} : memref<16x64xf32, #tpu.memory_space<vmem>>, vector<16x64xf32>,
    return
  }
  func.func @transform_0(%arg0: i32) -> (i32, i32, i32) {
    %c0_i32 = arith.constant 0 : i32
    %c0_i32_0 = arith.constant 0 : i32
    %c0_i32_1 = arith.constant 0 : i32
    return %arg0, %c0_i32, %c0_i32_0 : i32, i32, i32
  }
  func.func @transform_1(%arg0: i32) -> (i32, i32, i32) {
    %c0_i32 = arith.constant 0 : i32
    %c0_i32_0 = arith.constant 0 : i32
    %c0_i32_1 = arith.constant 0 : i32
    return %arg0, %c0_i32, %c0_i32_0 : i32, i32, i32
  }
  func.func @transform_2(%arg0: i32) -> (i32, i32, i32) {
    %c0_i32 = arith.constant 0 : i32
    %c0_i32_0 = arith.constant 0 : i32
    %c0_i32_1 = arith.constant 0 : i32
    return %arg0, %c0_i32, %c0_i32_0 : i32, i32, i32
  }
  func.func @transform_3(%arg0: i32) -> (i32, i32) {
    %c0_i32 = arith.constant 0 : i32
    %c0_i32_0 = arith.constant 0 : i32
    %c0_i32_1 = arith.constant 0 : i32
    return %c0_i32, %c0_i32_0 : i32, i32
  }
  func.func @transform_4(%arg0: i32) -> (i32, i32) {
    %c0_i32 = arith.constant 0 : i32
    %c0_i32_0 = arith.constant 0 : i32
    %c0_i32_1 = arith.constant 0 : i32
    return %c0_i32, %c0_i32_0 : i32, i32
  }
  func.func @transform_5(%arg0: i32) -> (i32, i32) {
    %c0_i32 = arith.constant 0 : i32
    %c0_i32_0 = arith.constant 0 : i32
    %c0_i32_1 = arith.constant 0 : i32
    return %c0_i32, %c0_i32_0 : i32, i32
  }
  func.func @transform_6(%arg0: i32) -> (i32, i32) {
    %c0_i32 = arith.constant 0 : i32
    %c0_i32_0 = arith.constant 0 : i32
    %c0_i32_1 = arith.constant 0 : i32
    return %c0_i32, %c0_i32_0 : i32, i32
  }
  func.func @transform_7(%arg0: i32) -> (i32, i32) {
    %c0_i32 = arith.constant 0 : i32
    %c0_i32_0 = arith.constant 0 : i32
    %c0_i32_1 = arith.constant 0 : i32
    return %c0_i32, %c0_i32_0 : i32, i32
  }
  func.func @transform_8(%arg0: i32) -> (i32, i32) {
    %c0_i32 = arith.constant 0 : i32
    %c0_i32_0 = arith.constant 0 : i32
    %c0_i32_1 = arith.constant 0 : i32
    return %c0_i32, %c0_i32_0 : i32, i32
  }
  func.func @transform_9(%arg0: i32) -> (i32, i32) {
    %c0_i32 = arith.constant 0 : i32
    %c0_i32_0 = arith.constant 0 : i32
    return %arg0, %c0_i32 : i32, i32
  }
}

</mosaic_0001>

<bundles_post_ra>
// kernel: tpu_custom_call.1
= control target key start
LH: loop header
LB: loop body
LE: loop exit
PB: predicated region body
PF: predicated region fallthrough
CT: control target
= control target key end

     0   :  { %s8955_s0 = inlined_call_operand.hbm [shape: f32[32,8,32], index: 0, kind: input, shape index: {}]   ;;  %s8956_s1 = inlined_call_operand.hbm [shape: f32[2,4,128], index: 1, kind: input, shape index: {}]   ;;  %s8957_s2 = inlined_call_operand.hbm [shape: f32[2,16,128], index: 2, kind: input, shape index: {}]   ;;  %s8958_s3 = inlined_call_operand.hbm [shape: f32[128,128], index: 3, kind: input, shape index: {}]   ;;  %s8959_s4 = inlined_call_operand.hbm [shape: f32[32,384], index: 4, kind: input, shape index: {}]   ;;  %s8960_s5 = inlined_call_operand.vmem [shape: f32[1,384], index: 5, kind: input, shape index: {}]   ;;  %s8961_s6 = inlined_call_operand.hbm [shape: f32[64,64], index: 6, kind: input, shape index: {}]   ;;  %s8962_s7 = inlined_call_operand.vmem [shape: f32[1,64], index: 7, kind: input, shape index: {}]   ;;  %s8963_s8 = inlined_call_operand.hbm [shape: f32[8,64], index: 8, kind: input, shape index: {}]   ;;  %s8964_s9 = inlined_call_operand.hbm [shape: f32[32,64], index: 9, kind: output, shape index: {}]  }
   0x1   :  { %9021 = sst [smem:[#allocation61_spill]] %s8956_s1 }
   0x2   :  { %9022 = sst [smem:[#allocation62_spill]] %s8958_s3 }
   0x3   :  { %9023 = sst [smem:[#allocation63_spill]] %s8961_s6 }
   0x4   :  { %9024 = sst [smem:[#allocation64_spill]] %s8964_s9 }
   0x5   :  { %14 = vsyncpa [#allocation3], 0 }
   0x6   :  { %16 = vsyncpa [#allocation3 + $0x1], 0 }
   0x7   :  { %17 = vsyncpa [#allocation6], 0 }
   0x8   :  { %19 = vsyncpa [#allocation6 + $0x1], 0 }
   0x9   :  { %20 = vsyncpa [#allocation9], 0 }
   0xa   :  { %21 = vsyncpa [#allocation12], 0 }
   0xb   :  { %22 = vsyncpa [#allocation4], 0 }
   0xc   :  { %24 = vsyncpa [#allocation4 + $0x1], 0  ;;  %s5038_s30 = smov 0   ;;  %s5040_s10 = smov 0  }
   0xd   :  { %s5042_s11 = smov 0   ;;  %s5044_s12 = smov 0  }
   0xe LB: > { %9025 = sst [smem:[#allocation20_spill]] %s4957_s30  ;;  %s5062_s16 = sadd.s32 4294967295, %s4969_s12   ;;  %s4969_s12 = sphi %s5044_s12, %s9376_s12   ;;  %s4965_s11 = sphi %s5042_s11, %s9378_s11   ;;  %s4961_s10 = sphi %s5040_s10, %s9380_s10   ;;  %s4957_s30 = sphi %s5038_s30, %s9379_s30  }
   0xf   : > { %9026 = sst [smem:[#allocation21_spill]] %s4965_s11  ;;  %p3938_p0 = scmp.ge.s32.totalorder %s4969_s12, 1 }
  0x10   : > { %s9027_s3 = sld [smem:[#allocation62_spill]]  ;;  %p8977_p1 = scmp.eq.s32.totalorder %s5062_s16, 0 }
  0x11   : > { %p265_p2 = scmp.lt.s32.totalorder %s4969_s12, 3  ;;  %s4971_s18 = smov [#allocation8]  }
  0x12   : > { %s278_s19 = sshll.u32 %s4971_s18, 4  ;;  %s9029_s6 = sld [smem:[#allocation63_spill]]  ;;  %s279_s19 = int_to_ptr.vmem [resolvable:$true] %s278_s19 }
  0x13   : > { %p5067_p3 = pnand %p3938_p0, %p265_p2  ;;  %s4972_s24 = smov [#allocation11]  }
  0x14   : > { %s309_s25 = sshll.u32 %s4972_s24, 4  ;;  %s8965_s26 = smov 128   ;;  %s310_s25 = int_to_ptr.vmem [resolvable:$true] %s309_s25 }
  0x15   : > { %p4218_p4 = pneg %p5067_p3  ;;  %s8967_s27 = smov 8  }
  0x16   : > { %s276_s15 = sshll.u32 %s9027_s3, 4  ;;  %s3937_s28 = sadd.s32 4294967294, %s4969_s12   ;;  %s277_s15 = int_to_ptr.hbm [resolvable:$true] %s276_s15 }
  0x17   : > { %p5079_p6 = pnand %p4218_p4, %p8977_p1  ;;  %s5095_s29 = sadd.s32 1, %s4969_s12  }
  0x18   : > { %s307_s22 = sshll.u32 %s9029_s6, 4  ;;  %9031 = sst [smem:[#allocation22_spill]] %s5095_s29  ;;  %s308_s22 = int_to_ptr.hbm [resolvable:$true] %s307_s22 }
  0x19   : > { %4221 = dma.hbm_to_vmem [thread:$0]  (!%p5079_p6), %s277_s15, 2048, %s279_s19, [#allocation9], %s8965_s26, %s8965_s26, %s8967_s27  }
  0x1a   : > { %4227 = dma.hbm_to_vmem [thread:$0]  (!%p5079_p6), %s308_s22, 1024, %s310_s25, [#allocation12], %s8965_s26, %s8965_s26, %s8967_s27  }
  0x1b   : > { %s34_s13 = ssub.s32 %s4969_s12, %s5095_s29  ;;  %s37_s14 = sadd.s32 1, %s4965_s11 }
  0x1c   : > { %p35_p7 = scmp.eq.s32.totalorder %s34_s13, 0  ;;  %p44_p8 = scmp.ne.s32.totalorder %s4965_s11, %s4961_s10 }
  0x1d   : > { %p45_p9 = scmp.eq.s32.totalorder %s4969_s12, 0  ;;  %p50_p10 = scmp.ne.s32.totalorder %s4961_s10, %s4957_s30 }
  0x1e   : > { %s5106_s15 = scalar_select %p35_p7, %s4965_s11, %s37_s14  }
  0x1f   : > { %p46_p11 = por %p45_p9, %p44_p8  ;;  %p5110_p12 = por %p8977_p1, %p50_p10 }
  0x20   : > { %9032 = sst [smem:[#allocation23_spill]] %s5106_s15  ;;  %p252_p13 = scmp.eq.s32.totalorder %s5062_s16, 1 }
  0x21   : > { %p258_p0 = scmp.eq.s32.totalorder %s3937_s28, 1  ;;  %p4249_p2 = scmp.lt.s32.totalorder %s4969_s12, 2 }
  0x22   : > { %s5117_s19 = sand.u32 1, %s4965_s11   ;;  %p5119_p4 = por %p252_p13, %p44_p8 }
  0x23   : > { %p5123_p5 = por %p258_p0, %p50_p10  ;;  %p5127_p7 = pnand %p4249_p2, %p46_p11 }
  0x24   : > { %s9034_s20 = scalar_select %p5119_p4, 1, 0 }
  0x25   : > { %s9036_s21 = scalar_select %p5123_p5, 1, 0 }
  0x26   : > { %9035 = sst [smem:[#allocation24_spill]] %s9034_s20  ;;  %s360_s24 = sand.u32 1, %s4969_s12  }
  0x27   : > { %9037 = sst [smem:[#allocation25_spill]] %s9036_s21  ;;  %s3947_s25 = sshll.u32 %s5117_s19, 2 }
  0x28   : > { %s3948_s28 = sshll.u32 %s4969_s12, 2  ;;  %s364_s13 = scalar_lea.vmem [#allocation5], %s3947_s25 }
  0x29   : > { %s372_s14 = sshll.u32 %s364_s13, 4  ;;  %s9039_s1 = sld [smem:[#allocation61_spill]]  ;;  %s373_s14 = int_to_ptr.vmem [resolvable:$true] %s372_s14 }
  0x2a   : > { %s290_s21 = sshll.u32 %s8959_s4, 4  ;;  %s5141_s30 = scalar_lea.sflag [#allocation6], %s360_s24  ;;  %s291_s21 = int_to_ptr.hbm [resolvable:$true] %s290_s21 }
  0x2b   : > { %p4745_p9 = pneg %p5127_p7 }
  0x2f   : > { %s368_s3 = scalar_lea.hbm %s9039_s1, %s3948_s28  ;;  %s4748_s27 = scalar_lea.hbm %s9039_s1, 8 }
  0x30   : > { %s370_s6 = sshll.u32 %s368_s3, 4  ;;  %s371_s6 = int_to_ptr.hbm [resolvable:$true] %s370_s6 }
  0x31   : > { %s4741_s20 = sshra.s32 %s371_s6, 4  ;;  %s4742_s20 = int_to_ptr.hbm [resolvable:$true] %s4741_s20 }
  0x32   : > { %s4743_s9 = scalar_lea.hbm %s4742_s20, 4  ;;  %p4749_p13 = scmp.lt.s32.totalorder %s4742_s20, %s9039_s1 }
  0x33   : > { %p4744_p8 = scmp.ne.s32.totalorder %s4742_s20, %s4743_s9  ;;  %p4750_p0 = scmp.lt.s32.totalorder %s4748_s27, %s4743_s9 }
  0x35   : > { %p4746_p10 = pnand %p4745_p9, %p4744_p8  ;;  %p4751_p2 = por %p4750_p0, %p4749_p13 }
  0x37   : > { %p4747_p11 = pneg %p4746_p10 }
  0x39   : > { %p4752_p1 = pnand %p4751_p2, %p4747_p11 }
  0x3b   : > { %4755 = shalt.err (!%p4752_p1)
}
  0x3c   : > { %4237 = dma.hbm_to_vmem [thread:$0]  (!%p5127_p7), %s371_s6, 64, %s373_s14, %s5141_s30  }
  0x3d   : > { %s4975_s11 = smov [#allocation10]   ;;  %s4976_s24 = smov 384  }
  0x3e   : > { %s292_s29 = sshll.u32 %s4975_s11, 4  ;;  %s4977_s13 = smov 24   ;;  %s293_s29 = int_to_ptr.vmem [resolvable:$true] %s292_s29 }
  0x3f   : > { %4224 = dma.hbm_to_vmem [thread:$0]  (!%p5079_p6), %s291_s21, 1536, %s293_s29, [#allocation9], %s4976_s24, %s4976_s24, %s4977_s13  }
  0x40   : > { %s325_s26 = sshll.u32 %s8963_s8, 4  ;;  %s4978_s3 = smov [#allocation13]   ;;  %s326_s26 = int_to_ptr.hbm [resolvable:$true] %s325_s26 }
  0x41   : > { %s327_s27 = sshll.u32 %s4978_s3, 4  ;;  %s3944_s6 = sshll.u32 %s5117_s19, 7  ;;  %s328_s27 = int_to_ptr.vmem [resolvable:$true] %s327_s27 }
  0x42   : > { %4230 = dma.hbm_to_vmem [thread:$0]  (!%p5079_p6), %s326_s26, 128, %s328_s27, [#allocation12]  }
  0x43   : > { %s4175_s14 = sshll.u32 %s4969_s12, 7  ;;  %s342_s1 = scalar_lea.vmem [#allocation2], %s3944_s6 }
  0x44   : > { %s347_s11 = scalar_lea.hbm %s8955_s0, %s4175_s14  ;;  %s350_s21 = sshll.u32 %s342_s1, 4  ;;  %s351_s21 = int_to_ptr.vmem [resolvable:$true] %s350_s21 }
  0x45   : > { %s348_s15 = sshll.u32 %s347_s11, 4  ;;  %s339_s29 = scalar_lea.sflag [#allocation3], %s5117_s19  ;;  %s349_s15 = int_to_ptr.hbm [resolvable:$true] %s348_s15 }
  0x46   : > { %s4831_s24 = sshra.s32 %s349_s15, 4  ;;  %s4838_s20 = scalar_lea.hbm %s8955_s0, 256  ;;  %s4832_s24 = int_to_ptr.hbm [resolvable:$true] %s4831_s24 }
  0x47   : > { %s4833_s13 = scalar_lea.hbm %s4832_s24, 128  ;;  %p4839_p10 = scmp.lt.s32.totalorder %s4832_s24, %s8955_s0 }
  0x48   : > { %p4834_p1 = scmp.ne.s32.totalorder %s4832_s24, %s4833_s13  ;;  %p4840_p11 = scmp.lt.s32.totalorder %s4838_s20, %s4833_s13 }
  0x4a   : > { %p4836_p8 = pnand %p4834_p1, %p4745_p9  ;;  %p4841_p13 = por %p4840_p11, %p4839_p10 }
  0x4c   : > { %p4837_p6 = pneg %p4836_p8 }
  0x4e   : > { %p4842_p0 = pnand %p4841_p13, %p4837_p6 }
  0x50   : > { %4845 = shalt.err (!%p4842_p0)
}
  0x51   : > { %s9040_s1 = smov 8   ;;  %s9041_s27 = smov 128  }
  0x52   : > { %4234 = dma.hbm_to_vmem [thread:$0]  (!%p5127_p7), %s349_s15, 2048, %s351_s21, %s339_s29, %s9041_s27, %s9041_s27, %s9040_s1  }
  0x53   : > { %s4176_s6 = sshll.u32 %s4969_s12, 4  ;;  %s9042_s11 = sshll.u32 %s5117_s19, 4 }
  0x54   : > { %s388_s28 = scalar_lea.hbm %s8957_s2, %s4176_s6  ;;  %s383_s24 = scalar_lea.vmem [#allocation7], %s9042_s11 }
  0x55   : > { %s391_s13 = sshll.u32 %s383_s24, 4  ;;  %s389_s23 = sshll.u32 %s388_s28, 4  ;;  %s392_s13 = int_to_ptr.vmem [resolvable:$true] %s391_s13  ;;  %s390_s23 = int_to_ptr.hbm [resolvable:$true] %s389_s23 }
  0x56   : > { %s4861_s9 = sshra.s32 %s390_s23, 4  ;;  %s4868_s29 = scalar_lea.hbm %s8957_s2, 32  ;;  %s4862_s9 = int_to_ptr.hbm [resolvable:$true] %s4861_s9 }
  0x57   : > { %s4863_s20 = scalar_lea.hbm %s4862_s9, 16  ;;  %p4869_p6 = scmp.lt.s32.totalorder %s4862_s9, %s8957_s2 }
  0x58   : > { %p4864_p2 = scmp.ne.s32.totalorder %s4862_s9, %s4863_s20  ;;  %p4870_p10 = scmp.lt.s32.totalorder %s4868_s29, %s4863_s20 }
  0x5a   : > { %p4866_p1 = pnand %p4864_p2, %p4745_p9  ;;  %p4871_p11 = por %p4870_p10, %p4869_p6 }
  0x5c   : > { %p4867_p8 = pneg %p4866_p1 }
  0x5e   : > { %p4872_p13 = pnand %p4871_p11, %p4867_p8 }
  0x60   : > { %4875 = shalt.err (!%p4872_p13)
}
  0x61   : > { %4240 = dma.hbm_to_vmem [thread:$0]  (!%p5127_p7), %s390_s23, 256, %s392_s13, %s5141_s30, %s9041_s27, %s9041_s27, %s9040_s1  }
  0x62   : > { %403 = sbr.rel (%p5067_p3) target bundleno = 2009 (0x7d9), region = 56 }
  0x67   : > { %s5208_s19 = sand.u32 1, %s4961_s10  }
  0x68   : > { %s3953_s6 = sshll.u32 %s5208_s19, 7  ;;  %s406_s14 = scalar_lea.sflag [#allocation3], %s5208_s19 }
  0x69   : > { %s5212_s25 = scalar_lea.vmem [#allocation2], %s3953_s6 }
  0x6a   : > { %4936 = dma.done.wait (%p5110_p12), %s406_s14, 2048  }
  0x6b   : > { %4938 = vsyncadd (%p5110_p12), %s406_s14, 4294965248  ;;  %s415_s30 = sand.u32 1, %s5062_s16   ;;  %s3954_s17 = sshll.u32 %s5208_s19, 2 }
  0x6c   : > { %s416_s22 = scalar_lea.sflag [#allocation6], %s415_s30  ;;  %s5220_s1 = scalar_lea.vmem [#allocation5], %s3954_s17 }
  0x6d   : > { %4940 = dma.done.wait (%p5110_p12), %s416_s22, 320  }
  0x6e   : > { %4942 = vsyncadd (%p5110_p12), %s416_s22, 4294966976  ;;  %s3955_s27 = sshll.u32 %s5208_s19, 4  ;;  %p9043_p3 = scmp.eq.s32.totalorder %s5062_s16, 0 }
  0x6f   : > { %s5229_s28 = scalar_lea.vmem [#allocation7], %s3955_s27 }
  0x70   : > { %4944 = dma.done.wait (%p9043_p3), [#allocation9], 3584   ;;  %p9044_p7 = pmov %p9043_p3 }
  0x71   : > { %p9045_p9 = pmov %p9043_p3 }
  0x72   : > { %4946 = vsyncadd (%p9044_p7), [#allocation9], 4294963712 }
  0x73   : > { %4948 = dma.done.wait (%p9045_p9), [#allocation12], 1152   ;;  %p9046_p0 = pmov %p9043_p3 }
  0x74   : > { %v522_v0 = vld [vmem:[#allocation10 + $0x48] sm:$0xff]  ;;  %v519_v1 = vld [vmem:[#allocation10 + $0x30] sm:$0xff]  ;;  %v516_v2 = vld [vmem:[#allocation10 + $0x18] sm:$0xff]  ;;  %vm533_vm0 = vcmask 261120   ;;  %s4979_s24 = smov 112   ;;  %s4980_s13 = smov 48  }
  0x75   : > { %4950 = vsyncadd (%p9046_p0), [#allocation12], 4294966144  ;;  %594 = vmatpush.msra.mxu0 %v522_v0  ;;  %v513_v3 = vld [vmem:[#allocation10] sm:$0xff]  ;;  %v5240_v4 = vld [vmem:[%s5212_s25] sm:$0xff]  ;;  %s4981_s23 = smov 64   ;;  %s4982_s9 = smov 32  }
  0x76   : > { %v5245_v5 = vld [vmem:[%s5212_s25 + $0x8] sm:$0xff]  ;;  %v5250_v6 = vld [vmem:[%s5212_s25 + $0x10] sm:$0xff]  ;;  %v5255_v7 = vld [vmem:[%s5212_s25 + $0x18] sm:$0xff]  ;;  %s4983_s20 = smov 16   ;;  %s4984_s15 = smov 96   ;;  %vm842_vm1 = vcmask 130048  }
  0x77   : > { %595 = vmatpush.msra.mxu0 %v519_v1  ;;  %v5260_v8 = vld [vmem:[%s5212_s25 + $0x20] sm:$0xff]  ;;  %v5265_v9 = vld [vmem:[%s5212_s25 + $0x28] sm:$0xff]  ;;  %v523_v10 = vld [vmem:[#allocation10 + $0x50] sm:$0xff]  ;;  %s4985_s21 = smov 80   ;;  %s4177_s3 = sshll.u32 %s5062_s16, 4 }
  0x78   : > { %v520_v11 = vld [vmem:[#allocation10 + $0x38] sm:$0xff]  ;;  %659 = vmatpush.msra.mxu1 %v523_v10  ;;  %v517_v12 = vld [vmem:[#allocation10 + $0x20] sm:$0xff]  ;;  %v514_v13 = vld [vmem:[#allocation10 + $0x8] sm:$0xff]  ;;  %s494_s17 = scalar_lea.vmem [#allocation14], %s3955_s27  ;;  %s3768_s27 = scalar_lea.sflag [#allocation4], %s5208_s19 }
  0x79   : > { %596 = vmatpush.msra.mxu0 %v516_v2  ;;  %v5270_v14 = vld [vmem:[%s5212_s25 + $0x30] sm:$0xff]  ;;  %v5277_v15 = vld [vmem:[%s5212_s25 + $0x38] sm:$0xff]  ;;  %v5284_v16 = vld [vmem:[%s5212_s25 + $0x40] sm:$0xff]  ;;  %s3780_s22 = sshll.u32 %s494_s17, 4  ;;  %s3781_s22 = int_to_ptr.vmem [resolvable:$true] %s3780_s22 }
  0x7a   : > { %660 = vmatpush.msra.mxu1 %v520_v11  ;;  %v5291_v17 = vld [vmem:[%s5212_s25 + $0x48] sm:$0xff]  ;;  %v5298_v18 = vld [vmem:[%s5212_s25 + $0x50] sm:$0xff]  ;;  %v5305_v19 = vld [vmem:[%s5212_s25 + $0x58] sm:$0xff] }
  0x7b   : > { %597 = vmatpush.msra.mxu0 %v513_v3  ;;  %v5312_v20 = vld [vmem:[%s5212_s25 + $0x60] sm:$0xff]  ;;  %v5319_v21 = vld [vmem:[%s5212_s25 + $0x68] sm:$0xff]  ;;  %v5326_v22 = vld [vmem:[%s5212_s25 + $0x70] sm:$0xff] }
  0x7c   : > { %3961 = vmatmul.msk.f32.vlgmr.msra.gmra.mxu0 %vm533_vm0, %v5240_v4  ;;  %661 = vmatpush.msra.mxu1 %v517_v12  ;;  %v5333_v23 = vld [vmem:[%s5212_s25 + $0x78] sm:$0xff]  ;;  %v5338_v24 = vld [vmem:[%s8960_s5] sm:$0x7]  ;;  %v521_v39 = vld [vmem:[#allocation10 + $0x40] sm:$0xff]  ;;  %s9371_s25 = sld [smem:[#allocation64_spill]] }
  0x7d   : > { %v5345_v25 = vperm.slane %v5338_v24, 0  ;;  %v524_v38 = vld [vmem:[#allocation10 + $0x58] sm:$0xff]  ;;  %v518_v40 = vld [vmem:[#allocation10 + $0x28] sm:$0xff]  ;;  %v515_v41 = vld [vmem:[#allocation10 + $0x10] sm:$0xff] }
  0x7e   : > { %662 = vmatpush.msra.mxu1 %v514_v13  ;;  %724 = vmatpush.msra.mxu2 %v524_v38 }
  0x7f   : > { %3977 = vmatmul.msk.f32.vlgmr.msra.gmra.mxu1 %vm533_vm0, %v5240_v4 }
  0x80   : > { %725 = vmatpush.msra.mxu2 %v521_v39 }
  0x82   : > { %726 = vmatpush.msra.mxu2 %v518_v40  ;;  %s3779_s30 = scalar_lea.hbm %s9371_s25, %s4177_s3 }
  0x84   : > { %3962 = vmatmul.msk.f32.gmra.mxu0 %vm533_vm0, %v5245_v5  ;;  %727 = vmatpush.msra.mxu2 %v515_v41 }
  0x85   : > { %3993 = vmatmul.msk.f32.vlgmr.msra.gmra.mxu2 %vm533_vm0, %v5240_v4 }
  0x87   : > { %3978 = vmatmul.msk.f32.gmra.mxu1 %vm533_vm0, %v5245_v5 }
  0x8c   : > { %3963 = vmatmul.msk.f32.gmra.mxu0 %vm533_vm0, %v5250_v6 }
  0x8d   : > { %3994 = vmatmul.msk.f32.gmra.mxu2 %vm533_vm0, %v5245_v5 }
  0x8f   : > { %3979 = vmatmul.msk.f32.gmra.mxu1 %vm533_vm0, %v5250_v6 }
  0x94   : > { %3964 = vmatmul.msk.f32.gmra.mxu0 %vm533_vm0, %v5255_v7 }
  0x95   : > { %3995 = vmatmul.msk.f32.gmra.mxu2 %vm533_vm0, %v5250_v6 }
  0x97   : > { %3980 = vmatmul.msk.f32.gmra.mxu1 %vm533_vm0, %v5255_v7 }
  0x9c   : > { %3965 = vmatmul.msk.f32.gmra.mxu0 %vm533_vm0, %v5260_v8 }
  0x9d   : > { %3996 = vmatmul.msk.f32.gmra.mxu2 %vm533_vm0, %v5255_v7 }
  0x9f   : > { %3981 = vmatmul.msk.f32.gmra.mxu1 %vm533_vm0, %v5260_v8 }
  0xa4   : > { %3966 = vmatmul.msk.f32.gmra.mxu0 %vm533_vm0, %v5265_v9 }
  0xa5   : > { %3997 = vmatmul.msk.f32.gmra.mxu2 %vm533_vm0, %v5260_v8 }
  0xa7   : > { %3982 = vmatmul.msk.f32.gmra.mxu1 %vm533_vm0, %v5265_v9 }
  0xac   : > { %3967 = vmatmul.msk.f32.gmra.mxu0 %vm533_vm0, %v5270_v14 }
  0xad   : > { %3998 = vmatmul.msk.f32.gmra.mxu2 %vm533_vm0, %v5265_v9 }
  0xaf   : > { %3983 = vmatmul.msk.f32.gmra.mxu1 %vm533_vm0, %v5270_v14 }
  0xb4   : > { %3968 = vmatmul.msk.f32.gmra.mxu0 %vm533_vm0, %v5277_v15 }
  0xb5   : > { %3999 = vmatmul.msk.f32.gmra.mxu2 %vm533_vm0, %v5270_v14 }
  0xb7   : > { %3984 = vmatmul.msk.f32.gmra.mxu1 %vm533_vm0, %v5277_v15 }
  0xbc   : > { %3969 = vmatmul.msk.f32.gmra.mxu0 %vm533_vm0, %v5284_v16 }
  0xbd   : > { %4000 = vmatmul.msk.f32.gmra.mxu2 %vm533_vm0, %v5277_v15 }
  0xbf   : > { %3985 = vmatmul.msk.f32.gmra.mxu1 %vm533_vm0, %v5284_v16 }
  0xc4   : > { %3970 = vmatmul.msk.f32.gmra.mxu0 %vm533_vm0, %v5291_v17 }
  0xc5   : > { %4001 = vmatmul.msk.f32.gmra.mxu2 %vm533_vm0, %v5284_v16 }
  0xc7   : > { %3986 = vmatmul.msk.f32.gmra.mxu1 %vm533_vm0, %v5291_v17 }
  0xcc   : > { %3971 = vmatmul.msk.f32.gmra.mxu0 %vm533_vm0, %v5298_v18 }
  0xcd   : > { %4002 = vmatmul.msk.f32.gmra.mxu2 %vm533_vm0, %v5291_v17 }
  0xcf   : > { %3987 = vmatmul.msk.f32.gmra.mxu1 %vm533_vm0, %v5298_v18 }
  0xd4   : > { %3972 = vmatmul.msk.f32.gmra.mxu0 %vm533_vm0, %v5305_v19 }
  0xd5   : > { %4003 = vmatmul.msk.f32.gmra.mxu2 %vm533_vm0, %v5298_v18 }
  0xd7   : > { %3988 = vmatmul.msk.f32.gmra.mxu1 %vm533_vm0, %v5305_v19 }
  0xdc   : > { %3973 = vmatmul.msk.f32.gmra.mxu0 %vm533_vm0, %v5312_v20 }
  0xdd   : > { %4004 = vmatmul.msk.f32.gmra.mxu2 %vm533_vm0, %v5305_v19 }
  0xdf   : > { %3989 = vmatmul.msk.f32.gmra.mxu1 %vm533_vm0, %v5312_v20 }
  0xe4   : > { %3974 = vmatmul.msk.f32.gmra.mxu0 %vm533_vm0, %v5319_v21 }
  0xe5   : > { %4005 = vmatmul.msk.f32.gmra.mxu2 %vm533_vm0, %v5312_v20 }
  0xe7   : > { %3990 = vmatmul.msk.f32.gmra.mxu1 %vm533_vm0, %v5319_v21 }
  0xec   : > { %3975 = vmatmul.msk.f32.gmra.mxu0 %vm533_vm0, %v5326_v22 }
  0xed   : > { %4006 = vmatmul.msk.f32.gmra.mxu2 %vm533_vm0, %v5319_v21 }
  0xef   : > { %3991 = vmatmul.msk.f32.gmra.mxu1 %vm533_vm0, %v5326_v22 }
  0xf4   : > { %3976 = vmatmul.msk.f32.gmra.mxu0 %vm533_vm0, %v5333_v23 }
  0xf5   : > { %4007 = vmatmul.msk.f32.gmra.mxu2 %vm533_vm0, %v5326_v22  ;;  %v528_v22 = vperm.slane %v5338_v24, 1 }
  0xf7   : > { %3992 = vmatmul.msk.f32.gmra.mxu1 %vm533_vm0, %v5333_v23 }
  0xf9   : > { %v599_v26 = vpop.f32.mrf.mxu0 }
  0xfa   : > { %v5348_v27 = vadd.f32 %v599_v26, %v5345_v25 }
  0xfc   : > { %1406 = vrot.lane.b32.xlu2 %v5348_v27, %s4979_s24  ;;  %1438 = vrot.lane.b32.xlu1 %v5348_v27, %s4980_s13  ;;  %v5413_v43 = vpop.f32.mrf.mxu1 }
  0xfd   : > { %810 = vrot.lane.b32.xlu0 %v5348_v27, %s4981_s23  ;;  %4008 = vmatmul.msk.f32.gmra.mxu2 %vm533_vm0, %v5333_v23 }
 0x101   : > { %v602_v28 = vpop.f32.mrf.mxu0 }
 0x102   : > { %v5359_v29 = vadd.f32 %v602_v28, %v5345_v25 }
 0x104   : > { %9047 = vst [vmem:[#allocation26_spill] sm:$0xff] %v5359_v29  ;;  %1440 = vrot.lane.b32.xlu2 %v5359_v29, %s4980_s13  ;;  %812 = vrot.lane.b32.xlu1 %v5359_v29, %s4981_s23  ;;  %v5426_v46 = vpop.f32.mrf.mxu1 }
 0x105   : > { %1408 = vrot.lane.b32.xlu0 %v5359_v29, %s4979_s24 }
 0x109   : > { %v605_v30 = vpop.f32.mrf.mxu0 }
 0x10a   : > { %v5370_v31 = vadd.f32 %v605_v30, %v5345_v25 }
 0x10c   : > { %9048 = vst [vmem:[#allocation27_spill] sm:$0xff] %v5370_v31  ;;  %814 = vrot.lane.b32.xlu2 %v5370_v31, %s4981_s23  ;;  %1410 = vrot.lane.b32.xlu1 %v5370_v31, %s4979_s24  ;;  %v5439_v49 = vpop.f32.mrf.mxu1 }
 0x10d   : > { %1442 = vrot.lane.b32.xlu0 %v5370_v31, %s4980_s13 }
 0x111   : > { %v608_v32 = vpop.f32.mrf.mxu0 }
 0x112   : > { %v5381_v33 = vadd.f32 %v608_v32, %v5345_v25 }
 0x114   : > { %1412 = vrot.lane.b32.xlu2 %v5381_v33, %s4979_s24  ;;  %1444 = vrot.lane.b32.xlu1 %v5381_v33, %s4980_s13  ;;  %v5452_v52 = vpop.f32.mrf.mxu1 }
 0x115   : > { %816 = vrot.lane.b32.xlu0 %v5381_v33, %s4981_s23 }
 0x119   : > { %v611_v34 = vpop.f32.mrf.mxu0 }
 0x11a   : > { %v5392_v35 = vadd.f32 %v611_v34, %v5345_v25 }
 0x11c   : > { %1446 = vrot.lane.b32.xlu2 %v5392_v35, %s4980_s13  ;;  %818 = vrot.lane.b32.xlu1 %v5392_v35, %s4981_s23  ;;  %v5465_v54 = vpop.f32.mrf.mxu1 }
 0x11d   : > { %1414 = vrot.lane.b32.xlu0 %v5392_v35, %s4979_s24 }
 0x121   : > { %v614_v36 = vpop.f32.mrf.mxu0 }
 0x122   : > { %v5403_v37 = vadd.f32 %v614_v36, %v5345_v25 }
 0x124   : > { %820 = vrot.lane.b32.xlu2 %v5403_v37, %s4981_s23  ;;  %1416 = vrot.lane.b32.xlu1 %v5403_v37, %s4979_s24  ;;  %v5475_v56 = vpop.f32.mrf.mxu1 }
 0x125   : > { %1448 = vrot.lane.b32.xlu0 %v5403_v37, %s4980_s13 }
 0x129   : > { %v617_v42 = vpop.f32.mrf.mxu0 }
 0x12a   : > { %v5416_v44 = vadd.f32 %v617_v42, %v5345_v25 }
 0x12c   : > { %1418 = vrot.lane.b32.xlu2 %v5416_v44, %s4979_s24  ;;  %1450 = vrot.lane.b32.xlu1 %v5416_v44, %s4980_s13  ;;  %v5490_v59 = vpop.f32.mrf.mxu1 }
 0x12d   : > { %822 = vrot.lane.b32.xlu0 %v5416_v44, %s4981_s23 }
 0x131   : > { %v620_v45 = vpop.f32.mrf.mxu0 }
 0x132   : > { %v5429_v47 = vadd.f32 %v620_v45, %v5345_v25 }
 0x134   : > { %1452 = vrot.lane.b32.xlu2 %v5429_v47, %s4980_s13  ;;  %824 = vrot.lane.b32.xlu1 %v5429_v47, %s4981_s23  ;;  %v5505_v63 = vpop.f32.mrf.mxu1 }
 0x135   : > { %2157 = vrot.lane.b32.xlu0 %v5416_v44, %s4982_s9 }
 0x139   : > { %v623_v48 = vpop.f32.mrf.mxu0 }
 0x13a   : > { %v5442_v50 = vadd.f32 %v623_v48, %v5345_v25 }
 0x13c   : > { %2802 = vrot.lane.b32.xlu2 %v5429_v47, %s4983_s20  ;;  %2161 = vrot.lane.b32.xlu1 %v5442_v50, %s4982_s9  ;;  %v5520_v3 = vpop.f32.mrf.mxu1 }
 0x13d   : > { %1420 = vrot.lane.b32.xlu0 %v5429_v47, %s4979_s24 }
 0x141   : > { %v626_v51 = vpop.f32.mrf.mxu0 }
 0x142   : > { %v5455_v53 = vadd.f32 %v626_v51, %v5345_v25 }
 0x144   : > { %826 = vrot.lane.b32.xlu2 %v5442_v50, %s4981_s23  ;;  %1456 = vrot.lane.b32.xlu1 %v5455_v53, %s4980_s13  ;;  %v5536_v7 = vpop.f32.mrf.mxu1 }
 0x145   : > { %2159 = vrot.lane.b32.xlu0 %v5429_v47, %s4982_s9 }
 0x149   : > { %v629_v55 = vpop.f32.mrf.mxu0 }
 0x14a   : > { %v5488_v58 = vadd.f32 %v629_v55, %v5345_v25 }
 0x14c   : > { %1422 = vrot.lane.b32.xlu2 %v5442_v50, %s4979_s24  ;;  %1424 = vrot.lane.b32.xlu1 %v5455_v53, %s4979_s24  ;;  %v5552_v12 = vpop.f32.mrf.mxu1 }
 0x14d   : > { %1454 = vrot.lane.b32.xlu0 %v5442_v50, %s4980_s13 }
 0x151   : > { %v632_v60 = vpop.f32.mrf.mxu0 }
 0x152   : > { %v5503_v62 = vadd.f32 %v632_v60, %v5345_v25 }
 0x154   : > { %2804 = vrot.lane.b32.xlu2 %v5442_v50, %s4983_s20  ;;  %2163 = vrot.lane.b32.xlu1 %v5455_v53, %s4982_s9  ;;  %v697_v26 = vpop.f32.mrf.mxu1 }
 0x155   : > { %828 = vrot.lane.b32.xlu0 %v5455_v53, %s4981_s23 }
 0x156   : > { %v5485_v57 = vpop.permute.xlu2 %1406 }
 0x157   : > { %9049 = vst [vmem:[#allocation28_spill] sm:$0xff] %v5485_v57 }
 0x159   : > { %v635_v0 = vpop.f32.mrf.mxu0 }
 0x15a   : > { %v5518_v2 = vadd.f32 %v635_v0, %v5345_v25 }
 0x15c   : > { %1458 = vrot.lane.b32.xlu2 %v5488_v58, %s4980_s13  ;;  %830 = vrot.lane.b32.xlu1 %v5488_v58, %s4981_s23  ;;  %v700_v34 = vpop.f32.mrf.mxu1 }
 0x15d   : > { %2806 = vrot.lane.b32.xlu0 %v5455_v53, %s4983_s20 }
 0x15e   : > { %v5500_v61 = vpop.permute.xlu2 %1440 }
 0x161   : > { %v638_v8 = vpop.f32.mrf.mxu0 }
 0x162   : > { %v5569_v17 = vadd.f32 %v638_v8, %v5345_v25 }
 0x164   : > { %2165 = vrot.lane.b32.xlu2 %v5488_v58, %s4982_s9  ;;  %2810 = vrot.lane.b32.xlu1 %v5503_v62, %s4983_s20  ;;  %v703_v20 = vpop.f32.mrf.mxu1 }
 0x165   : > { %1426 = vrot.lane.b32.xlu0 %v5488_v58, %s4979_s24 }
 0x166   : > { %v5515_v1 = vpop.permute.xlu2 %814 }
 0x169   : > { %v641_v13 = vpop.f32.mrf.mxu0 }
 0x16a   : > { %v5572_v18 = vadd.f32 %v641_v13, %v5345_v25 }
 0x16c   : > { %832 = vrot.lane.b32.xlu2 %v5503_v62, %s4981_s23  ;;  %1462 = vrot.lane.b32.xlu1 %v5518_v2, %s4980_s13 }
 0x16d   : > { %2808 = vrot.lane.b32.xlu0 %v5488_v58, %s4983_s20 }
 0x16e   : > { %v5530_v4 = vpop.permute.xlu2 %1412  ;;  %v5532_v5 = vpop.permute.xlu1 %1438 }
 0x16f   : > { %9050 = vst [vmem:[#allocation29_spill] sm:$0xff] %v5530_v4  ;;  %v5534_v6 = vpop.permute.xlu0 %810 }
 0x170   : > { %9051 = vst [vmem:[#allocation30_spill] sm:$0xff] %v5532_v5 }
 0x171   : > { %v644_v19 = vpop.f32.mrf.mxu0 }
 0x172   : > { %v5603_v40 = vadd.f32 %v644_v19, %v5345_v25  ;;  %v706_v25 = vpop.f32.mrf.mxu1 }
 0x173   : > { %v5650_v23 = vadd.f32 %v706_v25, %v528_v22 }
 0x174   : > { %2167 = vrot.lane.b32.xlu2 %v5503_v62, %s4982_s9  ;;  %2812 = vrot.lane.b32.xlu1 %v5518_v2, %s4983_s20 }
 0x175   : > { %1460 = vrot.lane.b32.xlu0 %v5503_v62, %s4980_s13 }
 0x176   : > { %v5546_v9 = vpop.permute.xlu2 %1446  ;;  %v5548_v10 = vpop.permute.xlu1 %812 }
 0x177   : > { %v5550_v11 = vpop.permute.xlu0 %1408 }
 0x178   : > { %9052 = vst [vmem:[#allocation31_spill] sm:$0xff] %v5550_v11 }
 0x17a   : > { %v709_v55 = vpop.f32.mrf.mxu1 }
 0x17b   : > { %v5646_v8 = vadd.f32 %v709_v55, %v528_v22  ;;  %v5662_v55 = vadd.f32 %v700_v34, %v528_v22  ;;  %v5679_v34 = vadd.f32 %v5552_v12, %v528_v22 }
 0x17c   : > { %1428 = vrot.lane.b32.xlu2 %v5503_v62, %s4979_s24  ;;  %1430 = vrot.lane.b32.xlu1 %v5518_v2, %s4979_s24 }
 0x17d   : > { %834 = vrot.lane.b32.xlu0 %v5518_v2, %s4981_s23  ;;  %1101 = vmatpush.msrb.mxu0 %v5646_v8 }
 0x17e   : > { %v5562_v14 = vpop.permute.xlu2 %820  ;;  %v5564_v15 = vpop.permute.xlu1 %1410 }
 0x17f   : > { %9053 = vst [vmem:[#allocation32_spill] sm:$0xff] %v5564_v15  ;;  %v5566_v16 = vpop.permute.xlu0 %1442  ;;  %1102 = vmatpush.msrb.mxu0 %v5650_v23 }
 0x184   : > { %836 = vrot.lane.b32.xlu2 %v5569_v17, %s4981_s23  ;;  %838 = vrot.lane.b32.xlu1 %v5572_v18, %s4981_s23 }
 0x185   : > { %2169 = vrot.lane.b32.xlu0 %v5518_v2, %s4982_s9 }
 0x186   : > { %v5582_v28 = vpop.permute.xlu2 %1418  ;;  %v5584_v30 = vpop.permute.xlu1 %1444 }
 0x187   : > { %9054 = vst [vmem:[#allocation33_spill] sm:$0xff] %v5582_v28  ;;  %v5586_v32 = vpop.permute.xlu0 %816  ;;  %v5683_v28 = vadd.f32 %v5536_v7, %v528_v22 }
 0x18c   : > { %1464 = vrot.lane.b32.xlu2 %v5569_v17, %s4980_s13  ;;  %1466 = vrot.lane.b32.xlu1 %v5572_v18, %s4980_s13 }
 0x18d   : > { %2171 = vrot.lane.b32.xlu0 %v5569_v17, %s4982_s9 }
 0x18e   : > { %v5596_v36 = vpop.permute.xlu2 %1452  ;;  %v5598_v38 = vpop.permute.xlu1 %818 }
 0x18f   : > { %v5600_v39 = vpop.permute.xlu0 %1414 }
 0x190   : > { %9055 = vst [vmem:[#allocation34_spill] sm:$0xff] %v5600_v39 }
 0x194   : > { %2814 = vrot.lane.b32.xlu2 %v5569_v17, %s4983_s20  ;;  %2800 = vrot.lane.b32.xlu1 %v5416_v44, %s4983_s20 }
 0x195   : > { %840 = vrot.lane.b32.xlu0 %v5603_v40, %s4981_s23 }
 0x196   : > { %v5613_v41 = vpop.permute.xlu2 %2802  ;;  %v5615_v42 = vpop.permute.xlu1 %1416 }
 0x197   : > { %9056 = vst [vmem:[#allocation35_spill] sm:$0xff] %v5613_v41  ;;  %v5617_v45 = vpop.permute.xlu0 %1448  ;;  %v5655_v41 = vadd.f32 %v703_v20, %v528_v22  ;;  %v5671_v20 = vadd.f32 %v697_v26, %v528_v22  ;;  %v5691_v26 = vadd.f32 %v5520_v3, %v528_v22  ;;  %v683_v3 = vadd.f32 %v5490_v59, %v528_v22 }
 0x198   : > { %9057 = vst [vmem:[#allocation36_spill] sm:$0xff] %v5615_v42  ;;  %v5708_v42 = vadd.f32 %v5475_v56, %v528_v22  ;;  %v5725_v56 = vadd.f32 %v5452_v52, %v528_v22 }
 0x199   : > { %1103 = vmatpush.msrb.mxu0 %v5655_v41 }
 0x19b   : > { %1104 = vmatpush.msrb.mxu0 %v5662_v55 }
 0x19c   : > { %2155 = vrot.lane.b32.xlu2 %v5403_v37, %s4982_s9  ;;  %2173 = vrot.lane.b32.xlu1 %v5572_v18, %s4982_s9 }
 0x19d   : > { %1468 = vrot.lane.b32.xlu0 %v5603_v40, %s4980_s13  ;;  %1105 = vmatpush.msrb.mxu0 %v5671_v20  ;;  %s4911_s13 = scalar_lea.hbm %s9371_s25, 32 }
 0x19e   : > { %v5627_v21 = vpop.permute.xlu2 %826  ;;  %v5629_v48 = vpop.permute.xlu1 %1450 }
 0x19f   : > { %v5631_v51 = vpop.permute.xlu0 %822  ;;  %1106 = vmatpush.msrb.mxu0 %v5679_v34 }
 0x1a1   : > { %1107 = vmatpush.msrb.mxu0 %v5683_v28 }
 0x1a3   : > { %1108 = vmatpush.msrb.mxu0 %v5691_v26 }
 0x1a4   : > { %2816 = vrot.lane.b32.xlu2 %v5572_v18, %s4983_s20  ;;  %2798 = vrot.lane.b32.xlu1 %v5403_v37, %s4983_s20 }
 0x1a5   : > { %1432 = vrot.lane.b32.xlu0 %v5569_v17, %s4979_s24 }
 0x1a6   : > { %v5642_v60 = vpop.permute.xlu2 %1422  ;;  %v5644_v0 = vpop.permute.xlu1 %824 }
 0x1a7   : > { %9058 = vst [vmem:[#allocation37_spill] sm:$0xff] %v5642_v60  ;;  %v5648_v13 = vpop.permute.xlu0 %2157 }
 0x1a8   : > { %9059 = vst [vmem:[#allocation38_spill] sm:$0xff] %v5648_v13  ;;  %v5675_v13 = vpop.f32.mrf.mxu2 }
 0x1a9   : > { %9063 = vst [vmem:[#allocation42_spill] sm:$0xff] %v5675_v13 }
 0x1ac   : > { %2153 = vrot.lane.b32.xlu2 %v5392_v35, %s4982_s9  ;;  %2151 = vrot.lane.b32.xlu1 %v5381_v33, %s4982_s9 }
 0x1ad   : > { %2796 = vrot.lane.b32.xlu0 %v5392_v35, %s4983_s20 }
 0x1ae   : > { %v5667_v25 = vpop.permute.xlu2 %2804  ;;  %v5669_v19 = vpop.permute.xlu1 %2161 }
 0x1af   : > { %9060 = vst [vmem:[#allocation39_spill] sm:$0xff] %v5667_v25  ;;  %v5673_v60 = vpop.permute.xlu0 %1420  ;;  %v686_v25 = vadd.f32 %v5505_v63, %v528_v22  ;;  %v5715_v63 = vadd.f32 %v5465_v54, %v528_v22  ;;  %v5733_v54 = vadd.f32 %v5439_v49, %v528_v22  ;;  %v665_v49 = vadd.f32 %v5413_v43, %v528_v22 }
 0x1b0   : > { %9061 = vst [vmem:[#allocation40_spill] sm:$0xff] %v5669_v19  ;;  %v5703_v19 = vpop.f32.mrf.mxu2 }
 0x1b1   : > { %9062 = vst [vmem:[#allocation41_spill] sm:$0xff] %v5673_v60  ;;  %1109 = vmatpush.msrb.mxu0 %v686_v25 }
 0x1b2   : > { %9065 = vst [vmem:[#allocation44_spill] sm:$0xff] %v5703_v19  ;;  %v4309_v19 = vpack.i.bf16 %v5679_v34, %v5671_v20 }
 0x1b3   : > { %1110 = vmatpush.msrb.mxu0 %v683_v3 }
 0x1b4   : > { %1434 = vrot.lane.b32.xlu2 %v5572_v18, %s4979_s24  ;;  %2149 = vrot.lane.b32.xlu1 %v5370_v31, %s4982_s9 }
 0x1b5   : > { %2794 = vrot.lane.b32.xlu0 %v5381_v33, %s4983_s20  ;;  %1111 = vmatpush.msrb.mxu0 %v5708_v42 }
 0x1b6   : > { %v5696_v12 = vpop.permute.xlu2 %1458  ;;  %v5698_v7 = vpop.permute.xlu1 %1456 }
 0x1b7   : > { %v5701_v60 = vpop.permute.xlu0 %2159  ;;  %1112 = vmatpush.msrb.mxu0 %v5715_v63 }
 0x1b8   : > { %9064 = vst [vmem:[#allocation43_spill] sm:$0xff] %v5701_v60  ;;  %v5729_v4 = vpop.f32.mrf.mxu2 }
 0x1b9   : > { %1113 = vmatpush.msrb.mxu0 %v5725_v56 }
 0x1bb   : > { %1114 = vmatpush.msrb.mxu0 %v5733_v54 }
 0x1bc   : > { %2792 = vrot.lane.b32.xlu2 %v5370_v31, %s4983_s20  ;;  %2788 = vrot.lane.b32.xlu1 %v5348_v27, %s4983_s20 }
 0x1bd   : > { %2147 = vrot.lane.b32.xlu0 %v5359_v29, %s4982_s9 }
 0x1be   : > { %v5720_v59 = vpop.permute.xlu2 %2165  ;;  %v5722_v60 = vpop.permute.xlu1 %1424 }
 0x1bf   : > { %9066 = vst [vmem:[#allocation45_spill] sm:$0xff] %v5720_v59  ;;  %v5727_v39 = vpop.permute.xlu0 %1454  ;;  %v5739_v59 = vadd.f32 %v5426_v46, %v528_v22 }
 0x1c0   : > { %9067 = vst [vmem:[#allocation46_spill] sm:$0xff] %v5722_v60  ;;  %v5756_v60 = vpop.f32.mrf.mxu2 }
 0x1c1   : > { %1115 = vmatpush.msrb.mxu0 %v5739_v59 }
 0x1c3   : > { %1116 = vmatpush.msrb.mxu0 %v665_v49 }
 0x1c4   : > { %2790 = vrot.lane.b32.xlu2 %v5359_v29, %s4983_s20  ;;  %2115 = vrot.lane.b32.xlu1 %v5359_v29, %s4984_s15 }
 0x1c5   : > { %2145 = vrot.lane.b32.xlu0 %v5348_v27, %s4982_s9 }
 0x1c6   : > { %v5750_v52 = vpop.permute.xlu2 %832  ;;  %v5752_v46 = vpop.permute.xlu1 %2163 }
 0x1c7   : > { %9068 = vst [vmem:[#allocation47_spill] sm:$0xff] %v5752_v46  ;;  %v5754_v15 = vpop.permute.xlu0 %828 }
 0x1c8   : > { %v5770_v11 = vpop.f32.mrf.mxu2 }
 0x1cc   : > { %2113 = vrot.lane.b32.xlu2 %v5348_v27, %s4984_s15  ;;  %2760 = vrot.lane.b32.xlu1 %v5370_v31, %s4985_s21 }
 0x1cd   : > { %2756 = vrot.lane.b32.xlu0 %v5348_v27, %s4985_s21 }
 0x1ce   : > { %v5764_v43 = vpop.permute.xlu2 %2167  ;;  %v5766_v22 = vpop.permute.xlu1 %830 }
 0x1cf   : > { %9069 = vst [vmem:[#allocation48_spill] sm:$0xff] %v5764_v43  ;;  %v5768_v46 = vpop.permute.xlu0 %2806 }
 0x1d0   : > { %9070 = vst [vmem:[#allocation49_spill] sm:$0xff] %v5768_v46  ;;  %v5784_v13 = vpop.f32.mrf.mxu2  ;;  %v4304_v46 = vpack.i.bf16 %v5662_v55, %v5655_v41 }
 0x1d4   : > { %2758 = vrot.lane.b32.xlu2 %v5359_v29, %s4985_s21  ;;  %2762 = vrot.lane.b32.xlu1 %v5381_v33, %s4985_s21 }
 0x1d5   : > { %2117 = vrot.lane.b32.xlu0 %v5370_v31, %s4984_s15 }
 0x1d6   : > { %v5778_v57 = vpop.permute.xlu2 %1428  ;;  %v5780_v5 = vpop.permute.xlu1 %2810 }
 0x1d7   : > { %9071 = vst [vmem:[#allocation50_spill] sm:$0xff] %v5778_v57  ;;  %v5782_v43 = vpop.permute.xlu0 %1426 }
 0x1d8   : > { %9072 = vst [vmem:[#allocation51_spill] sm:$0xff] %v5780_v5  ;;  %v5797_v5 = vpop.f32.mrf.mxu2 }
 0x1d9   : > { %9073 = vst [vmem:[#allocation52_spill] sm:$0xff] %v5782_v43  ;;  %v4319_v43 = vpack.i.bf16 %v683_v3, %v686_v25  ;;  %v4314_v25 = vpack.i.bf16 %v5691_v26, %v5683_v28 }
 0x1dc   : > { %4305 = vrot.lane.b32.xlu2 %v4304_v46, %s4981_s23  ;;  %2121 = vrot.lane.b32.xlu1 %v5392_v35, %s4984_s15 }
 0x1dd   : > { %2119 = vrot.lane.b32.xlu0 %v5381_v33, %s4984_s15 }
 0x1de   : > { %v837_v31 = vpop.permute.xlu2 %836  ;;  %v5793_v29 = vpop.permute.xlu1 %1462 }
 0x1df   : > { %v5795_v57 = vpop.permute.xlu0 %2808 }
 0x1e0   : > { %9074 = vst [vmem:[#allocation53_spill] sm:$0xff] %v5795_v57  ;;  %v5811_v57 = vpop.f32.mrf.mxu2 }
 0x1e4   : > { %2764 = vrot.lane.b32.xlu2 %v5392_v35, %s4985_s21  ;;  %4320 = vrot.lane.b32.xlu1 %v4319_v43, %s4981_s23  ;;  %v4324_v43 = vpack.i.bf16 %v5715_v63, %v5708_v42  ;;  %v9079_v42 = vpack.i.bf16 %v5650_v23, %v5646_v8  ;;  %v5860_v8 = vperm.slane %v5338_v24, 2 }
 0x1e5   : > { %4310 = vrot.lane.b32.xlu0 %v4309_v19, %s4981_s23 }
 0x1e6   : > { %v5805_v41 = vpop.permute.xlu2 %1464  ;;  %v5807_v55 = vpop.permute.xlu1 %2812 }
 0x1e7   : > { %9075 = vst [vmem:[#allocation54_spill] sm:$0xff] %v5807_v55  ;;  %v5809_v46 = vpop.permute.xlu0 %1460  ;;  %v4339_v55 = vpack.i.bf16 %v665_v49, %v5739_v59  ;;  %v9080_v59 = vpack.i.bf16 %v5733_v54, %v5725_v56 }
 0x1e8   : > { %v5824_v3 = vpop.f32.mrf.mxu2 }
 0x1ec   : > { %2123 = vrot.lane.b32.xlu2 %v5403_v37, %s4984_s15  ;;  %2175 = vrot.lane.b32.xlu1 %v5603_v40, %s4982_s9 }
 0x1ed   : > { %4315 = vrot.lane.b32.xlu0 %v4314_v25, %s4981_s23 }
 0x1ee   : > { %v5820_v19 = vpop.permute.xlu2 %2814  ;;  %v5822_v20 = vpop.permute.xlu1 %1430 }
 0x1ef   : > { %9076 = vst [vmem:[#allocation55_spill] sm:$0xff] %v5820_v19  ;;  %v835_v34 = vpop.permute.xlu0 %834 }
 0x1f0   : > { %9077 = vst [vmem:[#allocation56_spill] sm:$0xff] %v5822_v20  ;;  %v5837_v20 = vpop.f32.mrf.mxu2 }
 0x1f4   : > { %4325 = vrot.lane.b32.xlu2 %v4324_v43, %s4981_s23  ;;  %1436 = vrot.lane.b32.xlu1 %v5603_v40, %s4979_s24 }
 0x1f5   : > { %2766 = vrot.lane.b32.xlu0 %v5403_v37, %s4985_s21 }
 0x1f6   : > { %v5833_v28 = vpop.permute.xlu2 %2155  ;;  %v839_v26 = vpop.permute.xlu1 %838 }
 0x1f7   : > { %9078 = vst [vmem:[#allocation57_spill] sm:$0xff] %v5833_v28  ;;  %v5835_v25 = vpop.permute.xlu0 %2169 }
 0x1f8   : > { %v759_v19 = vpop.f32.mrf.mxu2 }
 0x1f9   : > { %v5869_v56 = vadd.f32 %v759_v19, %v5860_v8 }
 0x1fc   : > { %4330 = vrot.lane.b32.xlu2 %v9079_v42, %s4981_s23  ;;  %4340 = vrot.lane.b32.xlu1 %v4339_v55, %s4981_s23 }
 0x1fd   : > { %2818 = vrot.lane.b32.xlu0 %v5603_v40, %s4983_s20 }
 0x1fe   : > { %v5847_v63 = vpop.permute.xlu2 %2816  ;;  %v1467_v43 = vpop.permute.xlu1 %1466 }
 0x1ff   : > { %v5849_v28 = vpop.permute.xlu0 %2171 }
 0x200   : > { %v762_v42 = vpop.f32.mrf.mxu2 }
 0x201   : > { %v5872_v54 = vadd.f32 %v762_v42, %v5860_v8 }
 0x204   : > { %4335 = vrot.lane.b32.xlu2 %v9080_v59, %s4981_s23  ;;  %2770 = vrot.lane.b32.xlu1 %v5429_v47, %s4985_s21 }
 0x205   : > { %2127 = vrot.lane.b32.xlu0 %v5429_v47, %s4984_s15 }
 0x206   : > { %v5862_v23 = vpop.permute.xlu2 %2153  ;;  %v5864_v49 = vpop.permute.xlu1 %2800 }
 0x207   : > { %v841_v55 = vpop.permute.xlu0 %840 }
 0x208   : > { %4009 = vmatpush.xpose.msk.msrb.mxu2 %vm842_vm1, %v841_v55  ;;  %4178 = vmatpush.xpose.msk.msra.mxu3 %vm842_vm1, %v841_v55  ;;  %v765_v42 = vpop.f32.mrf.mxu2 }
 0x20c   : > { %4010 = vmatpush.xpose.msk.msrb.mxu2 %vm842_vm1, %v839_v26  ;;  %4179 = vmatpush.xpose.msk.msra.mxu3 %vm842_vm1, %v839_v26 }
 0x20d   : > { %2125 = vrot.lane.b32.xlu2 %v5416_v44, %s4984_s15  ;;  %2131 = vrot.lane.b32.xlu1 %v5455_v53, %s4984_s15 }
 0x20e   : > { %2129 = vrot.lane.b32.xlu0 %v5442_v50, %s4984_s15  ;;  %v5884_v19 = vpop.permute.xlu2 %1434  ;;  %v5886_v59 = vpop.permute.xlu1 %2173 }
 0x20f   : > { %9081 = vst [vmem:[#allocation58_spill] sm:$0xff] %v5884_v19  ;;  %v1469_v55 = vpop.permute.xlu0 %1468 }
 0x210   : > { %4011 = vmatpush.xpose.msk.msrb.mxu2 %vm842_vm1, %v837_v31  ;;  %4180 = vmatpush.xpose.msk.msra.mxu3 %vm842_vm1, %v837_v31  ;;  %v768_v24 = vpop.f32.mrf.mxu2 }
 0x211   : > { %4041 = vmatpush.xpose.msk.msrb.mxu1 %vm842_vm1, %v1469_v55 }
 0x214   : > { %4012 = vmatpush.xpose.msk.msrb.mxu2 %vm842_vm1, %v835_v34  ;;  %4181 = vmatpush.xpose.msk.msra.mxu3 %vm842_vm1, %v835_v34  ;;  %v5911_v34 = vadd.f32 %v765_v42, %v5860_v8 }
 0x215   : > { %4042 = vmatpush.xpose.msk.msrb.mxu1 %vm842_vm1, %v1467_v43  ;;  %2768 = vrot.lane.b32.xlu2 %v5416_v44, %s4985_s21  ;;  %v5914_v43 = vadd.f32 %v768_v24, %v5860_v8 }
 0x216   : > { %2135 = vrot.lane.b32.xlu1 %v5503_v62, %s4984_s15  ;;  %2774 = vrot.lane.b32.xlu0 %v5455_v53, %s4985_s21  ;;  %v5900_v26 = vpop.permute.xlu2 %2792  ;;  %v5902_v31 = vpop.permute.xlu1 %2798 }
 0x217   : > { %v5904_v55 = vpop.permute.xlu0 %1432 }
 0x218   : > { %4013 = vmatpush.xpose.msk.msrb.mxu2 %vm842_vm1, %v5750_v52  ;;  %4182 = vmatpush.xpose.msk.msra.mxu3 %vm842_vm1, %v5750_v52  ;;  %v771_v42 = vpop.f32.mrf.mxu2 }
 0x219   : > { %4043 = vmatpush.xpose.msk.msrb.mxu1 %vm842_vm1, %v5805_v41 }
 0x21c   : > { %4014 = vmatpush.xpose.msk.msrb.mxu2 %vm842_vm1, %v5766_v22  ;;  %4183 = vmatpush.xpose.msk.msra.mxu3 %vm842_vm1, %v5766_v22 }
 0x21d   : > { %4044 = vmatpush.xpose.msk.msrb.mxu1 %vm842_vm1, %v5793_v29  ;;  %2772 = vrot.lane.b32.xlu2 %v5442_v50, %s4985_s21 }
 0x21e   : > { %2139 = vrot.lane.b32.xlu1 %v5569_v17, %s4984_s15  ;;  %2133 = vrot.lane.b32.xlu0 %v5488_v58, %s4984_s15  ;;  %v5932_v52 = vpop.permute.xlu2 %2790  ;;  %v5934_v41 = vpop.permute.xlu1 %2151 }
 0x21f   : > { %v5936_v24 = vpop.permute.xlu0 %2796 }
 0x220   : > { %4015 = vmatpush.xpose.msk.msrb.mxu2 %vm842_vm1, %v5754_v15  ;;  %4184 = vmatpush.xpose.msk.msra.mxu3 %vm842_vm1, %v5754_v15 }
 0x221   : > { %4045 = vmatpush.xpose.msk.msrb.mxu1 %vm842_vm1, %v5809_v46  ;;  %v774_v46 = vpop.f32.mrf.mxu2 }
 0x224   : > { %4016 = vmatpush.xpose.msk.msrb.mxu2 %vm842_vm1, %v5627_v21  ;;  %4185 = vmatpush.xpose.msk.msra.mxu3 %vm842_vm1, %v5627_v21  ;;  %v5967_v21 = vadd.f32 %v771_v42, %v5860_v8 }
 0x225   : > { %4046 = vmatpush.xpose.msk.msrb.mxu1 %vm842_vm1, %v5696_v12  ;;  %2776 = vrot.lane.b32.xlu2 %v5488_v58, %s4985_s21  ;;  %v5970_v12 = vadd.f32 %v774_v46, %v5860_v8 }
 0x226   : > { %2143 = vrot.lane.b32.xlu1 %v5603_v40, %s4984_s15  ;;  %2778 = vrot.lane.b32.xlu0 %v5503_v62, %s4985_s21  ;;  %v5956_v29 = vpop.permute.xlu2 %2113  ;;  %v5958_v15 = vpop.permute.xlu1 %2149 }
 0x227   : > { %v5960_v22 = vpop.permute.xlu0 %2794  ;;  %2435 = vmatpush.msra.mxu0 %v5970_v12 }
 0x228   : > { %4017 = vmatpush.xpose.msk.msrb.mxu2 %vm842_vm1, %v5644_v0  ;;  %4186 = vmatpush.xpose.msk.msra.mxu3 %vm842_vm1, %v5644_v0 }
 0x229   : > { %4047 = vmatpush.xpose.msk.msrb.mxu1 %vm842_vm1, %v5698_v7  ;;  %2436 = vmatpush.msra.mxu0 %v5967_v21 }
 0x22b   : > { %2437 = vmatpush.msra.mxu0 %v5914_v43 }
 0x22c   : > { %4018 = vmatpush.xpose.msk.msrb.mxu2 %vm842_vm1, %v5631_v51  ;;  %4187 = vmatpush.xpose.msk.msra.mxu3 %vm842_vm1, %v5631_v51 }
 0x22d   : > { %4048 = vmatpush.xpose.msk.msrb.mxu1 %vm842_vm1, %v5727_v39  ;;  %2137 = vrot.lane.b32.xlu2 %v5518_v2, %s4984_s15  ;;  %v6019_v39 = vadd.f32 %v5837_v20, %v5860_v8  ;;  %v6054_v20 = vadd.f32 %v5797_v5, %v5860_v8  ;;  %v6072_v5 = vadd.f32 %v5770_v11, %v5860_v8 }
 0x22e   : > { %2782 = vrot.lane.b32.xlu0 %v5569_v17, %s4985_s21  ;;  %v5987_v0 = vpop.permute.xlu2 %2758  ;;  %v5989_v7 = vpop.permute.xlu1 %2788  ;;  %2438 = vmatpush.msra.mxu0 %v5911_v34 }
 0x22f   : > { %v5992_v42 = vpop.permute.xlu0 %2147  ;;  %9083 = vst [vmem:[#allocation60_spill] sm:$0xff] %v6072_v5 }
 0x230   : > { %4019 = vmatpush.xpose.msk.msrb.mxu2 %vm842_vm1, %v5562_v14  ;;  %4188 = vmatpush.xpose.msk.msra.mxu3 %vm842_vm1, %v5562_v14 }
 0x231   : > { %4049 = vmatpush.xpose.msk.msrb.mxu1 %vm842_vm1, %v5596_v36  ;;  %2439 = vmatpush.msra.mxu0 %v5872_v54 }
 0x233   : > { %2440 = vmatpush.msra.mxu0 %v5869_v56 }
 0x234   : > { %4020 = vmatpush.xpose.msk.msrb.mxu2 %vm842_vm1, %v5598_v38  ;;  %4189 = vmatpush.xpose.msk.msra.mxu3 %vm842_vm1, %v5598_v38 }
 0x235   : > { %4050 = vmatpush.xpose.msk.msrb.mxu1 %vm842_vm1, %v5629_v48  ;;  %2780 = vrot.lane.b32.xlu2 %v5518_v2, %s4985_s21  ;;  %v6032_v48 = vadd.f32 %v5824_v3, %v5860_v8 }
 0x236   : > { %2786 = vrot.lane.b32.xlu0 %v5603_v40, %s4985_s21  ;;  %v6012_v14 = vpop.permute.xlu2 %4305  ;;  %v6014_v36 = vpop.permute.xlu1 %2115  ;;  %2441 = vmatpush.msra.mxu0 %v6019_v39 }
 0x237   : > { %v6021_v38 = vpop.permute.xlu0 %2145 }
 0x238   : > { %4021 = vmatpush.xpose.msk.msrb.mxu2 %vm842_vm1, %v5586_v32  ;;  %4190 = vmatpush.xpose.msk.msra.mxu3 %vm842_vm1, %v5586_v32  ;;  %v6041_v32 = vadd.f32 %v5811_v57, %v5860_v8  ;;  %v6067_v57 = vadd.f32 %v5784_v13, %v5860_v8  ;;  %v9088_v13 = vld [vmem:[#allocation30_spill] sm:$0xff] }
 0x239   : > { %4051 = vmatpush.xpose.msk.msrb.mxu1 %vm842_vm1, %v5617_v45  ;;  %2442 = vmatpush.msra.mxu0 %v6032_v48 }
 0x23a   : > { %9082 = vst [vmem:[#allocation59_spill] sm:$0xff] %v6067_v57 }
 0x23b   : > { %2443 = vmatpush.msra.mxu0 %v6041_v32 }
 0x23c   : > { %4022 = vmatpush.xpose.msk.msrb.mxu2 %vm842_vm1, %v5515_v1  ;;  %4191 = vmatpush.xpose.msk.msra.mxu3 %vm842_vm1, %v5515_v1 }
 0x23d   : > { %4052 = vmatpush.xpose.msk.msrb.mxu1 %vm842_vm1, %v5546_v9  ;;  %2141 = vrot.lane.b32.xlu2 %v5572_v18, %s4984_s15  ;;  %v6084_v9 = vadd.f32 %v5756_v60, %v5860_v8 }
 0x23e   : > { %v6047_v45 = vpop.permute.xlu2 %2764  ;;  %v6049_v51 = vpop.permute.xlu1 %2760  ;;  %2444 = vmatpush.msra.mxu0 %v6054_v20 }
 0x23f   : > { %v6056_v1 = vpop.permute.xlu0 %2756 }
 0x240   : > { %4023 = vmatpush.xpose.msk.msrb.mxu2 %vm842_vm1, %v5548_v10  ;;  %4192 = vmatpush.xpose.msk.msra.mxu3 %vm842_vm1, %v5548_v10 }
 0x241   : > { %4053 = vmatpush.xpose.msk.msrb.mxu1 %vm842_vm1, %v5584_v30  ;;  %2445 = vmatpush.msra.mxu0 %v6067_v57  ;;  %v9084_v30 = vld [vmem:[#allocation44_spill] sm:$0xff] }
 0x242   : > { %v6106_v60 = vadd.f32 %v9084_v30, %v5860_v8 }
 0x243   : > { %2446 = vmatpush.msra.mxu0 %v6072_v5  ;;  %v9091_v5 = vld [vmem:[#allocation27_spill] sm:$0xff] }
 0x244   : > { %4024 = vmatpush.xpose.msk.msrb.mxu2 %vm842_vm1, %v5534_v6  ;;  %4193 = vmatpush.xpose.msk.msra.mxu3 %vm842_vm1, %v5534_v6  ;;  %9085 = vst [vmem:[#allocation44_spill] sm:$0xff] %v6106_v60 }
 0x245   : > { %4054 = vmatpush.xpose.msk.msrb.mxu1 %vm842_vm1, %v5566_v16  ;;  %2784 = vrot.lane.b32.xlu2 %v5572_v18, %s4985_s21  ;;  %v6099_v16 = vadd.f32 %v5729_v4, %v5860_v8 }
 0x246   : > { %v6086_v10 = vpop.permute.xlu2 %2123  ;;  %v6088_v11 = vpop.permute.xlu1 %2762  ;;  %2447 = vmatpush.msra.mxu0 %v6084_v9 }
 0x247   : > { %4025 = vmatmul.msk.f32.vlgmr.msrb.gmra.mxu2 %vm842_vm1, %v5348_v27  ;;  %4029 = vmatmul.msk.f32.vlgmr.msra.gmra.mxu3 %vm842_vm1, %v5392_v35  ;;  %v6095_v6 = vpop.permute.xlu0 %2117  ;;  %v9086_v27 = vld [vmem:[#allocation42_spill] sm:$0xff] }
 0x248   : > { %v6111_v35 = vadd.f32 %v9086_v27, %v5860_v8  ;;  %2448 = vmatpush.msra.mxu0 %v6099_v16  ;;  %v9090_v8 = vld [vmem:[#allocation28_spill] sm:$0xff] }
 0x249   : > { %4055 = vmatpush.xpose.msk.msrb.mxu1 %vm842_vm1, %v5500_v61  ;;  %v9089_v61 = vld [vmem:[#allocation26_spill] sm:$0xff] }
 0x24a   : > { %9087 = vst [vmem:[#allocation42_spill] sm:$0xff] %v6111_v35  ;;  %2449 = vmatpush.msra.mxu0 %v6106_v60  ;;  %v9092_v60 = vld [vmem:[#allocation31_spill] sm:$0xff] }
 0x24c   : > { %2450 = vmatpush.msra.mxu0 %v6111_v35 }
 0x24d   : > { %4056 = vmatpush.xpose.msk.msrb.mxu1 %vm842_vm1, %v9088_v13 }
 0x24e   : > { %v4326_v4 = vpop.permute.xlu2 %4325  ;;  %v6116_v3 = vpop.permute.xlu1 %2121 }
 0x24f   : > { %4026 = vmatmul.msk.f32.gmra.mxu2 %vm842_vm1, %v9089_v61  ;;  %4030 = vmatmul.msk.f32.gmra.mxu3 %vm842_vm1, %v5403_v37  ;;  %v6123_v46 = vpop.permute.xlu0 %2119  ;;  %v4307_v37 = vunpack.i.l.bf16 %v6012_v14 }
 0x250   : > { %4057 = vmatmul.msk.f32.vlgmr.msrb.gmra.mxu1 %vm842_vm1, %v9090_v8  ;;  %v4308_v8 = vunpack.i.h.bf16 %v6012_v14 }
 0x256   : > { %v4331_v30 = vpop.permute.xlu2 %4330  ;;  %v4321_v27 = vpop.permute.xlu1 %4320 }
 0x257   : > { %v4333_v13 = vunpack.i.h.bf16 %v4331_v30  ;;  %v4332_v19 = vunpack.i.l.bf16 %v4331_v30  ;;  %4027 = vmatmul.msk.f32.gmra.mxu2 %vm842_vm1, %v9091_v5  ;;  %4031 = vmatmul.msk.f32.gmra.mxu3 %vm842_vm1, %v5416_v44  ;;  %v4311_v61 = vpop.permute.xlu0 %4310  ;;  %v9093_v30 = vld [vmem:[#allocation32_spill] sm:$0xff] }
 0x258   : > { %4058 = vmatmul.msk.f32.gmra.mxu1 %vm842_vm1, %v9092_v60  ;;  %v4312_v35 = vunpack.i.l.bf16 %v4311_v61  ;;  %v4313_v5 = vunpack.i.h.bf16 %v4311_v61  ;;  %v4322_v60 = vunpack.i.l.bf16 %v4321_v27  ;;  %v9094_v61 = vld [vmem:[#allocation29_spill] sm:$0xff] }
 0x259   : > { %1792 = vmatpush.msra.mxu2 %v4332_v19 }
 0x25b   : > { %1793 = vmatpush.msra.mxu2 %v4333_v13  ;;  %v4323_v13 = vunpack.i.h.bf16 %v4321_v27 }
 0x25d   : > { %1794 = vmatpush.msra.mxu2 %v4307_v37  ;;  %v9095_v37 = vld [vmem:[#allocation34_spill] sm:$0xff] }
 0x25e   : > { %v2176_v57 = vpop.permute.xlu1 %2175 }
 0x25f   : > { %4028 = vmatmul.msk.f32.gmra.mxu2 %vm842_vm1, %v5381_v33  ;;  %4032 = vmatmul.msk.f32.gmra.mxu3 %vm842_vm1, %v5429_v47  ;;  %v4316_v44 = vpop.permute.xlu0 %4315 }
 0x260   : > { %4059 = vmatmul.msk.f32.gmra.mxu1 %vm842_vm1, %v9093_v30  ;;  %1795 = vmatpush.msra.mxu2 %v4308_v8  ;;  %v4317_v19 = vunpack.i.l.bf16 %v4316_v44  ;;  %v4318_v14 = vunpack.i.h.bf16 %v4316_v44  ;;  %v9099_v30 = vld [vmem:[#allocation47_spill] sm:$0xff] }
 0x261   : > { %4073 = vmatpush.xpose.msk.msrb.mxu3 %vm842_vm1, %v2176_v57  ;;  %v4327_v57 = vunpack.i.l.bf16 %v4326_v4 }
 0x262   : > { %1796 = vmatpush.msra.mxu2 %v4312_v35  ;;  %v4328_v35 = vunpack.i.h.bf16 %v4326_v4  ;;  %v9097_v4 = vld [vmem:[#allocation45_spill] sm:$0xff] }
 0x264   : > { %1797 = vmatpush.msra.mxu2 %v4313_v5  ;;  %v9098_v5 = vld [vmem:[#allocation36_spill] sm:$0xff] }
 0x265   : > { %4074 = vmatpush.xpose.msk.msrb.mxu3 %vm842_vm1, %v5886_v59  ;;  %v4336_v59 = vpop.permute.xlu2 %4335 }
 0x266   : > { %1798 = vmatpush.msra.mxu2 %v4317_v19  ;;  %v6145_v33 = vpop.permute.xlu1 %1436  ;;  %v4337_v27 = vunpack.i.l.bf16 %v4336_v59  ;;  %v4338_v44 = vunpack.i.h.bf16 %v4336_v59  ;;  %v9100_v19 = vld [vmem:[#allocation55_spill] sm:$0xff]  ;;  %v9108_v59 = vld [vmem:[#allocation41_spill] sm:$0xff] }
 0x267   : > { %4033 = vmatmul.msk.f32.gmra.mxu3 %vm842_vm1, %v5442_v50  ;;  %v6149_v47 = vpop.permute.xlu0 %2766 }
 0x268   : > { %4060 = vmatmul.msk.f32.gmra.mxu1 %vm842_vm1, %v9094_v61  ;;  %1799 = vmatpush.msra.mxu2 %v4318_v14  ;;  %v9101_v14 = vld [vmem:[#allocation40_spill] sm:$0xff]  ;;  %v9106_v61 = vld [vmem:[#allocation38_spill] sm:$0xff] }
 0x269   : > { %4075 = vmatpush.xpose.msk.msrb.mxu3 %vm842_vm1, %v5849_v28  ;;  %v9096_v28 = vld [vmem:[#allocation48_spill] sm:$0xff] }
 0x26a   : > { %1800 = vmatpush.msra.mxu2 %v4322_v60  ;;  %v9102_v60 = vld [vmem:[#allocation54_spill] sm:$0xff] }
 0x26c   : > { %1801 = vmatpush.msra.mxu2 %v4323_v13  ;;  %v9105_v13 = vld [vmem:[#allocation51_spill] sm:$0xff] }
 0x26d   : > { %4076 = vmatpush.xpose.msk.msrb.mxu3 %vm842_vm1, %v5835_v25 }
 0x26e   : > { %1802 = vmatpush.msra.mxu2 %v4327_v57  ;;  %v4341_v8 = vpop.permute.xlu1 %4340  ;;  %v9107_v57 = vld [vmem:[#allocation53_spill] sm:$0xff] }
 0x26f   : > { %4034 = vmatmul.msk.f32.gmra.mxu3 %vm842_vm1, %v5455_v53  ;;  %v2819_v50 = vpop.permute.xlu0 %2818  ;;  %v4342_v25 = vunpack.i.l.bf16 %v4341_v8  ;;  %v4343_v53 = vunpack.i.h.bf16 %v4341_v8 }
 0x270   : > { %4061 = vmatmul.msk.f32.gmra.mxu1 %vm842_vm1, %v9095_v37  ;;  %1803 = vmatpush.msra.mxu2 %v4328_v35  ;;  %v9110_v35 = vld [vmem:[#allocation49_spill] sm:$0xff] }
 0x271   : > { %4077 = vmatpush.xpose.msk.msrb.mxu3 %vm842_vm1, %v9096_v28  ;;  %4105 = vmatpush.xpose.msk.msra.mxu1 %vm842_vm1, %v2819_v50  ;;  %v9111_v50 = vld [vmem:[#allocation39_spill] sm:$0xff] }
 0x272   : > { %1804 = vmatpush.msra.mxu2 %v4337_v27  ;;  %v9112_v27 = vld [vmem:[#allocation37_spill] sm:$0xff] }
 0x274   : > { %1805 = vmatpush.msra.mxu2 %v4338_v44  ;;  %v2126_v44 = vpop.permute.xlu2 %2125 }
 0x275   : > { %4078 = vmatpush.xpose.msk.msrb.mxu3 %vm842_vm1, %v9097_v4  ;;  %4106 = vmatpush.xpose.msk.msra.mxu1 %vm842_vm1, %v5847_v63  ;;  %v9104_v63 = vld [vmem:[#allocation43_spill] sm:$0xff] }
 0x276   : > { %1806 = vmatpush.msra.mxu2 %v4342_v25  ;;  %v6306_v25 = vld [vmem:[#allocation8 + $0x10] sm:$0xff] }
 0x277   : > { %4035 = vmatmul.msk.f32.gmra.mxu3 %vm842_vm1, %v5488_v58  ;;  %v9103_v58 = vld [vmem:[#allocation33_spill] sm:$0xff]  ;;  %v6308_v4 = vld [vmem:[#allocation8 + $0x30] sm:$0xff] }
 0x278   : > { %4062 = vmatmul.msk.f32.gmra.mxu1 %vm842_vm1, %v9098_v5  ;;  %1807 = vmatpush.msra.mxu2 %v4343_v53  ;;  %v2128_v53 = vpop.permute.xlu0 %2127  ;;  %v6310_v5 = vld [vmem:[#allocation8 + $0x28] sm:$0xff] }
 0x279   : > { %4079 = vmatpush.xpose.msk.msrb.mxu3 %vm842_vm1, %v9099_v30  ;;  %4107 = vmatpush.xpose.msk.msra.mxu1 %vm842_vm1, %v9100_v19 }
 0x27d   : > { %4080 = vmatpush.xpose.msk.msrb.mxu3 %vm842_vm1, %v9101_v14  ;;  %4108 = vmatpush.xpose.msk.msra.mxu1 %vm842_vm1, %v9102_v60 }
 0x27f   : > { %4036 = vmatmul.msk.f32.gmra.mxu3 %vm842_vm1, %v5503_v62  ;;  %v9109_v62 = vld [vmem:[#allocation57_spill] sm:$0xff] }
 0x280   : > { %4063 = vmatmul.msk.f32.gmra.mxu1 %vm842_vm1, %v9103_v58 }
 0x281   : > { %4081 = vmatpush.xpose.msk.msrb.mxu3 %vm842_vm1, %v9104_v63  ;;  %4109 = vmatpush.xpose.msk.msra.mxu1 %vm842_vm1, %v9105_v13 }
 0x285   : > { %4082 = vmatpush.xpose.msk.msrb.mxu3 %vm842_vm1, %v9106_v61  ;;  %4110 = vmatpush.xpose.msk.msra.mxu1 %vm842_vm1, %v9107_v57 }
 0x287   : > { %4037 = vmatmul.msk.f32.gmra.mxu3 %vm842_vm1, %v5518_v2  ;;  %v9113_v2 = vld [vmem:[#allocation35_spill] sm:$0xff] }
 0x288   : > { %4064 = vmatmul.msk.f32.gmra.mxu1 %vm842_vm1, %v9108_v59  ;;  %v2130_v59 = vpop.permute.xlu0 %2129 }
 0x289   : > { %4083 = vmatpush.xpose.msk.msrb.mxu3 %vm842_vm1, %v9109_v62  ;;  %4111 = vmatpush.xpose.msk.msra.mxu1 %vm842_vm1, %v9110_v35  ;;  %v2769_v62 = vpop.permute.xlu2 %2768 }
 0x28d   : > { %4084 = vmatpush.xpose.msk.msrb.mxu3 %vm842_vm1, %v5862_v23  ;;  %4112 = vmatpush.xpose.msk.msra.mxu1 %vm842_vm1, %v9111_v50  ;;  %v9114_v23 = vld [vmem:[#allocation46_spill] sm:$0xff]  ;;  %v2771_v50 = vpop.permute.xlu1 %2770 }
 0x28f   : > { %4038 = vmatmul.msk.f32.gmra.mxu3 %vm842_vm1, %v5569_v17  ;;  %v9115_v17 = vld [vmem:[#allocation52_spill] sm:$0xff] }
 0x290   : > { %4065 = vmatmul.msk.f32.gmra.mxu1 %vm842_vm1, %v9112_v27  ;;  %v6332_v27 = vld [vmem:[#allocation8 + $0x18] sm:$0xff] }
 0x291   : > { %4085 = vmatpush.xpose.msk.msrb.mxu3 %vm842_vm1, %v5934_v41  ;;  %4113 = vmatpush.xpose.msk.msra.mxu1 %vm842_vm1, %v9113_v2 }
 0x295   : > { %4086 = vmatpush.xpose.msk.msrb.mxu3 %vm842_vm1, %v5958_v15  ;;  %4114 = vmatpush.xpose.msk.msra.mxu1 %vm842_vm1, %v5864_v49  ;;  %v9118_v49 = vld [vmem:[#allocation58_spill] sm:$0xff] }
 0x297   : > { %4039 = vmatmul.msk.f32.gmra.mxu3 %vm842_vm1, %v5572_v18  ;;  %v9116_v18 = vld [vmem:[#allocation50_spill] sm:$0xff] }
 0x298   : > { %4066 = vmatmul.msk.f32.gmra.mxu1 %vm842_vm1, %v9114_v23 }
 0x299   : > { %4087 = vmatpush.xpose.msk.msrb.mxu3 %vm842_vm1, %v5992_v42  ;;  %4115 = vmatpush.xpose.msk.msra.mxu1 %vm842_vm1, %v5902_v31  ;;  %v6263_v31 = vld [vmem:[#allocation8] sm:$0xff] }
 0x29d   : > { %4088 = vmatpush.xpose.msk.msrb.mxu3 %vm842_vm1, %v6021_v38  ;;  %4116 = vmatpush.xpose.msk.msra.mxu1 %vm842_vm1, %v5936_v24 }
 0x29f   : > { %4040 = vmatmul.msk.f32.gmra.mxu3 %vm842_vm1, %v5603_v40  ;;  %v9117_v40 = vld [vmem:[#allocation56_spill] sm:$0xff] }
 0x2a0   : > { %4067 = vmatmul.msk.f32.gmra.mxu1 %vm842_vm1, %v9115_v17 }
 0x2a1   : > { %4117 = vmatpush.xpose.msk.msra.mxu1 %vm842_vm1, %v5960_v22 }
 0x2a5   : > { %4118 = vmatpush.xpose.msk.msra.mxu1 %vm842_vm1, %v5900_v26  ;;  %v6257_v26 = vld [vmem:[%s5220_s1] sm:$0xf]  ;;  %s3782_s1 = sshll.u32 %s3779_s30, 4  ;;  %s3783_s1 = int_to_ptr.hbm [resolvable:$true] %s3782_s1 }
 0x2a6   : > { %v6273_v22 = vperm.slane %v6257_v26, 1 }
 0x2a7   : > { %4089 = vmatmul.msk.f32.vlgmr.msrb.gmra.mxu3 %vm842_vm1, %v5956_v29 }
 0x2a8   : > { %4068 = vmatmul.msk.f32.gmra.mxu1 %vm842_vm1, %v9116_v18 }
 0x2a9   : > { %4119 = vmatpush.xpose.msk.msra.mxu1 %vm842_vm1, %v5932_v52  ;;  %v6265_v52 = vld [vmem:[#allocation8 + $0x20] sm:$0xff] }
 0x2ad   : > { %4120 = vmatpush.xpose.msk.msra.mxu1 %vm842_vm1, %v5989_v7 }
 0x2af   : > { %4090 = vmatmul.msk.f32.gmra.mxu3 %vm842_vm1, %v6014_v36 }
 0x2b0   : > { %4069 = vmatmul.msk.f32.gmra.mxu1 %vm842_vm1, %v9117_v40 }
 0x2b7   : > { %4091 = vmatmul.msk.f32.gmra.mxu3 %vm842_vm1, %v6095_v6 }
 0x2b8   : > { %4070 = vmatmul.msk.f32.gmra.mxu1 %vm842_vm1, %v5904_v55  ;;  %v6268_v55 = vperm.slane %v6257_v26, 0 }
 0x2bf   : > { %4092 = vmatmul.msk.f32.gmra.mxu3 %vm842_vm1, %v6123_v46 }
 0x2c0   : > { %4071 = vmatmul.msk.f32.gmra.mxu1 %vm842_vm1, %v9118_v49 }
 0x2c7   : > { %4093 = vmatmul.msk.f32.gmra.mxu3 %vm842_vm1, %v6116_v3  ;;  %v6291_v3 = vld [vmem:[#allocation8 + $0x8] sm:$0xff] }
 0x2c8   : > { %4072 = vmatmul.msk.f32.gmra.mxu1 %vm842_vm1, %v6145_v33 }
 0x2ca   : > { %v924_v41 = vpop.f32.mrf.mxu2  ;;  %v936_v24 = vpop.f32.mrf.mxu3 }
 0x2cb   : > { %v925_v29 = vadd.f32 %v924_v41, %v6263_v31  ;;  %v937_v15 = vadd.f32 %v936_v24, %v6265_v52  ;;  %v6347_v41 = vpop.permute.xlu0 %2774 }
 0x2cd   : > { %v1551_v7 = vpop.f32.mrf.mxu1  ;;  %v6276_v42 = vadd.f32 %v6268_v55, %v937_v15  ;;  %v6279_v36 = vadd.f32 %v6268_v55, %v925_v29  ;;  %v2132_v15 = vpop.permute.xlu1 %2131 }
 0x2ce   : > { %v1552_v38 = vadd.f32 %v1551_v7, %v6263_v31 }
 0x2cf   : > { %997 = vmax.xlane.f32.xlu2 %v6276_v42  ;;  %989 = vmax.xlane.f32.xlu0 %v6279_v36 }
 0x2d0   : > { %4094 = vmatmul.msk.f32.gmra.mxu3 %vm842_vm1, %v6086_v10  ;;  %4121 = vmatmul.msk.f32.vlgmr.msra.gmra.mxu1 %vm842_vm1, %v6056_v1  ;;  %v6289_v6 = vadd.f32 %v6273_v22, %v1552_v38 }
 0x2d2   : > { %1616 = vmax.xlane.f32.xlu1 %v6289_v6  ;;  %v927_v46 = vpop.f32.mrf.mxu2  ;;  %v939_v33 = vpop.f32.mrf.mxu3 }
 0x2d3   : > { %v928_v37 = vadd.f32 %v927_v46, %v6291_v3  ;;  %v6359_v46 = vld [vmem:[#allocation8 + $0x38] sm:$0xff] }
 0x2d5   : > { %v1554_v8 = vpop.f32.mrf.mxu1  ;;  %v6296_v28 = vadd.f32 %v6268_v55, %v928_v37 }
 0x2d6   : > { %v1555_v10 = vadd.f32 %v1554_v8, %v6291_v3 }
 0x2d7   : > { %991 = vmax.xlane.f32.xlu0 %v6296_v28 }
 0x2d8   : > { %4095 = vmatmul.msk.f32.gmra.mxu3 %vm842_vm1, %v2126_v44  ;;  %4122 = vmatmul.msk.f32.gmra.mxu1 %vm842_vm1, %v5987_v0  ;;  %v6304_v1 = vadd.f32 %v6273_v22, %v1555_v10  ;;  %v940_v0 = vadd.f32 %v939_v33, %v6310_v5  ;;  %v6361_v33 = vld [vmem:[#allocation8 + $0x40] sm:$0xff] }
 0x2d9   : > { %9119 = vst [vmem:[#allocation30_spill] sm:$0xff] %v6361_v33 }
 0x2da   : > { %1618 = vmax.xlane.f32.xlu2 %v6304_v1  ;;  %v930_v30 = vpop.f32.mrf.mxu2  ;;  %v942_v19 = vpop.f32.mrf.mxu3  ;;  %v6328_v61 = vadd.f32 %v6268_v55, %v940_v0 }
 0x2db   : > { %v931_v14 = vadd.f32 %v930_v30, %v6306_v25  ;;  %v943_v60 = vadd.f32 %v942_v19, %v6308_v4 }
 0x2dd   : > { %v1557_v58 = vpop.f32.mrf.mxu1  ;;  %v6317_v63 = vadd.f32 %v6268_v55, %v943_v60  ;;  %v6320_v13 = vadd.f32 %v6268_v55, %v931_v14  ;;  %v6377_v60 = vld [vmem:[#allocation8 + $0x48] sm:$0xff] }
 0x2de   : > { %v1558_v35 = vadd.f32 %v1557_v58, %v6306_v25 }
 0x2df   : > { %1001 = vmax.xlane.f32.xlu0 %v6317_v63  ;;  %993 = vmax.xlane.f32.xlu1 %v6320_v13 }
 0x2e0   : > { %4096 = vmatmul.msk.f32.gmra.mxu3 %vm842_vm1, %v2128_v53  ;;  %4123 = vmatmul.msk.f32.gmra.mxu1 %vm842_vm1, %v6049_v51  ;;  %v6342_v17 = vadd.f32 %v6273_v22, %v1558_v35  ;;  %v2134_v53 = vpop.permute.xlu0 %2133  ;;  %v2136_v35 = vpop.permute.xlu1 %2135 }
 0x2e2   : > { %999 = vmax.xlane.f32.xlu2 %v6328_v61  ;;  %v945_v57 = vpop.f32.mrf.mxu3  ;;  %v933_v18 = vpop.f32.mrf.mxu2 }
 0x2e3   : > { %v934_v49 = vadd.f32 %v933_v18, %v6332_v27  ;;  %v946_v8 = vadd.f32 %v945_v57, %v6359_v46  ;;  %v6395_v18 = vld [vmem:[#allocation8 + $0x58] sm:$0xff] }
 0x2e4   : > { %9120 = vst [vmem:[#allocation26_spill] sm:$0xff] %v6395_v18 }
 0x2e5   : > { %v1560_v2 = vpop.f32.mrf.mxu1  ;;  %v6354_v7 = vadd.f32 %v6268_v55, %v934_v49  ;;  %v6375_v19 = vadd.f32 %v6268_v55, %v946_v8  ;;  %v6409_v8 = vld [vmem:[#allocation8 + $0x60] sm:$0xff] }
 0x2e6   : > { %v1561_v23 = vadd.f32 %v1560_v2, %v6332_v27  ;;  %9121 = vst [vmem:[#allocation28_spill] sm:$0xff] %v6409_v8 }
 0x2e8   : > { %4097 = vmatmul.msk.f32.gmra.mxu3 %vm842_vm1, %v2130_v59  ;;  %4124 = vmatmul.msk.f32.gmra.mxu1 %vm842_vm1, %v6088_v11  ;;  %v6339_v51 = vadd.f32 %v6273_v22, %v1561_v23  ;;  %v2773_v11 = vpop.permute.xlu2 %2772 }
 0x2ea   : > { %1622 = vmax.xlane.f32.xlu0 %v6339_v51  ;;  %1620 = vmax.xlane.f32.xlu2 %v6342_v17  ;;  %v948_v40 = vpop.f32.mrf.mxu3 }
 0x2eb   : > { %v949_v10 = vadd.f32 %v948_v40, %v6361_v33 }
 0x2ed   : > { %v1563_v24 = vpop.f32.mrf.mxu1  ;;  %v6380_v0 = vadd.f32 %v6268_v55, %v949_v10  ;;  %v6411_v10 = vld [vmem:[#allocation8 + $0x50] sm:$0xff] }
 0x2ee   : > { %v1564_v29 = vadd.f32 %v1563_v24, %v6265_v52  ;;  %9122 = vst [vmem:[#allocation27_spill] sm:$0xff] %v6411_v10 }
 0x2f0   : > { %4098 = vmatmul.msk.f32.gmra.mxu3 %vm842_vm1, %v2132_v15  ;;  %4125 = vmatmul.msk.f32.gmra.mxu1 %vm842_vm1, %v6047_v45  ;;  %v6357_v38 = vadd.f32 %v6273_v22, %v1564_v29  ;;  %v2777_v14 = vpop.permute.xlu2 %2776 }
 0x2f2   : > { %995 = vmax.xlane.f32.xlu2 %v6354_v7  ;;  %1624 = vmax.xlane.f32.xlu1 %v6357_v38  ;;  %v951_v37 = vpop.f32.mrf.mxu3 }
 0x2f5   : > { %v1566_v45 = vpop.f32.mrf.mxu1 }
 0x2f6   : > { %v1567_v44 = vadd.f32 %v1566_v45, %v6310_v5 }
 0x2f8   : > { %4099 = vmatmul.msk.f32.gmra.mxu3 %vm842_vm1, %v2134_v53  ;;  %4126 = vmatmul.msk.f32.gmra.mxu1 %vm842_vm1, %v6149_v47  ;;  %v6372_v30 = vadd.f32 %v6273_v22, %v1567_v44  ;;  %v952_v47 = vadd.f32 %v951_v37, %v6377_v60  ;;  %v2138_v49 = vpop.permute.xlu2 %2137 }
 0x2fa   : > { %1626 = vmax.xlane.f32.xlu0 %v6372_v30  ;;  %1003 = vmax.xlane.f32.xlu2 %v6375_v19  ;;  %v954_v58 = vpop.f32.mrf.mxu3  ;;  %v6390_v2 = vadd.f32 %v6268_v55, %v952_v47 }
 0x2fb   : > { %1005 = vmax.xlane.f32.xlu1 %v6380_v0  ;;  %v955_v47 = vadd.f32 %v954_v58, %v6411_v10  ;;  %v6431_v58 = vld [vmem:[#allocation8 + $0x68] sm:$0xff] }
 0x2fc   : > { %9123 = vst [vmem:[#allocation31_spill] sm:$0xff] %v6431_v58 }
 0x2fd   : > { %v1569_v57 = vpop.f32.mrf.mxu1 }
 0x2fe   : > { %v1570_v59 = vadd.f32 %v1569_v57, %v6308_v4 }
 0x300   : > { %4100 = vmatmul.msk.f32.gmra.mxu3 %vm842_vm1, %v2136_v35  ;;  %4127 = vmatmul.msk.f32.gmra.mxu1 %vm842_vm1, %v2769_v62  ;;  %v6393_v23 = vadd.f32 %v6273_v22, %v1570_v59  ;;  %v2781_v53 = vpop.permute.xlu2 %2780  ;;  %v2140_v59 = vpop.permute.xlu1 %2139 }
 0x302   : > { %1007 = vmax.xlane.f32.xlu2 %v6390_v2  ;;  %v957_v40 = vpop.f32.mrf.mxu3 }
 0x303   : > { %1628 = vmax.xlane.f32.xlu1 %v6393_v23  ;;  %v958_v24 = vadd.f32 %v957_v40, %v6395_v18 }
 0x305   : > { %v1572_v29 = vpop.f32.mrf.mxu1  ;;  %v6402_v62 = vadd.f32 %v6268_v55, %v958_v24 }
 0x306   : > { %v1573_v15 = vadd.f32 %v1572_v29, %v6359_v46 }
 0x308   : > { %4101 = vmatmul.msk.f32.gmra.mxu3 %vm842_vm1, %v2138_v49  ;;  %4128 = vmatmul.msk.f32.gmra.mxu1 %vm842_vm1, %v2771_v50  ;;  %v6407_v37 = vadd.f32 %v6273_v22, %v1573_v15  ;;  %v6427_v49 = vadd.f32 %v6268_v55, %v955_v47 }
 0x30a   : > { %1011 = vmax.xlane.f32.xlu2 %v6402_v62  ;;  %v960_v45 = vpop.f32.mrf.mxu3 }
 0x30b   : > { %1630 = vmax.xlane.f32.xlu1 %v6407_v37  ;;  %v961_v44 = vadd.f32 %v960_v45, %v6409_v8  ;;  %v2142_v45 = vpop.permute.xlu2 %2141 }
 0x30d   : > { %v1575_v57 = vpop.f32.mrf.mxu1  ;;  %v6419_v35 = vadd.f32 %v6268_v55, %v961_v44 }
 0x30e   : > { %v1576_v50 = vadd.f32 %v1575_v57, %v6361_v33  ;;  %v2779_v33 = vpop.permute.xlu0 %2778 }
 0x310   : > { %4102 = vmatmul.msk.f32.gmra.mxu3 %vm842_vm1, %v2140_v59  ;;  %4129 = vmatmul.msk.f32.gmra.mxu1 %vm842_vm1, %v2773_v11  ;;  %v6424_v40 = vadd.f32 %v6273_v22, %v1576_v50  ;;  %v2144_v59 = vpop.permute.xlu1 %2143 }
 0x312   : > { %1632 = vmax.xlane.f32.xlu0 %v6424_v40  ;;  %1013 = vmax.xlane.f32.xlu2 %v6419_v35  ;;  %v963_v24 = vpop.f32.mrf.mxu3 }
 0x313   : > { %1009 = vmax.xlane.f32.xlu1 %v6427_v49  ;;  %v964_v29 = vadd.f32 %v963_v24, %v6431_v58  ;;  %v6453_v24 = vld [vmem:[#allocation8 + $0x70] sm:$0xff] }
 0x314   : > { %9124 = vst [vmem:[#allocation32_spill] sm:$0xff] %v6453_v24 }
 0x315   : > { %v1578_v15 = vpop.f32.mrf.mxu1  ;;  %v6443_v47 = vadd.f32 %v6268_v55, %v964_v29 }
 0x316   : > { %v1579_v11 = vadd.f32 %v1578_v15, %v6377_v60 }
 0x318   : > { %4103 = vmatmul.msk.f32.gmra.mxu3 %vm842_vm1, %v2142_v45  ;;  %4130 = vmatmul.msk.f32.gmra.mxu1 %vm842_vm1, %v6347_v41  ;;  %v6440_v44 = vadd.f32 %v6273_v22, %v1579_v11 }
 0x31a   : > { %1634 = vmax.xlane.f32.xlu0 %v6440_v44  ;;  %v966_v15 = vpop.f32.mrf.mxu3 }
 0x31b   : > { %1015 = vmax.xlane.f32.xlu1 %v6443_v47  ;;  %v967_v29 = vadd.f32 %v966_v15, %v6453_v24 }
 0x31d   : > { %v1581_v57 = vpop.f32.mrf.mxu1 }
 0x31e   : > { %v1582_v50 = vadd.f32 %v1581_v57, %v6411_v10 }
 0x320   : > { %4104 = vmatmul.msk.f32.gmra.mxu3 %vm842_vm1, %v2144_v59  ;;  %4131 = vmatmul.msk.f32.gmra.mxu1 %vm842_vm1, %v2777_v14  ;;  %v6451_v41 = vadd.f32 %v6273_v22, %v1582_v50  ;;  %v6463_v14 = vadd.f32 %v6268_v55, %v967_v29 }
 0x322   : > { %1636 = vmax.xlane.f32.xlu0 %v6451_v41 }
 0x325   : > { %v1584_v11 = vpop.f32.mrf.mxu1 }
 0x326   : > { %v1585_v45 = vadd.f32 %v1584_v11, %v6395_v18  ;;  %v2783_v11 = vpop.permute.xlu0 %2782 }
 0x328   : > { %v6459_v57 = vadd.f32 %v6273_v22, %v1585_v45  ;;  %4132 = vmatmul.msk.f32.gmra.mxu1 %vm842_vm1, %v2779_v33  ;;  %v9125_v33 = vpack.i.bf16 %v5911_v34, %v5914_v43  ;;  %v969_v43 = vpop.f32.mrf.mxu3 }
 0x32a   : > { %1017 = vmax.xlane.f32.xlu0 %v6463_v14  ;;  %1638 = vmax.xlane.f32.xlu2 %v6459_v57 }
 0x32d   : > { %v1587_v50 = vpop.f32.mrf.mxu1 }
 0x32e   : > { %v1588_v59 = vadd.f32 %v1587_v50, %v6409_v8  ;;  %v4359_v50 = vpack.i.bf16 %v6032_v48, %v6019_v39 }
 0x330   : > { %v6469_v15 = vadd.f32 %v6273_v22, %v1588_v59  ;;  %4133 = vmatmul.msk.f32.gmra.mxu1 %vm842_vm1, %v2781_v53  ;;  %v2787_v53 = vpop.permute.xlu0 %2786  ;;  %v2785_v59 = vpop.permute.xlu2 %2784 }
 0x332   : > { %1640 = vmax.xlane.f32.xlu2 %v6469_v15 }
 0x334   : > { %4350 = vrot.lane.b32.xlu1 %v9125_v33, %s4981_s23 }
 0x335   : > { %v1590_v29 = vpop.f32.mrf.mxu1 }
 0x336   : > { %v1591_v45 = vadd.f32 %v1590_v29, %v6431_v58 }
 0x338   : > { %v6479_v18 = vadd.f32 %v6273_v22, %v1591_v45  ;;  %4134 = vmatmul.msk.f32.gmra.mxu1 %vm842_vm1, %v2783_v11 }
 0x33a   : > { %1642 = vmax.xlane.f32.xlu0 %v6479_v18 }
 0x33c   : > { %4360 = vrot.lane.b32.xlu1 %v4359_v50, %s4981_s23 }
 0x33d   : > { %v1593_v8 = vpop.f32.mrf.mxu1 }
 0x33e   : > { %v1594_v34 = vadd.f32 %v1593_v8, %v6453_v24 }
 0x340   : > { %v6488_v33 = vadd.f32 %v6273_v22, %v1594_v34  ;;  %4135 = vmatmul.msk.f32.gmra.mxu1 %vm842_vm1, %v2785_v59  ;;  %v2258_v34 = vpop.f32.mrf.mxu3  ;;  %v9126_v59 = vpack.i.bf16 %v5967_v21, %v5970_v12 }
 0x342   : > { %1644 = vmax.xlane.f32.xlu0 %v6488_v33  ;;  %v990_v11 = vpop.xlane.xlu0 %989  ;;  %v6492_v29 = vpop.xlane.xlu2 %997 }
 0x343   : > { %v1021_v39 = vsub.f32 %v6279_v36, %v990_v11 }
 0x345   : > { %v1617_v48 = vpop.xlane.xlu1 %1616  ;;  %v6495_v45 = vpop.f32.mrf.mxu1  ;;  %v1037_v50 = vmul.f32 1.442695, %v1021_v39 }
 0x346   : > { %v1648_v58 = vsub.f32 %v6289_v6, %v1617_v48 }
 0x347   : > { %4385 = vpow2.f32 %v1037_v50 }
 0x348   : > { %v1664_v8 = vmul.f32 1.442695, %v1648_v58  ;;  %4136 = vmatmul.msk.f32.gmra.mxu1 %vm842_vm1, %v2787_v53 }
 0x34a   : > { %4387 = vpow2.f32 %v1664_v8  ;;  %4345 = vrot.lane.b32.xlu2 %v9126_v59, %s4981_s23  ;;  %v992_v24 = vpop.xlane.xlu0 %991 }
 0x34b   : > { %v1022_v36 = vsub.f32 %v6296_v28, %v992_v24  ;;  %v6514_v28 = vpop.f32.mrf.mxu3 }
 0x34d   : > { %v1619_v11 = vpop.xlane.xlu2 %1618  ;;  %v6504_v10 = vpop.f32.mrf.mxu1  ;;  %v1039_v6 = vmul.f32 1.442695, %v1022_v36  ;;  %v9130_v36 = vpack.i.bf16 %v5869_v56, %v5872_v54 }
 0x34e   : > { %v6506_v39 = vpop.eup %4385  ;;  %v1649_v58 = vsub.f32 %v6304_v1, %v1619_v11 }
 0x34f   : > { %9127 = vst [vmem:[#allocation29_spill] sm:$0xff] %v6506_v39  ;;  %1117 = vmatmul.f32.vlgmr.msrb.gmra.mxu0 %v6506_v39  ;;  %4389 = vpow2.f32 %v1039_v6 }
 0x350   : > { %v6510_v53 = vpop.eup %4387  ;;  %v1666_v48 = vmul.f32 1.442695, %v1649_v58  ;;  %v6534_v58 = vld [vmem:[#allocation8 + $0x78] sm:$0xff] }
 0x351   : > { %9128 = vst [vmem:[#allocation34_spill] sm:$0xff] %v6510_v53  ;;  %1808 = vmatmul.f32.vlgmr.msra.gmra.mxu2 %v6510_v53 }
 0x352   : > { %4391 = vpow2.f32 %v1666_v48  ;;  %v994_v21 = vpop.xlane.xlu1 %993  ;;  %v6520_v1 = vpop.xlane.xlu0 %1001 }
 0x353   : > { %v1023_v12 = vsub.f32 %v6320_v13, %v994_v21  ;;  %v4364_v13 = vpack.i.bf16 %v6054_v20, %v6041_v32 }
 0x355   : > { %v1041_v24 = vmul.f32 1.442695, %v1023_v12  ;;  %v1000_v50 = vpop.xlane.xlu2 %999  ;;  %v6516_v8 = vpop.f32.mrf.mxu1 }
 0x356   : > { %v6518_v59 = vpop.eup %4389  ;;  %4355 = vrot.lane.b32.xlu0 %v9130_v36, %s4981_s23  ;;  %v6538_v12 = vpop.f32.mrf.mxu3 }
 0x357   : > { %9129 = vst [vmem:[#allocation48_spill] sm:$0xff] %v6518_v59  ;;  %4393 = vpow2.f32 %v1041_v24  ;;  %1120 = vmatmul.f32.gmra.mxu0 %v6518_v59  ;;  %v970_v24 = vadd.f32 %v969_v43, %v6534_v58  ;;  %v2259_v43 = vadd.f32 %v2258_v34, %v6263_v31  ;;  %v1597_v34 = vadd.f32 %v6495_v45, %v6534_v58 }
 0x358   : > { %v6527_v11 = vpop.eup %4391 }
 0x359   : > { %9131 = vst [vmem:[#allocation45_spill] sm:$0xff] %v6527_v11  ;;  %1811 = vmatmul.f32.gmra.mxu2 %v6527_v11  ;;  %v6546_v20 = vadd.f32 %v6268_v55, %v970_v24 }
 0x35d   : > { %v6532_v6 = vpop.eup %4393  ;;  %v1621_v48 = vpop.xlane.xlu2 %1620 }
 0x35e   : > { %v6536_v21 = vpop.f32.mrf.mxu1  ;;  %v1650_v56 = vsub.f32 %v6342_v17, %v1621_v48  ;;  %v1623_v54 = vpop.xlane.xlu0 %1622  ;;  %4365 = vrot.lane.b32.xlu0 %v4364_v13, %s4981_s23  ;;  %v6556_v48 = vperm.slane %v6257_v26, 2 }
 0x35f   : > { %1123 = vmatmul.f32.gmra.mxu0 %v6532_v6  ;;  %v1651_v32 = vsub.f32 %v6339_v51, %v1623_v54  ;;  %v6558_v51 = vpop.f32.mrf.mxu3 }
 0x360   : > { %v1668_v36 = vmul.f32 1.442695, %v1650_v56  ;;  %v1025_v56 = vsub.f32 %v6276_v42, %v6492_v29 }
 0x361   : > { %v1670_v11 = vmul.f32 1.442695, %v1651_v32 }
 0x362   : > { %4395 = vpow2.f32 %v1668_v36  ;;  %v1045_v54 = vmul.f32 1.442695, %v1025_v56 }
 0x363   : > { %4397 = vpow2.f32 %v1670_v11 }
 0x365   : > { %v996_v53 = vpop.xlane.xlu2 %995  ;;  %v1625_v39 = vpop.xlane.xlu1 %1624 }
 0x366   : > { %v1024_v59 = vsub.f32 %v6354_v7, %v996_v53  ;;  %1019 = vmax.xlane.f32.xlu1 %v6546_v20  ;;  %v6550_v17 = vpop.f32.mrf.mxu1  ;;  %v1652_v7 = vsub.f32 %v6357_v38, %v1625_v39  ;;  %v6565_v53 = vadd.f32 %v6556_v48, %v2259_v43  ;;  %v6579_v38 = vadd.f32 %v6273_v22, %v1597_v34 }
 0x367   : > { %v1026_v39 = vsub.f32 %v6328_v61, %v1000_v50  ;;  %v6584_v45 = vpop.f32.mrf.mxu3  ;;  %v1027_v50 = vsub.f32 %v6317_v63, %v6520_v1 }
 0x368   : > { %v6552_v13 = vpop.eup %4395  ;;  %v1043_v55 = vmul.f32 1.442695, %v1024_v59  ;;  %v1672_v24 = vmul.f32 1.442695, %v1652_v7 }
 0x369   : > { %1814 = vmatmul.f32.gmra.mxu2 %v6552_v13  ;;  %v6574_v42 = vpop.eup %4397  ;;  %v1047_v43 = vmul.f32 1.442695, %v1026_v39 }
 0x36a   : > { %4399 = vpow2.f32 %v1043_v55  ;;  %9132 = vst [vmem:[#allocation36_spill] sm:$0xff] %v6574_v42 }
 0x36b   : > { %4401 = vpow2.f32 %v1045_v54 }
 0x36c   : > { %4403 = vpow2.f32 %v1672_v24  ;;  %v1049_v24 = vmul.f32 1.442695, %v1027_v50 }
 0x36d   : > { %v1627_v29 = vpop.xlane.xlu0 %1626  ;;  %v1004_v54 = vpop.xlane.xlu2 %1003  ;;  %4405 = vpow2.f32 %v1047_v43  ;;  %v6613_v43 = vperm.slane %v6257_v26, 3 }
 0x36e   : > { %v6569_v36 = vpop.xlane.xlu1 %1005  ;;  %2323 = vmax.xlane.f32.xlu1 %v6565_v53  ;;  %v6572_v59 = vpop.f32.mrf.mxu1  ;;  %v1653_v32 = vsub.f32 %v6372_v30, %v1627_v29  ;;  %v1028_v63 = vsub.f32 %v6375_v19, %v1004_v54 }
 0x36f   : > { %v6599_v34 = vpop.f32.mrf.mxu3 }
 0x370   : > { %v6576_v11 = vpop.eup %4399  ;;  %v1674_v55 = vmul.f32 1.442695, %v1653_v32  ;;  %v1051_v50 = vmul.f32 1.442695, %v1028_v63 }
 0x371   : > { %9133 = vst [vmem:[#allocation47_spill] sm:$0xff] %v6576_v11  ;;  %1126 = vmatmul.f32.gmra.mxu0 %v6576_v11  ;;  %1817 = vmatmul.f32.gmra.mxu2 %v6574_v42  ;;  %v6590_v22 = vpop.eup %4401 }
 0x372   : > { %v6592_v61 = vpop.eup %4403  ;;  %4407 = vpow2.f32 %v1674_v55 }
 0x373   : > { %1646 = vmax.xlane.f32.xlu2 %v6579_v38  ;;  %v6603_v32 = vpop.eup %4405  ;;  %4409 = vpow2.f32 %v1049_v24 }
 0x374   : > { %9134 = vst [vmem:[#allocation55_spill] sm:$0xff] %v6603_v32 }
 0x375   : > { %v1008_v1 = vpop.xlane.xlu2 %1007 }
 0x376   : > { %v1629_v56 = vpop.xlane.xlu1 %1628  ;;  %v6588_v7 = vpop.f32.mrf.mxu1 }
 0x377   : > { %v1654_v30 = vsub.f32 %v6393_v23, %v1629_v56  ;;  %v2902_v23 = vadd.f32 %v6504_v10, %v6263_v31  ;;  %v4374_v56 = vpack.i.bf16 %v6099_v16, %v6084_v9  ;;  %v6621_v54 = vpop.f32.mrf.mxu3  ;;  %v9136_v9 = vld [vmem:[#allocation60_spill] sm:$0xff]  ;;  %v1029_v10 = vsub.f32 %v6380_v0, %v6569_v36 }
 0x378   : > { %v6605_v11 = vpop.eup %4407 }
 0x379   : > { %1129 = vmatmul.f32.gmra.mxu0 %v6590_v22  ;;  %1820 = vmatmul.f32.gmra.mxu2 %v6592_v61  ;;  %v1676_v29 = vmul.f32 1.442695, %v1654_v30  ;;  %v6619_v19 = vadd.f32 %v6613_v43, %v2902_v23  ;;  %v1053_v23 = vmul.f32 1.442695, %v1029_v10 }
 0x37b   : > { %4411 = vpow2.f32 %v1676_v29 }
 0x37c   : > { %4413 = vpow2.f32 %v1051_v50 }
 0x37d   : > { %v1012_v63 = vpop.xlane.xlu2 %1011 }
 0x37e   : > { %v6601_v39 = vpop.f32.mrf.mxu1  ;;  %v1631_v42 = vpop.xlane.xlu1 %1630 }
 0x37f   : > { %v1655_v55 = vsub.f32 %v6407_v37, %v1631_v42  ;;  %v9135_v37 = vld [vmem:[#allocation59_spill] sm:$0xff]  ;;  %v2905_v42 = vadd.f32 %v6516_v8, %v6291_v3  ;;  %v9138_v8 = vld [vmem:[#allocation44_spill] sm:$0xff] }
 0x380   : > { %v4369_v16 = vpack.i.bf16 %v9136_v9, %v9135_v37  ;;  %v6648_v37 = vpop.f32.mrf.mxu3  ;;  %v2262_v9 = vadd.f32 %v6514_v28, %v6291_v3 }
 0x381   : > { %1132 = vmatmul.f32.gmra.mxu0 %v6603_v32  ;;  %1823 = vmatmul.f32.gmra.mxu2 %v6605_v11  ;;  %v1678_v24 = vmul.f32 1.442695, %v1655_v55  ;;  %v6623_v32 = vpop.eup %4409 }
 0x382   : > { %v6626_v26 = vpop.eup %4411 }
 0x383   : > { %4415 = vpow2.f32 %v1678_v24  ;;  %v6644_v0 = vpop.eup %4413  ;;  %v9139_v24 = vld [vmem:[#allocation42_spill] sm:$0xff] }
 0x384   : > { %4417 = vpow2.f32 %v1053_v23  ;;  %v6663_v23 = vadd.f32 %v6556_v48, %v2262_v9 }
 0x385   : > { %v1633_v30 = vpop.xlane.xlu0 %1632 }
 0x386   : > { %v6628_v31 = vpop.f32.mrf.mxu1  ;;  %v1656_v29 = vsub.f32 %v6424_v40, %v1633_v30  ;;  %v4379_v40 = vpack.i.bf16 %v9139_v24, %v9138_v8  ;;  %v1030_v30 = vsub.f32 %v6390_v2, %v1008_v1  ;;  %v1010_v2 = vpop.xlane.xlu1 %1009 }
 0x387   : > { %4375 = vrot.lane.b32.xlu1 %v4374_v56, %s4981_s23  ;;  %v6642_v56 = vadd.f32 %v6613_v43, %v2905_v42  ;;  %v1031_v3 = vsub.f32 %v6427_v49, %v1010_v2 }
 0x388   : > { %2966 = vmax.xlane.f32.xlu0 %v6619_v19  ;;  %v1680_v50 = vmul.f32 1.442695, %v1656_v29  ;;  %v1055_v42 = vmul.f32 1.442695, %v1030_v30  ;;  %v1014_v29 = vpop.xlane.xlu2 %1013  ;;  %v6675_v28 = vpop.f32.mrf.mxu3 }
 0x389   : > { %1135 = vmatmul.f32.gmra.mxu0 %v6623_v32  ;;  %1826 = vmatmul.f32.gmra.mxu2 %v6626_v26  ;;  %v6646_v36 = vpop.eup %4415 }
 0x38a   : > { %9137 = vst [vmem:[#allocation40_spill] sm:$0xff] %v6646_v36  ;;  %4419 = vpow2.f32 %v1680_v50  ;;  %v6665_v8 = vpop.eup %4417 }
 0x38b   : > { %4370 = vrot.lane.b32.xlu2 %v4369_v16, %s4981_s23  ;;  %9140 = vst [vmem:[#allocation54_spill] sm:$0xff] %v6665_v8  ;;  %4421 = vpow2.f32 %v1055_v42 }
 0x38d   : > { %v1635_v55 = vpop.xlane.xlu0 %1634 }
 0x38e   : > { %v6658_v16 = vpop.f32.mrf.mxu1  ;;  %v1657_v10 = vsub.f32 %v6440_v44, %v1635_v55  ;;  %v2265_v44 = vadd.f32 %v6538_v12, %v6306_v25  ;;  %v1032_v12 = vsub.f32 %v6402_v62, %v1012_v63  ;;  %v1016_v62 = vpop.xlane.xlu1 %1015  ;;  %v1033_v63 = vsub.f32 %v6419_v35, %v1014_v29 }
 0x390   : > { %2968 = vmax.xlane.f32.xlu0 %v6642_v56  ;;  %v1682_v1 = vmul.f32 1.442695, %v1657_v10  ;;  %v6681_v9 = vadd.f32 %v6556_v48, %v2265_v44  ;;  %v1059_v44 = vmul.f32 1.442695, %v1032_v12 }
 0x391   : > { %1138 = vmatmul.f32.gmra.mxu0 %v6644_v0  ;;  %1829 = vmatmul.f32.gmra.mxu2 %v6646_v36  ;;  %v6667_v36 = vpop.eup %4419 }
 0x392   : > { %4423 = vpow2.f32 %v1682_v1  ;;  %v6683_v10 = vpop.eup %4421  ;;  %v6694_v1 = vpop.f32.mrf.mxu3 }
 0x393   : > { %4380 = vrot.lane.b32.xlu2 %v4379_v40, %s4981_s23  ;;  %v1057_v40 = vmul.f32 1.442695, %v1031_v3  ;;  %9141 = vst [vmem:[#allocation33_spill] sm:$0xff] %v6683_v10 }
 0x395   : > { %v1637_v24 = vpop.xlane.xlu0 %1636  ;;  %4425 = vpow2.f32 %v1057_v40 }
 0x396   : > { %v1658_v55 = vsub.f32 %v6451_v41, %v1637_v24  ;;  %v6678_v50 = vpop.f32.mrf.mxu1  ;;  %v2268_v41 = vadd.f32 %v6558_v51, %v6332_v27 }
 0x398   : > { %2325 = vmax.xlane.f32.xlu0 %v6663_v23  ;;  %v1684_v49 = vmul.f32 1.442695, %v1658_v55  ;;  %v6685_v42 = vpop.eup %4423  ;;  %v6697_v3 = vadd.f32 %v6556_v48, %v2268_v41 }
 0x399   : > { %1141 = vmatmul.f32.gmra.mxu0 %v6665_v8  ;;  %1832 = vmatmul.f32.gmra.mxu2 %v6667_v36  ;;  %9142 = vst [vmem:[#allocation43_spill] sm:$0xff] %v6685_v42 }
 0x39a   : > { %4427 = vpow2.f32 %v1684_v49 }
 0x39b   : > { %v6703_v8 = vpop.eup %4425  ;;  %4429 = vpow2.f32 %v1059_v44 }
 0x39c   : > { %9143 = vst [vmem:[#allocation51_spill] sm:$0xff] %v6703_v8 }
 0x39d   : > { %v1639_v30 = vpop.xlane.xlu2 %1638  ;;  %v6701_v40 = vpop.xlane.xlu0 %1017 }
 0x39e   : > { %v1659_v2 = vsub.f32 %v6459_v57, %v1639_v30  ;;  %v6699_v55 = vpop.f32.mrf.mxu1  ;;  %v2914_v57 = vadd.f32 %v6572_v59, %v6265_v52  ;;  %v2911_v30 = vadd.f32 %v6550_v17, %v6332_v27 }
 0x3a0   : > { %2327 = vmax.xlane.f32.xlu0 %v6681_v9  ;;  %v6705_v51 = vpop.eup %4427  ;;  %v6717_v12 = vadd.f32 %v6613_v43, %v2914_v57  ;;  %v6722_v59 = vadd.f32 %v6613_v43, %v2911_v30  ;;  %v2280_v57 = vadd.f32 %v6648_v37, %v6359_v46 }
 0x3a1   : > { %1144 = vmatmul.f32.gmra.mxu0 %v6683_v10  ;;  %1835 = vmatmul.f32.gmra.mxu2 %v6685_v42  ;;  %v1686_v42 = vmul.f32 1.442695, %v1659_v2  ;;  %9144 = vst [vmem:[#allocation38_spill] sm:$0xff] %v6705_v51  ;;  %v6719_v2 = vpop.f32.mrf.mxu3  ;;  %v6724_v35 = vpop.eup %4429 }
 0x3a3   : > { %4431 = vpow2.f32 %v1686_v42  ;;  %v2271_v42 = vadd.f32 %v6584_v45, %v6265_v52  ;;  %v2908_v52 = vadd.f32 %v6536_v21, %v6306_v25  ;;  %v2917_v21 = vadd.f32 %v6588_v7, %v6310_v5 }
 0x3a5   : > { %v1641_v24 = vpop.xlane.xlu2 %1640  ;;  %v6758_v25 = vadd.f32 %v6613_v43, %v2908_v52  ;;  %v6772_v7 = vadd.f32 %v6613_v43, %v2917_v21  ;;  %v2277_v52 = vadd.f32 %v6621_v54, %v6308_v4  ;;  %v2923_v54 = vadd.f32 %v6628_v31, %v6359_v46 }
 0x3a6   : > { %v1660_v49 = vsub.f32 %v6469_v15, %v1641_v24  ;;  %v4351_v29 = vpop.permute.xlu1 %4350  ;;  %v6726_v27 = vpop.f32.mrf.mxu1  ;;  %v1034_v24 = vsub.f32 %v6443_v47, %v1016_v62  ;;  %v6746_v47 = vadd.f32 %v6556_v48, %v2280_v57 }
 0x3a7   : > { %v4353_v30 = vunpack.i.h.bf16 %v4351_v29 }
 0x3a8   : > { %2329 = vmax.xlane.f32.xlu0 %v6697_v3  ;;  %v1688_v44 = vmul.f32 1.442695, %v1660_v49  ;;  %v6741_v49 = vadd.f32 %v6556_v48, %v2271_v42  ;;  %v1063_v45 = vmul.f32 1.442695, %v1034_v24  ;;  %v2274_v42 = vadd.f32 %v6599_v34, %v6310_v5 }
 0x3a9   : > { %1147 = vmatmul.f32.gmra.mxu0 %v6703_v8  ;;  %1838 = vmatmul.f32.gmra.mxu2 %v6705_v51  ;;  %v1061_v8 = vmul.f32 1.442695, %v1033_v63  ;;  %v6729_v15 = vpop.eup %4431  ;;  %v6750_v62 = vpop.f32.mrf.mxu3 }
 0x3aa   : > { %v6785_v5 = vadd.f32 %v6556_v48, %v2274_v42 }
 0x3ab   : > { %4433 = vpow2.f32 %v1061_v8 }
 0x3ac   : > { %4435 = vpow2.f32 %v1688_v44 }
 0x3ad   : > { %v4346_v41 = vpop.permute.xlu2 %4345  ;;  %v1643_v10 = vpop.xlane.xlu0 %1642  ;;  %4437 = vpow2.f32 %v1063_v45 }
 0x3ae   : > { %v4347_v51 = vunpack.i.l.bf16 %v4346_v41  ;;  %v4348_v17 = vunpack.i.h.bf16 %v4346_v41  ;;  %v1661_v63 = vsub.f32 %v6479_v18, %v1643_v10  ;;  %v1035_v41 = vsub.f32 %v6463_v14, %v6701_v40  ;;  %v2937_v44 = vpop.f32.mrf.mxu1 }
 0x3b0   : > { %2974 = vmax.xlane.f32.xlu0 %v6717_v12  ;;  %3142 = vmatpush.msrb.mxu2 %v4347_v51  ;;  %v4352_v51 = vunpack.i.l.bf16 %v4351_v29  ;;  %v1690_v8 = vmul.f32 1.442695, %v1661_v63  ;;  %v2929_v29 = vadd.f32 %v6678_v50, %v6377_v60  ;;  %v1065_v24 = vmul.f32 1.442695, %v1035_v41  ;;  %v4361_v41 = vpop.permute.xlu1 %4360 }
 0x3b1   : > { %2972 = vmax.xlane.f32.xlu1 %v6722_v59  ;;  %1150 = vmatmul.f32.gmra.mxu0 %v6724_v35  ;;  %v6748_v37 = vpop.eup %4433  ;;  %v6789_v34 = vpop.f32.mrf.mxu3  ;;  %v4363_v46 = vunpack.i.h.bf16 %v4361_v41 }
 0x3b2   : > { %1841 = vmatmul.f32.gmra.mxu2 %v6729_v15  ;;  %v6753_v10 = vpop.eup %4435  ;;  %4439 = vpow2.f32 %v1690_v8  ;;  %v6775_v14 = vadd.f32 %v6613_v43, %v2929_v29  ;;  %v9149_v29 = vld [vmem:[#allocation28_spill] sm:$0xff] }
 0x3b3   : > { %3143 = vmatpush.msrb.mxu2 %v4348_v17  ;;  %v6777_v57 = vpop.eup %4437  ;;  %4441 = vpow2.f32 %v1065_v24 }
 0x3b5   : > { %3144 = vmatpush.msrb.mxu2 %v4352_v51  ;;  %v1645_v18 = vpop.xlane.xlu0 %1644  ;;  %v9146_v51 = vld [vmem:[#allocation27_spill] sm:$0xff] }
 0x3b6   : > { %v1662_v17 = vsub.f32 %v6488_v33, %v1645_v18  ;;  %v2920_v33 = vadd.f32 %v6601_v39, %v6308_v4  ;;  %v2289_v63 = vadd.f32 %v6719_v2, %v9146_v51  ;;  %v6813_v4 = vadd.f32 %v6556_v48, %v2277_v52 }
 0x3b7   : > { %3145 = vmatpush.msrb.mxu2 %v4353_v30  ;;  %v6794_v30 = vpop.f32.mrf.mxu1 }
 0x3b8   : > { %2331 = vmax.xlane.f32.xlu0 %v6741_v49  ;;  %v1692_v40 = vmul.f32 1.442695, %v1662_v17  ;;  %v6780_v50 = vpop.eup %4439  ;;  %v6800_v45 = vadd.f32 %v6613_v43, %v2920_v33  ;;  %v6803_v39 = vadd.f32 %v6556_v48, %v2289_v63  ;;  %v2938_v17 = vadd.f32 %v2937_v44, %v9149_v29  ;;  %v9150_v63 = vld [vmem:[#allocation30_spill] sm:$0xff] }
 0x3b9   : > { %2337 = vmax.xlane.f32.xlu1 %v6746_v47  ;;  %1153 = vmatmul.f32.gmra.mxu0 %v6748_v37  ;;  %9145 = vst [vmem:[#allocation53_spill] sm:$0xff] %v6780_v50  ;;  %v6805_v8 = vpop.eup %4441  ;;  %v2297_v24 = vpop.f32.mrf.mxu3  ;;  %v6821_v33 = vadd.f32 %v6613_v43, %v2923_v54  ;;  %v2926_v52 = vadd.f32 %v6658_v16, %v9150_v63  ;;  %v9151_v16 = vld [vmem:[#allocation31_spill] sm:$0xff] }
 0x3ba   : > { %1844 = vmatmul.f32.gmra.mxu2 %v6753_v10  ;;  %4443 = vpow2.f32 %v1692_v40  ;;  %9147 = vst [vmem:[#allocation41_spill] sm:$0xff] %v6805_v8  ;;  %v4362_v40 = vunpack.i.l.bf16 %v4361_v41  ;;  %v6828_v31 = vadd.f32 %v6613_v43, %v2938_v17 }
 0x3bb   : > { %v6835_v54 = vadd.f32 %v6613_v43, %v2926_v52  ;;  %v2932_v52 = vadd.f32 %v6699_v55, %v9146_v51 }
 0x3bc   : > { %2970 = vmax.xlane.f32.xlu2 %v6758_v25 }
 0x3c0   : > { %2976 = vmax.xlane.f32.xlu0 %v6772_v7  ;;  %v6808_v2 = vpop.eup %4443 }
 0x3c1   : > { %2984 = vmax.xlane.f32.xlu1 %v6775_v14  ;;  %1156 = vmatmul.f32.gmra.mxu0 %v6777_v57  ;;  %9148 = vst [vmem:[#allocation57_spill] sm:$0xff] %v6808_v2 }
 0x3c2   : > { %1847 = vmatmul.f32.gmra.mxu2 %v6780_v50 }
 0x3c4   : > { %2333 = vmax.xlane.f32.xlu2 %v6785_v5 }
 0x3c8   : > { %2978 = vmax.xlane.f32.xlu0 %v6800_v45  ;;  %v4356_v18 = vpop.permute.xlu0 %4355 }
 0x3c9   : > { %2343 = vmax.xlane.f32.xlu1 %v6803_v39  ;;  %v4357_v21 = vunpack.i.l.bf16 %v4356_v18  ;;  %1159 = vmatmul.f32.gmra.mxu0 %v6805_v8  ;;  %v4358_v42 = vunpack.i.h.bf16 %v4356_v18  ;;  %v6825_v8 = vpop.f32.mrf.mxu1 }
 0x3ca   : > { %1850 = vmatmul.f32.gmra.mxu2 %v6808_v2 }
 0x3cb   : > { %3146 = vmatpush.msrb.mxu2 %v4357_v21  ;;  %v2283_v21 = vadd.f32 %v6675_v28, %v9150_v63 }
 0x3cc   : > { %2335 = vmax.xlane.f32.xlu2 %v6813_v4 }
 0x3cd   : > { %3147 = vmatpush.msrb.mxu2 %v4358_v42  ;;  %v2298_v42 = vadd.f32 %v2297_v24, %v9151_v16  ;;  %v6840_v17 = vadd.f32 %v6556_v48, %v2283_v21  ;;  %v9152_v21 = vld [vmem:[#allocation26_spill] sm:$0xff] }
 0x3cf   : > { %3148 = vmatpush.msrb.mxu2 %v4362_v40  ;;  %v2286_v40 = vadd.f32 %v6694_v1, %v6377_v60  ;;  %v6845_v50 = vadd.f32 %v6556_v48, %v2298_v42  ;;  %v2935_v42 = vadd.f32 %v6726_v27, %v9152_v21 }
 0x3d0   : > { %2980 = vmax.xlane.f32.xlu0 %v6821_v33  ;;  %v4366_v44 = vpop.permute.xlu0 %4365 }
 0x3d1   : > { %2990 = vmax.xlane.f32.xlu1 %v6828_v31  ;;  %v4367_v18 = vunpack.i.l.bf16 %v4366_v44  ;;  %3149 = vmatpush.msrb.mxu2 %v4363_v46  ;;  %v4368_v41 = vunpack.i.h.bf16 %v4366_v44  ;;  %v2300_v46 = vpop.f32.mrf.mxu3  ;;  %v2946_v28 = vpop.f32.mrf.mxu1  ;;  %v6850_v24 = vadd.f32 %v6556_v48, %v2286_v40  ;;  %v6870_v51 = vadd.f32 %v6613_v43, %v2935_v42 }
 0x3d2   : > { %v2947_v60 = vadd.f32 %v2946_v28, %v6534_v58  ;;  %v2941_v42 = vadd.f32 %v6794_v30, %v9151_v16  ;;  %v9156_v16 = vld [vmem:[#allocation48_spill] sm:$0xff] }
 0x3d3   : > { %3150 = vmatpush.msrb.mxu2 %v4367_v18  ;;  %v6858_v18 = vadd.f32 %v6613_v43, %v2932_v52 }
 0x3d4   : > { %2982 = vmax.xlane.f32.xlu2 %v6835_v54 }
 0x3d5   : > { %3151 = vmatpush.msrb.mxu2 %v4368_v41  ;;  %v6863_v41 = vadd.f32 %v6613_v43, %v2947_v60 }
 0x3d8   : > { %2339 = vmax.xlane.f32.xlu0 %v6840_v17 }
 0x3d9   : > { %v1020_v63 = vpop.xlane.xlu1 %1019  ;;  %2349 = vmax.xlane.f32.xlu1 %v6845_v50  ;;  %v2303_v40 = vpop.f32.mrf.mxu3 }
 0x3da   : > { %v1036_v44 = vsub.f32 %v6546_v20, %v1020_v63  ;;  %v2292_v20 = vadd.f32 %v6750_v62, %v9152_v21  ;;  %v2304_v27 = vadd.f32 %v2303_v40, %v6534_v58  ;;  %v2295_v62 = vadd.f32 %v6789_v34, %v9149_v29  ;;  %v6894_v29 = vpop.f32.mrf.mxu0  ;;  %v9154_v40 = vld [vmem:[#allocation32_spill] sm:$0xff] }
 0x3dc   : > { %v1067_v1 = vmul.f32 1.442695, %v1036_v44  ;;  %2341 = vmax.xlane.f32.xlu2 %v6850_v24  ;;  %v6879_v44 = vadd.f32 %v6556_v48, %v2292_v20  ;;  %v6890_v21 = vadd.f32 %v6556_v48, %v2295_v62 }
 0x3de   : > { %4445 = vpow2.f32 %v1067_v1  ;;  %v6884_v1 = vadd.f32 %v6556_v48, %v2304_v27 }
 0x3e0   : > { %2986 = vmax.xlane.f32.xlu0 %v6858_v18 }
 0x3e1   : > { %v2324_v55 = vpop.xlane.xlu1 %2323  ;;  %2996 = vmax.xlane.f32.xlu1 %v6863_v41 }
 0x3e2   : > { %v2355_v28 = vsub.f32 %v6565_v53, %v2324_v55  ;;  %v2944_v55 = vadd.f32 %v6825_v8, %v9154_v40 }
 0x3e4   : > { %v6874_v63 = vpop.eup %4445  ;;  %v2371_v52 = vmul.f32 1.442695, %v2355_v28  ;;  %2988 = vmax.xlane.f32.xlu2 %v6870_v51  ;;  %v6908_v62 = vadd.f32 %v6613_v43, %v2944_v55 }
 0x3e5   : > { %9153 = vst [vmem:[#allocation49_spill] sm:$0xff] %v6874_v63  ;;  %1162 = vmatmul.f32.gmra.mxu0 %v6874_v63 }
 0x3e6   : > { %4447 = vpow2.f32 %v2371_v52  ;;  %v1647_v60 = vpop.xlane.xlu2 %1646  ;;  %v2301_v52 = vadd.f32 %v2300_v46, %v9154_v40 }
 0x3e7   : > { %v1663_v58 = vsub.f32 %v6579_v38, %v1647_v60  ;;  %v6898_v38 = vadd.f32 %v6613_v43, %v2941_v42  ;;  %v6910_v60 = vpop.f32.mrf.mxu2 }
 0x3e8   : > { %2345 = vmax.xlane.f32.xlu0 %v6879_v44  ;;  %v6915_v8 = vadd.f32 %v6556_v48, %v2301_v52 }
 0x3e9   : > { %v1694_v53 = vmul.f32 1.442695, %v1663_v58  ;;  %2353 = vmax.xlane.f32.xlu1 %v6884_v1  ;;  %v6917_v58 = vpop.f32.mrf.mxu0 }
 0x3eb   : > { %4449 = vpow2.f32 %v1694_v53 }
 0x3ec   : > { %v4448_v34 = vpop.eup %4447  ;;  %2347 = vmax.xlane.f32.xlu2 %v6890_v21 }
 0x3ed   : > { %2451 = vmatmul.f32.vlgmr.msra.gmra.mxu0 %v4448_v34 }
 0x3ee   : > { %v4371_v20 = vpop.permute.xlu2 %4370 }
 0x3ef   : > { %v4372_v28 = vunpack.i.l.bf16 %v4371_v20  ;;  %v4373_v30 = vunpack.i.h.bf16 %v4371_v20  ;;  %v6920_v43 = vpop.f32.mrf.mxu2 }
 0x3f0   : > { %2992 = vmax.xlane.f32.xlu0 %v6898_v38 }
 0x3f1   : > { %v6903_v27 = vpop.eup %4449  ;;  %1071 = vadd.xlane.f32.xlu1 %v9156_v16  ;;  %3152 = vmatpush.msrb.mxu2 %v4372_v28  ;;  %v9157_v28 = vld [vmem:[#allocation29_spill] sm:$0xff]  ;;  %v6924_v48 = vpop.f32.mrf.mxu0 }
 0x3f2   : > { %9155 = vst [vmem:[#allocation39_spill] sm:$0xff] %v6903_v27  ;;  %1853 = vmatmul.f32.gmra.mxu2 %v6903_v27  ;;  %v9158_v27 = vld [vmem:[#allocation34_spill] sm:$0xff] }
 0x3f3   : > { %3153 = vmatpush.msrb.mxu2 %v4373_v30 }
 0x3f4   : > { %2994 = vmax.xlane.f32.xlu2 %v6908_v62 }
 0x3f6   : > { %v4381_v46 = vpop.permute.xlu2 %4380 }
 0x3f7   : > { %v4382_v30 = vunpack.i.l.bf16 %v4381_v46  ;;  %v4383_v52 = vunpack.i.h.bf16 %v4381_v46  ;;  %v6927_v2 = vpop.f32.mrf.mxu2 }
 0x3f8   : > { %2351 = vmax.xlane.f32.xlu0 %v6915_v8 }
 0x3f9   : > { %v4376_v53 = vpop.permute.xlu1 %4375 }
 0x3fa   : > { %v4377_v42 = vunpack.i.l.bf16 %v4376_v53  ;;  %v4378_v55 = vunpack.i.h.bf16 %v4376_v53 }
 0x3fb   : > { %v2967_v40 = vpop.xlane.xlu0 %2966 }
 0x3fc   : > { %v2998_v20 = vsub.f32 %v6619_v19, %v2967_v40  ;;  %3154 = vmatpush.msrb.mxu2 %v4377_v42  ;;  %1069 = vadd.xlane.f32.xlu2 %v9157_v28  ;;  %v6930_v40 = vpop.f32.mrf.mxu0 }
 0x3fe   : > { %v3014_v16 = vmul.f32 1.442695, %v2998_v20  ;;  %3155 = vmatpush.msrb.mxu2 %v4378_v55  ;;  %v9159_v20 = vld [vmem:[#allocation45_spill] sm:$0xff] }
 0x3ff   : > { %v6934_v28 = vpop.f32.mrf.mxu2 }
 0x400   : > { %4451 = vpow2.f32 %v3014_v16  ;;  %3156 = vmatpush.msrb.mxu2 %v4382_v30  ;;  %1696 = vadd.xlane.f32.xlu0 %v9158_v27 }
 0x402   : > { %3157 = vmatpush.msrb.mxu2 %v4383_v52 }
 0x403   : > { %v2969_v63 = vpop.xlane.xlu0 %2968 }
 0x404   : > { %v2999_v53 = vsub.f32 %v6642_v56, %v2969_v63  ;;  %2403 = vadd.xlane.f32.xlu2 %v4448_v34  ;;  %v6936_v56 = vpop.f32.mrf.mxu0 }
 0x406   : > { %v4452_v19 = vpop.eup %4451  ;;  %v3016_v42 = vmul.f32 1.442695, %v2999_v53 }
 0x407   : > { %3158 = vmatmul.f32.vlgmr.msrb.gmra.mxu2 %v4452_v19 }
 0x408   : > { %4453 = vpow2.f32 %v3016_v42  ;;  %3046 = vadd.xlane.f32.xlu0 %v4452_v19 }
 0x40b   : > { %v2326_v55 = vpop.xlane.xlu0 %2325 }
 0x40c   : > { %v2356_v46 = vsub.f32 %v6663_v23, %v2326_v55  ;;  %1698 = vadd.xlane.f32.xlu2 %v9159_v20  ;;  %v6940_v23 = vpop.f32.mrf.mxu2  ;;  %v6942_v19 = vpop.f32.mrf.mxu0 }
 0x40e   : > { %v4454_v27 = vpop.eup %4453  ;;  %v2373_v30 = vmul.f32 1.442695, %v2356_v46 }
 0x40f   : > { %3048 = vadd.xlane.f32.xlu1 %v4454_v27  ;;  %3161 = vmatmul.f32.gmra.mxu2 %v4454_v27 }
 0x410   : > { %4455 = vpow2.f32 %v2373_v30 }
 0x413   : > { %v2328_v63 = vpop.xlane.xlu0 %2327 }
 0x414   : > { %v2357_v34 = vsub.f32 %v6681_v9, %v2328_v63  ;;  %1073 = vadd.xlane.f32.xlu2 %v6532_v6  ;;  %v6946_v6 = vpop.f32.mrf.mxu2  ;;  %v6949_v63 = vpop.f32.mrf.mxu0 }
 0x415   : > { %9160 = vst [vmem:[#allocation37_spill] sm:$0xff] %v6949_v63 }
 0x416   : > { %v4456_v16 = vpop.eup %4455  ;;  %v2375_v52 = vmul.f32 1.442695, %v2357_v34 }
 0x417   : > { %2405 = vadd.xlane.f32.xlu0 %v4456_v16  ;;  %2454 = vmatmul.f32.gmra.mxu0 %v4456_v16 }
 0x418   : > { %4457 = vpow2.f32 %v2375_v52  ;;  %v9162_v52 = vld [vmem:[#allocation36_spill] sm:$0xff] }
 0x41b   : > { %v2330_v53 = vpop.xlane.xlu0 %2329 }
 0x41c   : > { %v2358_v42 = vsub.f32 %v6697_v3, %v2330_v53  ;;  %v9161_v3 = vld [vmem:[#allocation47_spill] sm:$0xff] }
 0x41e   : > { %v4458_v55 = vpop.eup %4457  ;;  %v2377_v46 = vmul.f32 1.442695, %v2358_v42  ;;  %v6954_v42 = vpop.f32.mrf.mxu2 }
 0x41f   : > { %1700 = vadd.xlane.f32.xlu0 %v6552_v13  ;;  %2407 = vadd.xlane.f32.xlu1 %v4458_v55 }
 0x420   : > { %4459 = vpow2.f32 %v2377_v46  ;;  %2457 = vmatmul.f32.gmra.mxu0 %v4458_v55 }
 0x423   : > { %v2975_v9 = vpop.xlane.xlu0 %2974 }
 0x424   : > { %v2973_v20 = vpop.xlane.xlu1 %2972  ;;  %v3002_v16 = vsub.f32 %v6717_v12, %v2975_v9  ;;  %v6958_v12 = vpop.f32.mrf.mxu0 }
 0x425   : > { %v3001_v27 = vsub.f32 %v6722_v59, %v2973_v20  ;;  %9163 = vst [vmem:[#allocation35_spill] sm:$0xff] %v6958_v12 }
 0x426   : > { %v4460_v30 = vpop.eup %4459  ;;  %v3022_v13 = vmul.f32 1.442695, %v3002_v16 }
 0x427   : > { %v3020_v34 = vmul.f32 1.442695, %v3001_v27  ;;  %1075 = vadd.xlane.f32.xlu0 %v9161_v3  ;;  %1702 = vadd.xlane.f32.xlu1 %v9162_v52 }
 0x428   : > { %2460 = vmatmul.f32.gmra.mxu0 %v4460_v30 }
 0x429   : > { %4461 = vpow2.f32 %v3020_v34 }
 0x42a   : > { %4463 = vpow2.f32 %v3022_v13 }
 0x42b   : > { %v2332_v53 = vpop.xlane.xlu0 %2331 }
 0x42c   : > { %v2338_v55 = vpop.xlane.xlu1 %2337  ;;  %v2359_v46 = vsub.f32 %v6741_v49, %v2332_v53  ;;  %v6963_v49 = vpop.f32.mrf.mxu2 }
 0x42e   : > { %v2379_v59 = vmul.f32 1.442695, %v2359_v46  ;;  %v6966_v46 = vpop.f32.mrf.mxu0 }
 0x42f   : > { %v4462_v20 = vpop.eup %4461  ;;  %v2971_v63 = vpop.xlane.xlu2 %2970  ;;  %1077 = vadd.xlane.f32.xlu1 %v6590_v22  ;;  %9164 = vst [vmem:[#allocation46_spill] sm:$0xff] %v6966_v46 }
 0x430   : > { %4465 = vpow2.f32 %v2379_v59  ;;  %v3000_v9 = vsub.f32 %v6758_v25, %v2971_v63  ;;  %3052 = vadd.xlane.f32.xlu0 %v4462_v20  ;;  %v4464_v3 = vpop.eup %4463 }
 0x432   : > { %v3018_v27 = vmul.f32 1.442695, %v3000_v9 }
 0x433   : > { %v2977_v34 = vpop.xlane.xlu0 %2976 }
 0x434   : > { %4467 = vpow2.f32 %v3018_v27  ;;  %v6961_v16 = vpop.xlane.xlu1 %2984  ;;  %v6970_v27 = vpop.f32.mrf.mxu2 }
 0x435   : > { %9165 = vst [vmem:[#allocation52_spill] sm:$0xff] %v6970_v27 }
 0x436   : > { %v4466_v52 = vpop.eup %4465  ;;  %v6975_v46 = vpop.f32.mrf.mxu0 }
 0x437   : > { %v2334_v53 = vpop.xlane.xlu2 %2333  ;;  %3054 = vadd.xlane.f32.xlu1 %v4464_v3  ;;  %2463 = vmatmul.f32.gmra.mxu0 %v4466_v52 }
 0x438   : > { %v2360_v22 = vsub.f32 %v6785_v5, %v2334_v53  ;;  %2411 = vadd.xlane.f32.xlu0 %v4466_v52 }
 0x43a   : > { %v4468_v13 = vpop.eup %4467  ;;  %v2381_v25 = vmul.f32 1.442695, %v2360_v22 }
 0x43b   : > { %3050 = vadd.xlane.f32.xlu2 %v4468_v13  ;;  %v2979_v63 = vpop.xlane.xlu0 %2978  ;;  %3164 = vmatmul.f32.gmra.mxu2 %v4468_v13  ;;  %v2362_v13 = vsub.f32 %v6746_v47, %v2338_v55 }
 0x43c   : > { %4469 = vpow2.f32 %v2381_v25  ;;  %v6968_v59 = vpop.xlane.xlu1 %2343  ;;  %v3004_v5 = vsub.f32 %v6800_v45, %v2979_v63  ;;  %v3003_v25 = vsub.f32 %v6772_v7, %v2977_v34 }
 0x43e   : > { %v3026_v27 = vmul.f32 1.442695, %v3004_v5  ;;  %v3024_v45 = vmul.f32 1.442695, %v3003_v25 }
 0x43f   : > { %v2336_v9 = vpop.xlane.xlu2 %2335 }
 0x440   : > { %v2361_v12 = vsub.f32 %v6813_v4, %v2336_v9  ;;  %1706 = vadd.xlane.f32.xlu0 %v6605_v11  ;;  %v2385_v9 = vmul.f32 1.442695, %v2362_v13 }
 0x442   : > { %v4470_v52 = vpop.eup %4469  ;;  %v2383_v53 = vmul.f32 1.442695, %v2361_v12  ;;  %v6982_v12 = vpop.f32.mrf.mxu2 }
 0x443   : > { %2409 = vadd.xlane.f32.xlu2 %v4460_v30  ;;  %2413 = vadd.xlane.f32.xlu1 %v4470_v52  ;;  %v2981_v22 = vpop.xlane.xlu0 %2980 }
 0x444   : > { %4471 = vpow2.f32 %v2383_v53  ;;  %2466 = vmatmul.f32.gmra.mxu0 %v4470_v52  ;;  %3167 = vmatmul.f32.gmra.mxu2 %v4462_v20  ;;  %v6979_v4 = vpop.xlane.xlu1 %2990  ;;  %v3005_v7 = vsub.f32 %v6821_v33, %v2981_v22  ;;  %v6988_v20 = vpop.f32.mrf.mxu0  ;;  %v9166_v52 = vld [vmem:[#allocation55_spill] sm:$0xff] }
 0x445   : > { %4473 = vpow2.f32 %v3026_v27 }
 0x446   : > { %4475 = vpow2.f32 %v2385_v9  ;;  %v3028_v27 = vmul.f32 1.442695, %v3005_v7 }
 0x447   : > { %v2983_v11 = vpop.xlane.xlu2 %2982  ;;  %4477 = vpow2.f32 %v3024_v45 }
 0x448   : > { %1081 = vadd.xlane.f32.xlu0 %v6623_v32  ;;  %4479 = vpow2.f32 %v3028_v27  ;;  %v3007_v27 = vsub.f32 %v6775_v14, %v6961_v16  ;;  %v3486_v14 = vld [vmem:[#allocation11 + $0x38] sm:$0xff] }
 0x449   : > { %3548 = vmatpush.msra.mxu3 %v3486_v14  ;;  %v3481_v14 = vld [vmem:[#allocation11 + $0x10] sm:$0xff] }
 0x44a   : > { %v4472_v30 = vpop.eup %4471 }
 0x44b   : > { %1704 = vadd.xlane.f32.xlu2 %v6592_v61  ;;  %1708 = vadd.xlane.f32.xlu1 %v6626_v26  ;;  %v2340_v47 = vpop.xlane.xlu0 %2339  ;;  %v4474_v32 = vpop.eup %4473 }
 0x44c   : > { %2469 = vmatmul.f32.gmra.mxu0 %v4472_v30  ;;  %3170 = vmatmul.f32.gmra.mxu2 %v4464_v3  ;;  %v2363_v55 = vsub.f32 %v6840_v17, %v2340_v47  ;;  %v6990_v34 = vpop.xlane.xlu1 %2349  ;;  %v4476_v5 = vpop.eup %4475  ;;  %v2365_v47 = vsub.f32 %v6803_v39, %v6968_v59  ;;  %v3032_v59 = vmul.f32 1.442695, %v3007_v27 }
 0x44d   : > { %v4478_v26 = vpop.eup %4477  ;;  %v6996_v3 = vpop.f32.mrf.mxu2 }
 0x44e   : > { %v2387_v61 = vmul.f32 1.442695, %v2363_v55  ;;  %v7001_v22 = vpop.f32.mrf.mxu0  ;;  %v4480_v9 = vpop.eup %4479 }
 0x44f   : > { %v2342_v63 = vpop.xlane.xlu2 %2341 }
 0x450   : > { %3058 = vadd.xlane.f32.xlu0 %v4474_v32  ;;  %4481 = vpow2.f32 %v2387_v61  ;;  %v2364_v17 = vsub.f32 %v6850_v24, %v2342_v63  ;;  %v3006_v24 = vsub.f32 %v6835_v54, %v2983_v11  ;;  %v2391_v63 = vmul.f32 1.442695, %v2365_v47  ;;  %v3485_v11 = vld [vmem:[#allocation11 + $0x30] sm:$0xff] }
 0x451   : > { %3549 = vmatpush.msra.mxu3 %v3485_v11 }
 0x452   : > { %v2389_v13 = vmul.f32 1.442695, %v2364_v17  ;;  %v3030_v61 = vmul.f32 1.442695, %v3006_v24  ;;  %v3484_v17 = vld [vmem:[#allocation11 + $0x28] sm:$0xff]  ;;  %v3483_v24 = vld [vmem:[#allocation11 + $0x20] sm:$0xff] }
 0x453   : > { %1079 = vadd.xlane.f32.xlu2 %v9166_v52  ;;  %1083 = vadd.xlane.f32.xlu1 %v6644_v0  ;;  %v6994_v33 = vpop.xlane.xlu0 %2986  ;;  %v9167_v52 = vld [vmem:[#allocation33_spill] sm:$0xff] }
 0x454   : > { %2472 = vmatmul.f32.gmra.mxu0 %v4476_v5  ;;  %3173 = vmatmul.f32.gmra.mxu2 %v4478_v26  ;;  %v7003_v25 = vpop.xlane.xlu1 %2996  ;;  %4483 = vpow2.f32 %v2389_v13 }
 0x455   : > { %v7008_v7 = vpop.f32.mrf.mxu2  ;;  %4485 = vpow2.f32 %v2391_v63  ;;  %3550 = vmatpush.msra.mxu3 %v3484_v17  ;;  %v2368_v17 = vsub.f32 %v6845_v50, %v6990_v34 }
 0x456   : > { %v4482_v0 = vpop.eup %4481  ;;  %4487 = vpow2.f32 %v3030_v61 }
 0x457   : > { %v6999_v53 = vpop.xlane.xlu2 %2988  ;;  %4489 = vpow2.f32 %v3032_v59  ;;  %3551 = vmatpush.msra.mxu3 %v3483_v24  ;;  %v3482_v59 = vld [vmem:[#allocation11 + $0x18] sm:$0xff] }
 0x458   : > { %2417 = vadd.xlane.f32.xlu0 %v4476_v5  ;;  %v7013_v5 = vpop.f32.mrf.mxu0 }
 0x459   : > { %3552 = vmatpush.msra.mxu3 %v3482_v59 }
 0x45b   : > { %3056 = vadd.xlane.f32.xlu2 %v4478_v26  ;;  %3060 = vadd.xlane.f32.xlu1 %v4480_v9  ;;  %v2346_v45 = vpop.xlane.xlu0 %2345  ;;  %v7015_v26 = vpop.eup %4483 }
 0x45c   : > { %2475 = vmatmul.f32.gmra.mxu0 %v4482_v0  ;;  %3176 = vmatmul.f32.gmra.mxu2 %v4474_v32  ;;  %v7017_v39 = vpop.xlane.xlu1 %2353  ;;  %v4486_v13 = vpop.eup %4485 }
 0x45d   : > { %v7025_v32 = vpop.f32.mrf.mxu2  ;;  %3553 = vmatpush.msra.mxu3 %v3481_v14 }
 0x45f   : > { %v2348_v55 = vpop.xlane.xlu2 %2347 }
 0x460   : > { %1712 = vadd.xlane.f32.xlu0 %v6667_v36  ;;  %v2366_v36 = vsub.f32 %v6879_v44, %v2346_v45  ;;  %v3008_v44 = vsub.f32 %v6858_v18, %v6994_v33  ;;  %v9169_v45 = vld [vmem:[#allocation43_spill] sm:$0xff]  ;;  %v7035_v63 = vpop.f32.mrf.mxu0  ;;  %v2367_v27 = vsub.f32 %v6890_v21, %v2348_v55  ;;  %v3010_v21 = vsub.f32 %v6828_v31, %v6979_v4  ;;  %v3479_v31 = vld [vmem:[#allocation11] sm:$0xff] }
 0x461   : > { %9170 = vst [vmem:[#allocation50_spill] sm:$0xff] %v7035_v63  ;;  %v3009_v4 = vsub.f32 %v6870_v51, %v6999_v53 }
 0x462   : > { %v3034_v18 = vmul.f32 1.442695, %v3008_v44  ;;  %v2395_v11 = vmul.f32 1.442695, %v2367_v27  ;;  %v9172_v44 = vld [vmem:[#allocation54_spill] sm:$0xff] }
 0x463   : > { %2415 = vadd.xlane.f32.xlu2 %v4472_v30  ;;  %2419 = vadd.xlane.f32.xlu1 %v4482_v0  ;;  %v7019_v54 = vpop.xlane.xlu0 %2992  ;;  %v2393_v30 = vmul.f32 1.442695, %v2366_v36  ;;  %v9168_v0 = vld [vmem:[#allocation40_spill] sm:$0xff]  ;;  %v3038_v50 = vmul.f32 1.442695, %v3010_v21 }
 0x464   : > { %2478 = vmatmul.f32.gmra.mxu0 %v7015_v26  ;;  %3179 = vmatmul.f32.gmra.mxu2 %v4480_v9  ;;  %v7028_v9 = vpop.eup %4487  ;;  %v7038_v61 = vpop.xlane.xlu1 %1071 }
 0x465   : > { %4491 = vpow2.f32 %v2393_v30  ;;  %v4490_v36 = vpop.eup %4489  ;;  %v7046_v55 = vpop.f32.mrf.mxu2 }
 0x466   : > { %4493 = vrcp.f32 %v7038_v61  ;;  %9171 = vst [vmem:[#allocation56_spill] sm:$0xff] %v7046_v55 }
 0x467   : > { %v7023_v16 = vpop.xlane.xlu2 %2994 }
 0x468   : > { %1087 = vadd.xlane.f32.xlu0 %v9167_v52  ;;  %v3480_v52 = vld [vmem:[#allocation11 + $0x8] sm:$0xff]  ;;  %v7065_v59 = vpop.f32.mrf.mxu0 }
 0x469   : > { %3554 = vmatpush.msra.mxu3 %v3480_v52  ;;  %9174 = vst [vmem:[#allocation58_spill] sm:$0xff] %v7065_v59 }
 0x46b   : > { %1710 = vadd.xlane.f32.xlu2 %v9168_v0  ;;  %1714 = vadd.xlane.f32.xlu1 %v9169_v45  ;;  %v2352_v47 = vpop.xlane.xlu0 %2351  ;;  %v7048_v30 = vpop.eup %4491  ;;  %v9173_v0 = vld [vmem:[#allocation51_spill] sm:$0xff] }
 0x46c   : > { %2481 = vmatmul.f32.gmra.mxu0 %v4486_v13  ;;  %3182 = vmatmul.f32.gmra.mxu2 %v7028_v9  ;;  %v7060_v24 = vpop.eup %4493  ;;  %v2369_v34 = vsub.f32 %v6915_v8, %v2352_v47  ;;  %v3011_v8 = vsub.f32 %v6898_v38, %v7019_v54 }
 0x46d   : > { %3555 = vmatpush.msra.mxu3 %v3479_v31  ;;  %v7080_v21 = vmul.f32 %v7060_v24, %v7038_v61  ;;  %v7089_v38 = vpop.f32.mrf.mxu2 }
 0x46e   : > { %v2399_v52 = vmul.f32 1.442695, %v2369_v34  ;;  %9175 = vst [vmem:[#allocation59_spill] sm:$0xff] %v7089_v38 }
 0x46f   : > { %v7040_v33 = vpop.xlane.xlu2 %1069 }
 0x470   : > { %3064 = vadd.xlane.f32.xlu0 %v4490_v36  ;;  %4495 = vrcp.f32 %v7040_v33  ;;  %v1175_v31 = vand.u32 2147483647, %v7040_v33  ;;  %v1177_v34 = vand.u32 2147483648, %v7040_v33  ;;  %vm1171_vm3 = vweird.f32 %v7040_v33 }
 0x471   : > { %4497 = vpow2.f32 %v3034_v18  ;;  %v2397_v18 = vmul.f32 1.442695, %v2368_v17 }
 0x472   : > { %vm7122_vm5 = vcmp.eq.f32.partialorder %v1175_v31, 8.507059e+37 }
 0x473   : > { %1085 = vadd.xlane.f32.xlu2 %v9172_v44  ;;  %1089 = vadd.xlane.f32.xlu1 %v9173_v0  ;;  %v7054_v45 = vpop.xlane.xlu0 %1696  ;;  %v7096_v0 = vmul.f32 1.442695, %v3011_v8 }
 0x474   : > { %2484 = vmatmul.f32.gmra.mxu0 %v7048_v30  ;;  %4499 = vrcp.f32 %v7054_v45  ;;  %3185 = vmatmul.f32.gmra.mxu2 %v4490_v36  ;;  %v2370_v36 = vsub.f32 %v6884_v1, %v7017_v39  ;;  %vm1862_vm7 = vweird.f32 %v7054_v45 }
 0x475   : > { %4501 = vpow2.f32 %v2395_v11  ;;  %v3036_v11 = vmul.f32 1.442695, %v3009_v4  ;;  %v7159_v63 = vpop.f32.mrf.mxu2 }
 0x476   : > { %v7063_v27 = vpop.eup %4495  ;;  %v7091_v54 = vmul.f32 1.442695, %v2370_v36  ;;  %v7104_v36 = vpop.f32.mrf.mxu0  ;;  %9183 = vst [vmem:[#allocation44_spill] sm:$0xff] %v7159_v63 }
 0x477   : > { %v7067_v14 = vpop.xlane.xlu2 %2403  ;;  %v1167_v51 = vmul.f32 %v7063_v27, %v7040_v33  ;;  %v4498_v53 = vpop.eup %4497  ;;  %9176 = vst [vmem:[#allocation60_spill] sm:$0xff] %v7104_v36  ;;  %vm1172_vm2 = vweird.f32 %v7063_v27 }
 0x478   : > { %4503 = vrcp.f32 %v7067_v14  ;;  %2423 = vadd.xlane.f32.xlu0 %v4486_v13  ;;  %v2511_v36 = vand.u32 2147483648, %v7067_v14  ;;  %vm7132_vm6 = vmor %vm1171_vm3, %vm1172_vm2  ;;  %vm2505_vm11 = vweird.f32 %v7067_v14  ;;  %vm1186_vm2 = vweird.f32 %v7060_v24 }
 0x479   : > { %4505 = vpow2.f32 %v3038_v50  ;;  %v1168_v1 = vsub.f32 1.0, %v1167_v51  ;;  %v1182_v50 = vsub.f32 1.0, %v7080_v21  ;;  %v1866_v21 = vand.u32 2147483647, %v7054_v45 }
 0x47a   : > { %v7076_v47 = vpop.eup %4499  ;;  %4507 = vpow2.f32 %v2397_v18  ;;  %v1868_v18 = vand.u32 2147483648, %v7054_v45 }
 0x47b   : > { %v7082_v39 = vpop.eup %4501  ;;  %v1858_v13 = vmul.f32 %v7076_v47, %v7054_v45  ;;  %3062 = vadd.xlane.f32.xlu2 %v7028_v9  ;;  %3066 = vadd.xlane.f32.xlu1 %v4498_v53  ;;  %v7087_v17 = vpop.xlane.xlu0 %3046  ;;  %v1169_v44 = vmul.f32 %v7063_v27, %v1168_v1  ;;  %vm1863_vm4 = vweird.f32 %v7076_v47  ;;  %vm1867_vm10 = vcmp.eq.f32.partialorder %v1866_v21, 8.507059e+37 }
 0x47c   : > { %2487 = vmatmul.f32.gmra.mxu0 %v7082_v39  ;;  %4509 = vrcp.f32 %v7087_v17  ;;  %3188 = vmatmul.f32.gmra.mxu2 %v4498_v53  ;;  %v1869_v31 = vor.u32 1.1754944e-38, %v1868_v18  ;;  %vm7144_vm9 = vmor %vm1862_vm7, %vm1863_vm4  ;;  %vm3212_vm15 = vweird.f32 %v7087_v17 }
 0x47d   : > { %4511 = vpow2.f32 %v3036_v11  ;;  %v1859_v9 = vsub.f32 1.0, %v1858_v13  ;;  %v1170_v51 = vadd.f32 %v7063_v27, %v1169_v44  ;;  %v1183_v13 = vmul.f32 %v7060_v24, %v1182_v50 }
 0x47e   : > { %v7099_v4 = vpop.eup %4503  ;;  %4513 = vpow2.f32 %v2399_v52 }
 0x47f   : > { %v1860_v53 = vmul.f32 %v7076_v47, %v1859_v9  ;;  %v2501_v11 = vmul.f32 %v7099_v4, %v7067_v14  ;;  %v7111_v8 = vpop.xlane.xlu2 %1698  ;;  %v7113_v1 = vpop.eup %4505  ;;  %vm2506_vm8 = vweird.f32 %v7099_v4  ;;  %v1174_v45 = vsel %vm7132_vm6, %v7063_v27, %v1170_v51 }
 0x480   : > { %4515 = vrcp.f32 %v7111_v8  ;;  %1718 = vadd.xlane.f32.xlu0 %v6729_v15  ;;  %v7120_v52 = vpop.eup %4507  ;;  %v1178_v15 = vor.u32 1.1754944e-38, %v1177_v34  ;;  %v2512_v27 = vor.u32 1.1754944e-38, %v2511_v36  ;;  %vm7173_vm12 = vmor %vm2505_vm11, %vm2506_vm8  ;;  %vm1876_vm4 = vweird.f32 %v7111_v8 }
 0x481   : > { %v1861_v44 = vadd.f32 %v7076_v47, %v1860_v53  ;;  %v2502_v9 = vsub.f32 1.0, %v2501_v11 }
 0x482   : > { %v7128_v33 = vpop.eup %4509  ;;  %v7138_v55 = vpop.xlane.xlu1 %3048 }
 0x483   : > { %v7140_v53 = vpop.eup %4511  ;;  %v2503_v38 = vmul.f32 %v7099_v4, %v2502_v9  ;;  %v3208_v34 = vmul.f32 %v7128_v33, %v7087_v17  ;;  %4517 = vrcp.f32 %v7138_v55  ;;  %2421 = vadd.xlane.f32.xlu2 %v7015_v26  ;;  %2425 = vadd.xlane.f32.xlu1 %v7048_v30  ;;  %v2509_v9 = vand.u32 2147483647, %v7067_v14 }
 0x484   : > { %v7157_v18 = vpop.eup %4513  ;;  %2490 = vmatmul.f32.gmra.mxu0 %v7120_v52  ;;  %3191 = vmatmul.f32.gmra.mxu2 %v7140_v53  ;;  %v1865_v26 = vsel %vm7144_vm9, %v7076_v47, %v1861_v44  ;;  %v1179_v14 = vsel %vm7122_vm5, %v1178_v15, %v1174_v45  ;;  %vm3213_vm13 = vweird.f32 %v7128_v33  ;;  %v3216_v47 = vand.u32 2147483647, %v7087_v17  ;;  %v2452_v45 = vpop.f32.mrf.mxu0 }
 0x485   : > { %v2504_v30 = vadd.f32 %v7099_v4, %v2503_v38  ;;  %v3209_v59 = vsub.f32 1.0, %v3208_v34  ;;  %v1870_v51 = vsel %vm1867_vm10, %v1869_v31, %v1865_v26  ;;  %v3218_v38 = vand.u32 2147483648, %v7087_v17  ;;  %vm3214_vm0 = vmor %vm3212_vm15, %vm3213_vm13 }
 0x486   : > { %v7169_v21 = vpop.eup %4515  ;;  %v2081_v44 = vmul.f32 %v1870_v51, %v6910_v60  ;;  %v3012_v15 = vsub.f32 %v6908_v62, %v7023_v16  ;;  %vm2510_vm14 = vcmp.eq.f32.partialorder %v2509_v9, 8.507059e+37  ;;  %v1390_v26 = vmul.f32 %v1179_v14, %v6894_v29  ;;  %v9186_v9 = vld [vmem:[#allocation38_spill] sm:$0xff] }
 0x487   : > { %v1872_v36 = vmul.f32 %v7169_v21, %v7111_v8  ;;  %v2508_v31 = vsel %vm7173_vm12, %v7099_v4, %v2504_v30  ;;  %v3210_v11 = vmul.f32 %v7128_v33, %v3209_v59  ;;  %vm3217_vm1 = vcmp.eq.f32.partialorder %v3216_v47, 8.507059e+37 }
 0x488   : > { %1093 = vadd.xlane.f32.xlu0 %v6748_v37  ;;  %v2513_v63 = vsel %vm2510_vm14, %v2512_v27, %v2508_v31  ;;  %v3219_v37 = vor.u32 1.1754944e-38, %v3218_v38  ;;  %v2097_v17 = vadd.f32 %v2081_v44, %v1390_v26  ;;  %v1189_v27 = vand.u32 2147483647, %v7038_v61 }
 0x489   : > { %v7194_v34 = vpop.eup %4517  ;;  %v1873_v60 = vsub.f32 1.0, %v1872_v36  ;;  %v3211_v4 = vadd.f32 %v7128_v33, %v3210_v11  ;;  %v2724_v62 = vmul.f32 %v2513_v63, %v2452_v45  ;;  %v1191_v47 = vand.u32 2147483648, %v7038_v61  ;;  %v7237_v63 = vpop.xlane.xlu2 %1073 }
 0x48a   : > { %v3222_v50 = vmul.f32 %v7194_v34, %v7138_v55  ;;  %v7200_v30 = vpop.xlane.xlu0 %2405  ;;  %v3159_v51 = vpop.f32.mrf.mxu2  ;;  %vm1877_vm3 = vweird.f32 %v7169_v21  ;;  %v1184_v36 = vadd.f32 %v7060_v24, %v1183_v13  ;;  %v1880_v44 = vand.u32 2147483647, %v7111_v8 }
 0x48b   : > { %v1874_v16 = vmul.f32 %v7169_v21, %v1873_v60  ;;  %4519 = vrcp.f32 %v7200_v30  ;;  %v3215_v29 = vsel %vm3214_vm0, %v7128_v33, %v3211_v4  ;;  %1716 = vadd.xlane.f32.xlu2 %v9186_v9  ;;  %1720 = vadd.xlane.f32.xlu1 %v6753_v10  ;;  %v2740_v33 = vadd.f32 %v2724_v62, %v2097_v17  ;;  %vm7233_vm7 = vmor %vm1876_vm4, %vm1877_vm3 }
 0x48c   : > { %4521 = vpow2.f32 %v7091_v54  ;;  %v3223_v59 = vsub.f32 1.0, %v3222_v50  ;;  %v3220_v14 = vsel %vm3217_vm1, %v3219_v37, %v3215_v29  ;;  %2493 = vmatmul.f32.gmra.mxu0 %v7157_v18  ;;  %3194 = vmatmul.f32.gmra.mxu2 %v7113_v1  ;;  %v3042_v10 = vmul.f32 1.442695, %v3012_v15 }
 0x48d   : > { %4523 = vpow2.f32 %v7096_v0  ;;  %v3431_v38 = vmul.f32 %v3220_v14, %v3159_v51  ;;  %v1875_v54 = vadd.f32 %v7169_v21, %v1874_v16  ;;  %v1882_v31 = vand.u32 2147483648, %v7111_v8 }
 0x48e   : > { %v3013_v0 = vsub.f32 %v6863_v41, %v7003_v25  ;;  %v3224_v15 = vmul.f32 %v7194_v34, %v3223_v59  ;;  %vm1185_vm5 = vweird.f32 %v7038_v61  ;;  %vm7229_vm6 = vcmp.eq.f32.partialorder %v1189_v27, 8.507059e+37 }
 0x48f   : > { %v7221_v11 = vadd.f32 %v3431_v38, %v2740_v33  ;;  %v1192_v60 = vor.u32 1.1754944e-38, %v1191_v47  ;;  %vm7244_vm8 = vmor %vm1185_vm5, %vm1186_vm2  ;;  %4525 = vpow2.f32 %v3042_v10  ;;  %vm3491_vm9 = vcmask 523264  }
 0x490   : > { %3070 = vadd.xlane.f32.xlu0 %v7113_v1  ;;  %v1879_v4 = vsel %vm7233_vm7, %v7169_v21, %v1875_v54  ;;  %vm7254_vm10 = vcmp.eq.f32.partialorder %v1880_v44, 8.507059e+37  ;;  %v1883_v37 = vor.u32 1.1754944e-38, %v1882_v31  ;;  %vm3226_vm11 = vweird.f32 %v7138_v55 }
 0x491   : > { %v4520_v45 = vpop.eup %4519  ;;  %v9014_v41 = vmax.f32 %v7221_v11, 0.0  ;;  %v1188_v17 = vsel %vm7244_vm8, %v7060_v24, %v1184_v36  ;;  %4527 = vrcp.f32 %v7237_v63  ;;  %v3225_v29 = vadd.f32 %v7194_v34, %v3224_v15 }
 0x492   : > { %v7240_v25 = vpop.eup %4521  ;;  %v2515_v61 = vmul.f32 %v4520_v45, %v7200_v30  ;;  %v7249_v1 = vpop.xlane.xlu0 %1700  ;;  %vm3227_vm12 = vweird.f32 %v7194_v34  ;;  %v2525_v24 = vand.u32 2147483648, %v7200_v30  ;;  %v3230_v9 = vand.u32 2147483647, %v7138_v55 }
 0x493   : > { %v4524_v50 = vpop.eup %4523  ;;  %v7258_v16 = vpop.xlane.xlu1 %2407  ;;  %1091 = vadd.xlane.f32.xlu2 %v6724_v35  ;;  %1095 = vadd.xlane.f32.xlu1 %v6777_v57  ;;  %4529 = vrcp.f32 %v7249_v1  ;;  %v3232_v35 = vand.u32 2147483648, %v7138_v55  ;;  %v1884_v57 = vsel %vm7254_vm10, %v1883_v37, %v1879_v4  ;;  %vm2520_vm13 = vweird.f32 %v4520_v45  ;;  %vm7282_vm14 = vmor %vm3226_vm11, %vm3227_vm12 }
 0x494   : > { %v2516_v21 = vsub.f32 1.0, %v2515_v61  ;;  %2496 = vmatmul.f32.gmra.mxu0 %v7240_v25  ;;  %3197 = vmatmul.f32.gmra.mxu2 %v4524_v50  ;;  %v2523_v59 = vand.u32 2147483647, %v7200_v30  ;;  %v1193_v14 = vsel %vm7229_vm6, %v1192_v60, %v1188_v17  ;;  %v3229_v33 = vsel %vm7282_vm14, %v7194_v34, %v3225_v29 }
 0x495   : > { %4137 = vmatmul.msk.f32.vlgmr.msra.gmra.mxu3 %vm3491_vm9, %v9014_v41  ;;  %v7288_v47 = vpop.eup %4525  ;;  %v2082_v38 = vmul.f32 %v1884_v57, %v6920_v43  ;;  %vm2519_vm15 = vweird.f32 %v7200_v30  ;;  %v3044_v55 = vmul.f32 1.442695, %v3013_v0  ;;  %v3233_v54 = vor.u32 1.1754944e-38, %v3232_v35  ;;  %v3162_v43 = vpop.f32.mrf.mxu2 }
 0x496   : > { %v2517_v27 = vmul.f32 %v4520_v45, %v2516_v21  ;;  %vm2521_vm0 = vmor %vm2519_vm15, %vm2520_vm13  ;;  %v2526_v36 = vor.u32 1.1754944e-38, %v2525_v24  ;;  %vm3231_vm1 = vcmp.eq.f32.partialorder %v3230_v9, 8.507059e+37  ;;  %v1391_v31 = vmul.f32 %v1193_v14, %v6917_v58 }
 0x497   : > { %v7296_v44 = vpop.eup %4527  ;;  %vm2524_vm2 = vcmp.eq.f32.partialorder %v2523_v59, 8.507059e+37  ;;  %4531 = vrcp.f32 %v7258_v16  ;;  %v3234_v30 = vsel %vm3231_vm1, %v3233_v54, %v3229_v33  ;;  %v1203_v14 = vand.u32 2147483647, %v7237_v63 }
 0x498   : > { %v2518_v10 = vadd.f32 %v4520_v45, %v2517_v27  ;;  %2429 = vadd.xlane.f32.xlu0 %v7120_v52  ;;  %v2455_v52 = vpop.f32.mrf.mxu0  ;;  %v2098_v60 = vadd.f32 %v2082_v38, %v1391_v31  ;;  %4533 = vpow2.f32 %v3044_v55  ;;  %v1195_v58 = vmul.f32 %v7296_v44, %v7237_v63 }
 0x499   : > { %v7301_v34 = vpop.eup %4529  ;;  %v3432_v61 = vmul.f32 %v3234_v30, %v3162_v43  ;;  %vm1200_vm3 = vweird.f32 %v7296_v44  ;;  %v1205_v33 = vand.u32 2147483648, %v7237_v63  ;;  %vm1199_vm5 = vweird.f32 %v7237_v63  ;;  %v9200_v43 = vld [vmem:[#allocation39_spill] sm:$0xff] }
 0x49a   : > { %v2522_v15 = vsel %vm2521_vm0, %v4520_v45, %v2518_v10  ;;  %v7299_v13 = vpop.xlane.xlu0 %1075  ;;  %v1886_v8 = vmul.f32 %v7301_v34, %v7249_v1  ;;  %v1196_v37 = vsub.f32 1.0, %v1195_v58  ;;  %vm1891_vm4 = vweird.f32 %v7301_v34  ;;  %vm7354_vm6 = vmor %vm1199_vm5, %vm1200_vm3 }
 0x49b   : > { %v2527_v0 = vsel %vm2524_vm2, %v2526_v36, %v2522_v15  ;;  %3068 = vadd.xlane.f32.xlu2 %v7140_v53  ;;  %3072 = vadd.xlane.f32.xlu1 %v4524_v50  ;;  %v7308_v45 = vpop.xlane.xlu1 %1702  ;;  %v9197_v53 = vld [vmem:[#allocation57_spill] sm:$0xff]  ;;  %v1896_v36 = vand.u32 2147483648, %v7249_v1  ;;  %vm1890_vm7 = vweird.f32 %v7249_v1  ;;  %vm1204_vm8 = vcmp.eq.f32.partialorder %v1203_v14, 8.507059e+37 }
 0x49c   : > { %v2725_v26 = vmul.f32 %v2527_v0, %v2455_v52  ;;  %3200 = vmatmul.f32.gmra.mxu2 %v7288_v47  ;;  %4535 = vrcp.f32 %v7308_v45  ;;  %v1887_v17 = vsub.f32 1.0, %v1886_v8  ;;  %v1197_v24 = vmul.f32 %v7296_v44, %v1196_v37  ;;  %v9199_v15 = vld [vmem:[#allocation53_spill] sm:$0xff]  ;;  %vm7362_vm10 = vmor %vm1890_vm7, %vm1891_vm4 }
 0x49d   : > { %v7316_v50 = vpop.eup %4531  ;;  %4537 = vrcp.f32 %v7299_v13  ;;  %v1894_v52 = vand.u32 2147483647, %v7249_v1  ;;  %v2539_v37 = vand.u32 2147483648, %v7258_v16  ;;  %vm2533_vm13 = vweird.f32 %v7258_v16 }
 0x49e   : > { %v2741_v4 = vadd.f32 %v2725_v26, %v2098_v60  ;;  %v4534_v29 = vpop.eup %4533  ;;  %v2529_v57 = vmul.f32 %v7316_v50, %v7258_v16  ;;  %v1888_v27 = vmul.f32 %v7301_v34, %v1887_v17  ;;  %v1206_v26 = vor.u32 1.1754944e-38, %v1205_v33  ;;  %v9209_v33 = vld [vmem:[#allocation41_spill] sm:$0xff] }
 0x49f   : > { %vm1895_vm11 = vcmp.eq.f32.partialorder %v1894_v52, 8.507059e+37  ;;  %vm2534_vm12 = vweird.f32 %v7316_v50  ;;  %vm1904_vm14 = vweird.f32 %v7308_v45  ;;  %v2540_v14 = vor.u32 1.1754944e-38, %v2539_v37 }
 0x4a0   : > { %v7312_v62 = vadd.f32 %v3432_v61, %v2741_v4  ;;  %1724 = vadd.xlane.f32.xlu0 %v9197_v53  ;;  %v2530_v51 = vsub.f32 1.0, %v2529_v57  ;;  %v1889_v10 = vadd.f32 %v7301_v34, %v1888_v27  ;;  %v1897_v4 = vor.u32 1.1754944e-38, %v1896_v36  ;;  %vm7390_vm15 = vmor %vm2533_vm13, %vm2534_vm12 }
 0x4a1   : > { %v2537_v53 = vand.u32 2147483647, %v7258_v16  ;;  %v1908_v16 = vand.u32 2147483647, %v7308_v45  ;;  %v1217_v36 = vand.u32 2147483647, %v7299_v13  ;;  %vm1213_vm3 = vweird.f32 %v7299_v13 }
 0x4a2   : > { %v9015_v21 = vmax.f32 %v7312_v62, 0.0  ;;  %v7330_v9 = vpop.eup %4535  ;;  %v2531_v0 = vmul.f32 %v7316_v50, %v2530_v51  ;;  %v1893_v1 = vsel %vm7362_vm10, %v7301_v34, %v1889_v10  ;;  %v1910_v10 = vand.u32 2147483648, %v7308_v45 }
 0x4a3   : > { %v7320_v35 = vpop.xlane.xlu0 %3052  ;;  %2427 = vadd.xlane.f32.xlu2 %v7082_v39  ;;  %2431 = vadd.xlane.f32.xlu1 %v7157_v18  ;;  %v7333_v59 = vpop.eup %4537  ;;  %v9198_v39 = vld [vmem:[#allocation49_spill] sm:$0xff]  ;;  %v1198_v18 = vadd.f32 %v7296_v44, %v1197_v24  ;;  %v1900_v55 = vmul.f32 %v7330_v9, %v7308_v45  ;;  %v1898_v57 = vsel %vm1895_vm11, %v1897_v4, %v1893_v1  ;;  %vm7394_vm0 = vcmp.eq.f32.partialorder %v2537_v53, 8.507059e+37 }
 0x4a4   : > { %3203 = vmatmul.f32.gmra.mxu2 %v4534_v29  ;;  %4138 = vmatmul.msk.f32.gmra.mxu3 %vm3491_vm9, %v9015_v21  ;;  %v7340_v38 = vpop.xlane.xlu1 %1077  ;;  %v1209_v54 = vmul.f32 %v7333_v59, %v7299_v13  ;;  %v2532_v17 = vadd.f32 %v7316_v50, %v2531_v0  ;;  %vm1905_vm1 = vweird.f32 %v7330_v9  ;;  %vm1214_vm2 = vweird.f32 %v7333_v59 }
 0x4a5   : > { %4539 = vrcp.f32 %v7340_v38  ;;  %v1202_v60 = vsel %vm7354_vm6, %v7296_v44, %v1198_v18  ;;  %v1901_v58 = vsub.f32 1.0, %v1900_v55  ;;  %v2083_v55 = vmul.f32 %v1898_v57, %v6927_v2  ;;  %vm7435_vm4 = vmor %vm1904_vm14, %vm1905_vm1 }
 0x4a6   : > { %4541 = vrcp.f32 %v7320_v35  ;;  %v1210_v8 = vsub.f32 1.0, %v1209_v54  ;;  %v1207_v44 = vsel %vm1204_vm8, %v1206_v26, %v1202_v60  ;;  %v1219_v60 = vand.u32 2147483648, %v7299_v13  ;;  %vm7446_vm6 = vmor %vm1213_vm3, %vm1214_vm2 }
 0x4a7   : > { %v1902_v34 = vmul.f32 %v7330_v9, %v1901_v58  ;;  %vm7439_vm5 = vcmp.eq.f32.partialorder %v1908_v16, 8.507059e+37  ;;  %v1233_v4 = vand.u32 2147483648, %v7340_v38  ;;  %v1911_v37 = vor.u32 1.1754944e-38, %v1910_v10 }
 0x4a8   : > { %1099 = vadd.xlane.f32.xlu0 %v9198_v39  ;;  %v1211_v27 = vmul.f32 %v7333_v59, %v1210_v8  ;;  %v1392_v39 = vmul.f32 %v1207_v44, %v6924_v48  ;;  %v2536_v48 = vsel %vm7390_vm15, %v7316_v50, %v2532_v17  ;;  %vm7450_vm7 = vcmp.eq.f32.partialorder %v1217_v36, 8.507059e+37  ;;  %v2458_v17 = vpop.f32.mrf.mxu0 }
 0x4a9   : > { %v1903_v30 = vadd.f32 %v7330_v9, %v1902_v34  ;;  %v2541_v26 = vsel %vm7394_vm0, %v2540_v14, %v2536_v48  ;;  %v1231_v14 = vand.u32 2147483647, %v7340_v38  ;;  %vm1227_vm8 = vweird.f32 %v7340_v38 }
 0x4aa   : > { %v1212_v2 = vadd.f32 %v7333_v59, %v1211_v27  ;;  %v2099_v13 = vadd.f32 %v2083_v55, %v1392_v39  ;;  %v2726_v34 = vmul.f32 %v2541_v26, %v2458_v17  ;;  %v7469_v55 = vor.u32 1.1754944e-38, %v1233_v4 }
 0x4ab   : > { %v7350_v31 = vpop.xlane.xlu0 %2411  ;;  %1722 = vadd.xlane.f32.xlu2 %v9199_v15  ;;  %1726 = vadd.xlane.f32.xlu1 %v9200_v43  ;;  %v7380_v24 = vpop.eup %4539  ;;  %v1907_v18 = vsel %vm7435_vm4, %v7330_v9, %v1903_v30  ;;  %v3260_v9 = vand.u32 2147483648, %v7320_v35  ;;  %vm3254_vm11 = vweird.f32 %v7320_v35  ;;  %vm7501_vm13 = vcmp.eq.f32.partialorder %v1231_v14, 8.507059e+37 }
 0x4ac   : > { %v7386_v51 = vpop.eup %4541  ;;  %v1223_v15 = vmul.f32 %v7380_v24, %v7340_v38  ;;  %v7418_v52 = vpop.xlane.xlu1 %3054  ;;  %v1216_v39 = vsel %vm7446_vm6, %v7333_v59, %v1212_v2  ;;  %v7466_v10 = vadd.f32 %v2726_v34, %v2099_v13  ;;  %v3258_v59 = vand.u32 2147483647, %v7320_v35 }
 0x4ad   : > { %v3250_v50 = vmul.f32 %v7386_v51, %v7320_v35  ;;  %vm1228_vm10 = vweird.f32 %v7380_v24  ;;  %v3261_v17 = vor.u32 1.1754944e-38, %v3260_v9  ;;  %vm2561_vm14 = vweird.f32 %v7350_v31 }
 0x4ae   : > { %v7373_v61 = vpop.xlane.xlu2 %3050  ;;  %v1224_v57 = vsub.f32 1.0, %v1223_v15  ;;  %v1912_v15 = vsel %vm7439_vm5, %v1911_v37, %v1907_v18  ;;  %v2567_v37 = vand.u32 2147483648, %v7350_v31  ;;  %vm3255_vm0 = vweird.f32 %v7386_v51  ;;  %vm7533_vm4 = vmor %vm1227_vm8, %vm1228_vm10 }
 0x4af   : > { %4543 = vrcp.f32 %v7373_v61  ;;  %v3251_v27 = vsub.f32 1.0, %v3250_v50  ;;  %v3244_v50 = vand.u32 2147483647, %v7373_v61  ;;  %v2084_v45 = vmul.f32 %v1912_v15, %v6934_v28 }
 0x4b0   : > { %3076 = vadd.xlane.f32.xlu0 %v4534_v29  ;;  %4545 = vrcp.f32 %v7350_v31  ;;  %v1220_v29 = vor.u32 1.1754944e-38, %v1219_v60  ;;  %v1225_v36 = vmul.f32 %v7380_v24, %v1224_v57  ;;  %vm3240_vm15 = vweird.f32 %v7373_v61  ;;  %v2461_v35 = vpop.f32.mrf.mxu0 }
 0x4b1   : > { %v3252_v60 = vmul.f32 %v7386_v51, %v3251_v27  ;;  %vm7509_vm1 = vcmp.eq.f32.partialorder %v3258_v59, 8.507059e+37  ;;  %vm3245_vm3 = vcmp.eq.f32.partialorder %v3244_v50, 8.507059e+37  ;;  %v3272_v59 = vand.u32 2147483647, %v7418_v52 }
 0x4b2   : > { %v1226_v28 = vadd.f32 %v7380_v24, %v1225_v36  ;;  %v3274_v9 = vand.u32 2147483648, %v7418_v52 }
 0x4b3   : > { %1097 = vadd.xlane.f32.xlu2 %v9209_v33  ;;  %v7412_v43 = vpop.xlane.xlu0 %1706  ;;  %v3253_v14 = vadd.f32 %v7386_v51, %v3252_v60 }
 0x4b5   : > { %v7405_v54 = vpop.eup %4543 }
 0x4b6   : > { %v3236_v0 = vmul.f32 %v7405_v54, %v7373_v61  ;;  %v7422_v63 = vpop.xlane.xlu2 %2409  ;;  %v7429_v58 = vpop.eup %4545  ;;  %vm3241_vm12 = vweird.f32 %v7405_v54 }
 0x4b7   : > { %4547 = vrcp.f32 %v7422_v63  ;;  %v2557_v33 = vmul.f32 %v7429_v58, %v7350_v31  ;;  %v7491_v13 = vpop.xlane.xlu1 %2413  ;;  %vm3242_vm2 = vmor %vm3240_vm15, %vm3241_vm12  ;;  %vm2562_vm5 = vweird.f32 %v7429_v58 }
 0x4b8   : > { %v3237_v53 = vsub.f32 1.0, %v3236_v0  ;;  %4549 = vrcp.f32 %v7418_v52  ;;  %v3246_v0 = vand.u32 2147483648, %v7373_v61  ;;  %vm7587_vm10 = vmor %vm2561_vm14, %vm2562_vm5  ;;  %vm3268_vm14 = vweird.f32 %v7418_v52 }
 0x4b9   : > { %v2558_v8 = vsub.f32 1.0, %v2557_v33  ;;  %v2568_v33 = vor.u32 1.1754944e-38, %v2567_v37 }
 0x4ba   : > { %v3238_v16 = vmul.f32 %v7405_v54, %v3237_v53  ;;  %v2565_v53 = vand.u32 2147483647, %v7350_v31 }
 0x4bb   : > { %3074 = vadd.xlane.f32.xlu2 %v7288_v47  ;;  %v1221_v47 = vsel %vm7450_vm7, %v1220_v29, %v1216_v39  ;;  %v7493_v1 = vpop.xlane.xlu0 %1081  ;;  %v3247_v29 = vor.u32 1.1754944e-38, %v3246_v0  ;;  %vm7555_vm7 = vmor %vm3254_vm11, %vm3255_vm0  ;;  %vm2547_vm11 = vweird.f32 %v7422_v63 }
 0x4bc   : > { %v3239_v4 = vadd.f32 %v7405_v54, %v3238_v16  ;;  %v1393_v27 = vmul.f32 %v1221_v47, %v6930_v40  ;;  %v2559_v40 = vmul.f32 %v7429_v58, %v2558_v8  ;;  %vm7538_vm6 = vcmp.eq.f32.partialorder %v2565_v53, 8.507059e+37 }
 0x4bd   : > { %v7473_v48 = vpop.eup %4547  ;;  %v1230_v8 = vsel %vm7533_vm4, %v7380_v24, %v1226_v28  ;;  %v3257_v37 = vsel %vm7555_vm7, %v7386_v51, %v3253_v14  ;;  %vm1932_vm4 = vweird.f32 %v7412_v43  ;;  %vm2575_vm7 = vweird.f32 %v7491_v13 }
 0x4be   : > { %v2543_v30 = vmul.f32 %v7473_v48, %v7422_v63  ;;  %v7484_v2 = vpop.xlane.xlu2 %1704  ;;  %v7489_v26 = vpop.eup %4549  ;;  %v3243_v61 = vsel %vm3242_vm2, %v7405_v54, %v3239_v4  ;;  %v2560_v4 = vadd.f32 %v7429_v58, %v2559_v40  ;;  %vm2548_vm8 = vweird.f32 %v7473_v48 }
 0x4bf   : > { %4551 = vrcp.f32 %v7484_v2  ;;  %v3165_v44 = vpop.f32.mrf.mxu2  ;;  %v7516_v18 = vmul.f32 %v7489_v26, %v7418_v52  ;;  %v3248_v16 = vsel %vm3245_vm3, %v3247_v29, %v3243_v61  ;;  %v1924_v14 = vand.u32 2147483648, %v7484_v2 }
 0x4c0   : > { %v2544_v34 = vsub.f32 1.0, %v2543_v30  ;;  %4553 = vrcp.f32 %v7412_v43  ;;  %v3433_v15 = vmul.f32 %v3248_v16, %v3165_v44  ;;  %v7543_v30 = vadd.f32 %v2084_v45, %v1393_v27 }
 0x4c1   : > { %v3265_v50 = vsub.f32 1.0, %v7516_v18  ;;  %4555 = vrcp.f32 %v7491_v13  ;;  %v1936_v44 = vand.u32 2147483647, %v7412_v43  ;;  %v1938_v45 = vand.u32 2147483648, %v7412_v43  ;;  %v7578_v18 = vpop.xlane.xlu1 %1708 }
 0x4c2   : > { %v2545_v54 = vmul.f32 %v7473_v48, %v2544_v34  ;;  %v7564_v53 = vadd.f32 %v3433_v15, %v7466_v10  ;;  %v2551_v34 = vand.u32 2147483647, %v7422_v63  ;;  %v2553_v10 = vand.u32 2147483648, %v7422_v63 }
 0x4c3   : > { %2433 = vadd.xlane.f32.xlu2 %v7240_v25  ;;  %v7581_v29 = vpop.xlane.xlu0 %3058  ;;  %v3262_v47 = vsel %vm7509_vm1, %v3261_v17, %v3257_v37  ;;  %v2564_v31 = vsel %vm7587_vm10, %v7429_v58, %v2560_v4  ;;  %v1922_v15 = vand.u32 2147483647, %v7484_v2  ;;  %v7612_v57 = vor.u32 1.1754944e-38, %v1938_v45 }
 0x4c4   : > { %v2546_v28 = vadd.f32 %v7473_v48, %v2545_v54  ;;  %v9016_v51 = vmax.f32 %v7564_v53, 0.0  ;;  %v1235_v54 = vsel %vm7501_vm13, %v7469_v55, %v1230_v8  ;;  %vm7616_vm13 = vmor %vm2547_vm11, %vm2548_vm8  ;;  %vm2552_vm15 = vcmp.eq.f32.partialorder %v2551_v34, 8.507059e+37 }
 0x4c5   : > { %v7527_v36 = vpop.eup %4551  ;;  %vm1918_vm0 = vweird.f32 %v7484_v2  ;;  %v1394_v8 = vmul.f32 %v1235_v54, %v6936_v56  ;;  %v2569_v4 = vsel %vm7538_vm6, %v2568_v33, %v2564_v31  ;;  %v1925_v37 = vor.u32 1.1754944e-38, %v1924_v14 }
 0x4c6   : > { %v1914_v38 = vmul.f32 %v7527_v36, %v7484_v2  ;;  %v7549_v0 = vpop.xlane.xlu2 %1079  ;;  %v7573_v24 = vpop.eup %4553  ;;  %vm1919_vm12 = vweird.f32 %v7527_v36  ;;  %4139 = vmatmul.msk.f32.gmra.mxu3 %vm3491_vm9, %v9016_v51  ;;  %v2550_v60 = vsel %vm7616_vm13, %v7473_v48, %v2546_v28  ;;  %vm1923_vm2 = vcmp.eq.f32.partialorder %v1922_v15, 8.507059e+37 }
 0x4c7   : > { %4557 = vrcp.f32 %v7549_v0  ;;  %v3168_v16 = vpop.f32.mrf.mxu2  ;;  %v7608_v17 = vpop.eup %4555  ;;  %v1928_v55 = vmul.f32 %v7573_v24, %v7412_v43  ;;  %vm1920_vm1 = vmor %vm1918_vm0, %vm1919_vm12  ;;  %vm3269_vm3 = vweird.f32 %v7489_v26  ;;  %v2579_v54 = vand.u32 2147483647, %v7491_v13 }
 0x4c8   : > { %v1915_v27 = vsub.f32 1.0, %v1914_v38  ;;  %v2554_v38 = vor.u32 1.1754944e-38, %v2553_v10  ;;  %4559 = vrcp.f32 %v7493_v1  ;;  %v2571_v2 = vmul.f32 %v7608_v17, %v7491_v13  ;;  %v2464_v28 = vpop.f32.mrf.mxu0  ;;  %vm3270_vm5 = vmor %vm3268_vm14, %vm3269_vm3 }
 0x4c9   : > { %v1929_v25 = vsub.f32 1.0, %v1928_v55  ;;  %v2728_v14 = vmul.f32 %v2569_v4, %v2464_v28  ;;  %v3434_v31 = vmul.f32 %v3262_v47, %v3168_v16  ;;  %v7648_v15 = vpop.xlane.xlu1 %1083  ;;  %v3275_v16 = vor.u32 1.1754944e-38, %v3274_v9 }
 0x4ca   : > { %v1916_v61 = vmul.f32 %v7527_v36, %v1915_v27  ;;  %v2555_v48 = vsel %vm2552_vm15, %v2554_v38, %v2550_v60  ;;  %v2581_v38 = vand.u32 2147483648, %v7491_v13  ;;  %vm7667_vm6 = vcmp.eq.f32.partialorder %v1936_v44, 8.507059e+37 }
 0x4cb   : > { %v2727_v33 = vmul.f32 %v2555_v48, %v2461_v35  ;;  %v2572_v35 = vsub.f32 1.0, %v2571_v2  ;;  %v7650_v55 = vpop.xlane.xlu0 %2417  ;;  %vm3273_vm8 = vcmp.eq.f32.partialorder %v3272_v59, 8.507059e+37  ;;  %v1261_v9 = vand.u32 2147483648, %v7493_v1 }
 0x4cc   : > { %v1917_v58 = vadd.f32 %v7527_v36, %v1916_v61  ;;  %v3266_v61 = vmul.f32 %v7489_v26, %v3265_v50  ;;  %vm1933_vm10 = vweird.f32 %v7573_v24  ;;  %v1259_v59 = vand.u32 2147483647, %v7493_v1 }
 0x4cd   : > { %v7621_v39 = vpop.eup %4557  ;;  %v2573_v48 = vmul.f32 %v7608_v17, %v2572_v35  ;;  %vm7696_vm11 = vcmp.eq.f32.partialorder %v2579_v54, 8.507059e+37  ;;  %vm2576_vm14 = vweird.f32 %v7608_v17  ;;  %vm7714_vm13 = vmor %vm1932_vm4, %vm1933_vm10  ;;  %vm1241_vm15 = vweird.f32 %v7549_v0 }
 0x4ce   : > { %v1237_v45 = vmul.f32 %v7621_v39, %v7549_v0  ;;  %v7635_v34 = vpop.xlane.xlu2 %3056  ;;  %v1921_v56 = vsel %vm1920_vm1, %v7527_v36, %v1917_v58  ;;  %v2743_v36 = vadd.f32 %v2727_v33, %v7543_v30  ;;  %v3267_v50 = vadd.f32 %v7489_v26, %v3266_v61  ;;  %v7653_v63 = vpop.eup %4559 }
 0x4cf   : > { %4561 = vrcp.f32 %v7635_v34  ;;  %v1926_v27 = vsel %vm1923_vm2, %v1925_v37, %v1921_v56  ;;  %v1930_v58 = vmul.f32 %v7573_v24, %v1929_v25  ;;  %v3171_v30 = vpop.f32.mrf.mxu2  ;;  %v1247_v25 = vand.u32 2147483648, %v7549_v0  ;;  %vm7743_vm2 = vmor %vm2575_vm7, %vm2576_vm14 }
 0x4d0   : > { %v1238_v10 = vsub.f32 1.0, %v1237_v45  ;;  %v2085_v40 = vmul.f32 %v1926_v27, %v6940_v23  ;;  %4563 = vrcp.f32 %v7578_v18  ;;  %v7657_v60 = vadd.f32 %v3434_v31, %v2743_v36 }
 0x4d1   : > { %v3271_v37 = vsel %vm3270_vm5, %v7489_v26, %v3267_v50  ;;  %4565 = vrcp.f32 %v7650_v55  ;;  %v1931_v52 = vadd.f32 %v7573_v24, %v1930_v58  ;;  %vm1242_vm12 = vweird.f32 %v7621_v39 }
 0x4d2   : > { %v2101_v23 = vadd.f32 %v2085_v40, %v1394_v8  ;;  %v1239_v8 = vmul.f32 %v7621_v39, %v1238_v10  ;;  %v9017_v2 = vmax.f32 %v7657_v60, 0.0  ;;  %v3276_v44 = vsel %vm3273_vm8, %v3275_v16, %v3271_v37  ;;  %vm1243_vm0 = vmor %vm1241_vm15, %vm1242_vm12 }
 0x4d3   : > { %4567 = vrcp.f32 %v7648_v15  ;;  %v3435_v26 = vmul.f32 %v3276_v44, %v3171_v30  ;;  %v1245_v40 = vand.u32 2147483647, %v7549_v0  ;;  %v7707_v36 = vor.u32 1.1754944e-38, %v1261_v9  ;;  %v7732_v0 = vpop.xlane.xlu1 %3060 }
 0x4d4   : > { %v2744_v4 = vadd.f32 %v2728_v14, %v2101_v23  ;;  %4140 = vmatmul.msk.f32.gmra.mxu3 %vm3491_vm9, %v9017_v2  ;;  %v1240_v10 = vadd.f32 %v7621_v39, %v1239_v8  ;;  %v1251_v14 = vmul.f32 %v7653_v63, %v7493_v1  ;;  %v2582_v31 = vor.u32 1.1754944e-38, %v2581_v38  ;;  %v9341_v2 = vld [vmem:[#allocation59_spill] sm:$0xff] }
 0x4d5   : > { %v7676_v45 = vpop.eup %4561  ;;  %v2574_v35 = vadd.f32 %v7608_v17, %v2573_v48  ;;  %v1950_v38 = vand.u32 2147483647, %v7578_v18  ;;  %v1248_v43 = vor.u32 1.1754944e-38, %v1247_v25  ;;  %vm1246_vm1 = vcmp.eq.f32.partialorder %v1245_v40, 8.507059e+37 }
 0x4d6   : > { %v3278_v56 = vmul.f32 %v7676_v45, %v7635_v34  ;;  %v7692_v33 = vpop.xlane.xlu2 %2415  ;;  %v7694_v27 = vpop.eup %4563  ;;  %v7703_v61 = vadd.f32 %v3435_v26, %v2744_v4  ;;  %v1244_v8 = vsel %vm1243_vm0, %v7621_v39, %v1240_v10  ;;  %v1935_v4 = vsel %vm7714_vm13, %v7573_v24, %v1931_v52 }
 0x4d7   : > { %4569 = vrcp.f32 %v7692_v33  ;;  %v7721_v50 = vpop.eup %4565  ;;  %v1942_v58 = vmul.f32 %v7694_v27, %v7578_v18  ;;  %v1252_v37 = vsub.f32 1.0, %v1251_v14  ;;  %v1952_v9 = vand.u32 2147483648, %v7578_v18 }
 0x4d8   : > { %v3279_v23 = vsub.f32 1.0, %v3278_v56  ;;  %v9018_v30 = vmax.f32 %v7703_v61, 0.0  ;;  %4571 = vrcp.f32 %v7581_v29  ;;  %v1249_v48 = vsel %vm1246_vm1, %v1248_v43, %v1244_v8 }
 0x4d9   : > { %v7729_v16 = vpop.eup %4567  ;;  %v1940_v39 = vsel %vm7667_vm6, %v7612_v57, %v1935_v4  ;;  %v2578_v24 = vsel %vm7743_vm2, %v7608_v17, %v2574_v35  ;;  %v2599_v56 = vmul.f32 %v7721_v50, %v7650_v55  ;;  %v1395_v26 = vmul.f32 %v1249_v48, %v6942_v19  ;;  %v2467_v4 = vpop.f32.mrf.mxu0 }
 0x4da   : > { %v3280_v13 = vmul.f32 %v7676_v45, %v3279_v23  ;;  %v1943_v52 = vsub.f32 1.0, %v1942_v58  ;;  %v1265_v25 = vmul.f32 %v7729_v16, %v7648_v15  ;;  %4573 = vrcp.f32 %v7732_v0 }
 0x4db   : > { %v2086_v47 = vmul.f32 %v1940_v39, %v6946_v6  ;;  %vm3282_vm3 = vweird.f32 %v7635_v34  ;;  %vm3283_vm4 = vweird.f32 %v7676_v45  ;;  %v3286_v19 = vand.u32 2147483647, %v7635_v34  ;;  %v7773_v6 = vpop.xlane.xlu0 %1712  ;;  %v7818_v14 = vpop.xlane.xlu1 %2419 }
 0x4dc   : > { %4141 = vmatmul.msk.f32.gmra.mxu3 %vm3491_vm9, %v9018_v30  ;;  %v3281_v57 = vadd.f32 %v7676_v45, %v3280_v13  ;;  %vm1256_vm5 = vweird.f32 %v7653_v63  ;;  %v2583_v10 = vsel %vm7696_vm11, %v2582_v31, %v2578_v24  ;;  %vm7777_vm6 = vmor %vm3282_vm3, %vm3283_vm4  ;;  %v3288_v54 = vand.u32 2147483648, %v7635_v34 }
 0x4dd   : > { %v7764_v17 = vpop.eup %4569  ;;  %v1253_v23 = vmul.f32 %v7653_v63, %v1252_v37  ;;  %vm1255_vm7 = vweird.f32 %v7493_v1  ;;  %v2600_v58 = vsub.f32 1.0, %v2599_v56  ;;  %v2102_v28 = vadd.f32 %v2086_v47, %v1395_v26  ;;  %v3174_v26 = vpop.f32.mrf.mxu2 }
 0x4de   : > { %v2585_v40 = vmul.f32 %v7764_v17, %v7692_v33  ;;  %v7782_v35 = vpop.eup %4571  ;;  %v3285_v31 = vsel %vm7777_vm6, %v7676_v45, %v3281_v57  ;;  %v1944_v43 = vmul.f32 %v7694_v27, %v1943_v52  ;;  %vm1946_vm8 = vweird.f32 %v7578_v18  ;;  %v7810_v52 = vpop.xlane.xlu2 %1710  ;;  %vm7842_vm0 = vmor %vm1255_vm7, %vm1256_vm5 }
 0x4df   : > { %v7791_v8 = vor.u32 1.1754944e-38, %v1952_v9  ;;  %v1266_v34 = vsub.f32 1.0, %v1265_v25  ;;  %v3289_v44 = vor.u32 1.1754944e-38, %v3288_v54  ;;  %v2729_v48 = vmul.f32 %v2583_v10, %v2467_v4 }
 0x4e0   : > { %4575 = vrcp.f32 %v7773_v6  ;;  %v2586_v37 = vsub.f32 1.0, %v2585_v40  ;;  %vm3287_vm10 = vcmp.eq.f32.partialorder %v3286_v19, 8.507059e+37  ;;  %v7794_v39 = vpop.eup %4573  ;;  %vm7798_vm11 = vcmp.eq.f32.partialorder %v1259_v59, 8.507059e+37 }
 0x4e1   : > { %vm1947_vm12 = vweird.f32 %v7694_v27  ;;  %vm7803_vm14 = vcmp.eq.f32.partialorder %v1950_v38, 8.507059e+37  ;;  %v3292_v24 = vmul.f32 %v7782_v35, %v7581_v29  ;;  %v1275_v56 = vand.u32 2147483648, %v7648_v15  ;;  %v2470_v18 = vpop.f32.mrf.mxu0 }
 0x4e2   : > { %v3290_v13 = vsel %vm3287_vm10, %v3289_v44, %v3285_v31  ;;  %v1254_v59 = vadd.f32 %v7653_v63, %v1253_v23  ;;  %v2601_v25 = vmul.f32 %v7721_v50, %v2600_v58  ;;  %v2745_v47 = vadd.f32 %v2729_v48, %v2102_v28  ;;  %vm7861_vm2 = vmor %vm1946_vm8, %vm1947_vm12 }
 0x4e3   : > { %v3436_v57 = vmul.f32 %v3290_v13, %v3174_v26  ;;  %v1945_v38 = vadd.f32 %v7694_v27, %v1944_v43  ;;  %v1267_v19 = vmul.f32 %v7729_v16, %v1266_v34  ;;  %v1273_v10 = vand.u32 2147483647, %v7648_v15  ;;  %v7855_v13 = vpop.xlane.xlu0 %1087 }
 0x4e4   : > { %v2607_v40 = vand.u32 2147483647, %v7650_v55  ;;  %v2609_v54 = vand.u32 2147483648, %v7650_v55  ;;  %v2587_v31 = vmul.f32 %v7764_v17, %v2586_v37  ;;  %4577 = vrcp.f32 %v7810_v52 }
 0x4e5   : > { %v7822_v4 = vadd.f32 %v3436_v57, %v2745_v47  ;;  %v3293_v23 = vsub.f32 1.0, %v3292_v24  ;;  %v7825_v58 = vor.u32 1.1754944e-38, %v1275_v56  ;;  %v7829_v28 = vmul.f32 %v7794_v39, %v7732_v0 }
 0x4e6   : > { %vm2603_vm13 = vweird.f32 %v7650_v55  ;;  %v7832_v43 = vpop.eup %4575  ;;  %v2602_v34 = vadd.f32 %v7721_v50, %v2601_v25  ;;  %vm2604_vm15 = vweird.f32 %v7721_v50  ;;  %4579 = vrcp.f32 %v7818_v14 }
 0x4e7   : > { %v9019_v44 = vmax.f32 %v7822_v4, 0.0  ;;  %v7847_v37 = vadd.f32 %v7729_v16, %v1267_v19  ;;  %vm7849_vm1 = vcmp.eq.f32.partialorder %v2607_v40, 8.507059e+37  ;;  %v2593_v56 = vand.u32 2147483647, %v7692_v33  ;;  %vm7879_vm5 = vmor %vm2603_vm13, %vm2604_vm15 }
 0x4e8   : > { %v2595_v26 = vand.u32 2147483648, %v7692_v33  ;;  %vm1270_vm3 = vweird.f32 %v7729_v16  ;;  %v2610_v25 = vor.u32 1.1754944e-38, %v2609_v54  ;;  %v2588_v47 = vadd.f32 %v7764_v17, %v2587_v31 }
 0x4e9   : > { %vm2590_vm4 = vweird.f32 %v7764_v17  ;;  %v1258_v57 = vsel %vm7842_vm0, %v7653_v63, %v1254_v59  ;;  %4142 = vmatmul.msk.f32.gmra.mxu3 %vm3491_vm9, %v9019_v44  ;;  %v3307_v19 = vsub.f32 1.0, %v7829_v28  ;;  %v1970_v54 = vmul.f32 %v7832_v43, %v7773_v6 }
 0x4ea   : > { %v1978_v63 = vand.u32 2147483647, %v7773_v6  ;;  %v1949_v59 = vsel %vm7861_vm2, %v7694_v27, %v1945_v38  ;;  %v7889_v31 = vpop.eup %4577  ;;  %vm1269_vm6 = vweird.f32 %v7648_v15  ;;  %v2606_v55 = vsel %vm7879_vm5, %v7721_v50, %v2602_v34 }
 0x4eb   : > { %vm2589_vm7 = vweird.f32 %v7692_v33  ;;  %v1263_v48 = vsel %vm7798_vm11, %v7707_v36, %v1258_v57  ;;  %v1954_v41 = vsel %vm7803_vm14, %v7791_v8, %v1949_v59  ;;  %v1980_v27 = vand.u32 2147483648, %v7773_v6  ;;  %v7925_v57 = vpop.xlane.xlu1 %1714  ;;  %v7939_v59 = vpop.xlane.xlu2 %1085 }
 0x4ec   : > { %vm7905_vm8 = vmor %vm2589_vm7, %vm2590_vm4  ;;  %vm2594_vm10 = vcmp.eq.f32.partialorder %v2593_v56, 8.507059e+37  ;;  %v2596_v50 = vor.u32 1.1754944e-38, %v2595_v26  ;;  %v1956_v33 = vmul.f32 %v7889_v31, %v7810_v52  ;;  %v7911_v34 = vpop.eup %4579  ;;  %v2087_v36 = vmul.f32 %v1954_v41, %v6954_v42  ;;  %v9258_v42 = vld [vmem:[#allocation37_spill] sm:$0xff] }
 0x4ed   : > { %v2592_v8 = vsel %vm7905_vm8, %v7764_v17, %v2588_v47  ;;  %v3294_v45 = vmul.f32 %v7782_v35, %v3293_v23  ;;  %vm3297_vm11 = vweird.f32 %v7782_v35  ;;  %vm7919_vm12 = vcmp.eq.f32.partialorder %v1273_v10, 8.507059e+37 }
 0x4ee   : > { %v2611_v56 = vsel %vm7849_vm1, %v2610_v25, %v2606_v55  ;;  %v1971_v26 = vsub.f32 1.0, %v1970_v54  ;;  %v1957_v1 = vsub.f32 1.0, %v1956_v33  ;;  %v1396_v41 = vmul.f32 %v1263_v48, %v9258_v42  ;;  %vm7958_vm1 = vmor %vm1269_vm6, %vm1270_vm3 }
 0x4ef   : > { %v2597_v40 = vsel %vm2594_vm10, %v2596_v50, %v2592_v8  ;;  %v3295_v17 = vadd.f32 %v7782_v35, %v3294_v45  ;;  %vm3296_vm14 = vweird.f32 %v7581_v29  ;;  %v3300_v23 = vand.u32 2147483647, %v7581_v29 }
 0x4f0   : > { %v2613_v10 = vmul.f32 %v7911_v34, %v7818_v14  ;;  %v1958_v47 = vmul.f32 %v7889_v31, %v1957_v1  ;;  %v2730_v24 = vmul.f32 %v2597_v40, %v2470_v18  ;;  %vm7934_vm13 = vmor %vm3296_vm14, %vm3297_vm11  ;;  %v3302_v54 = vand.u32 2147483648, %v7581_v29  ;;  %v3177_v18 = vpop.f32.mrf.mxu2  ;;  %v7949_v29 = vpop.xlane.xlu0 %3064 }
 0x4f1   : > { %v1964_v55 = vand.u32 2147483647, %v7810_v52  ;;  %v1966_v48 = vand.u32 2147483648, %v7810_v52  ;;  %v2103_v38 = vadd.f32 %v2087_v36, %v1396_v41  ;;  %v3299_v50 = vsel %vm7934_vm13, %v7782_v35, %v3295_v17  ;;  %v2473_v36 = vpop.f32.mrf.mxu0 }
 0x4f2   : > { %v1959_v33 = vadd.f32 %v7889_v31, %v1958_v47  ;;  %vm1961_vm15 = vweird.f32 %v7889_v31  ;;  %4581 = vrcp.f32 %v7925_v57  ;;  %v3303_v8 = vor.u32 1.1754944e-38, %v3302_v54 }
 0x4f3   : > { %v7951_v45 = vor.u32 1.1754944e-38, %v1980_v27  ;;  %v2746_v1 = vadd.f32 %v2730_v24, %v2103_v38  ;;  %vm3301_vm0 = vcmp.eq.f32.partialorder %v3300_v23, 8.507059e+37  ;;  %4583 = vrcp.f32 %v7939_v59 }
 0x4f4   : > { %v2614_v42 = vsub.f32 1.0, %v2613_v10  ;;  %4585 = vrcp.f32 %v7855_v13  ;;  %vm1960_vm2 = vweird.f32 %v7810_v52  ;;  %v3304_v27 = vsel %vm3301_vm0, %v3303_v8, %v3299_v50  ;;  %v8005_v50 = vpop.xlane.xlu2 %3062 }
 0x4f5   : > { %v2731_v41 = vmul.f32 %v2611_v56, %v2473_v36  ;;  %v1972_v40 = vmul.f32 %v7832_v43, %v1971_v26  ;;  %vm1962_vm4 = vmor %vm1960_vm2, %vm1961_vm15  ;;  %v1967_v17 = vor.u32 1.1754944e-38, %v1966_v48  ;;  %v3437_v23 = vmul.f32 %v3304_v27, %v3177_v18 }
 0x4f6   : > { %vm1974_vm3 = vweird.f32 %v7773_v6  ;;  %vm1965_vm5 = vcmp.eq.f32.partialorder %v1964_v55, 8.507059e+37  ;;  %v1272_v15 = vsel %vm7958_vm1, %v7729_v16, %v7847_v37  ;;  %v1963_v10 = vsel %vm1962_vm4, %v7889_v31, %v1959_v33  ;;  %v7987_v16 = vpop.xlane.xlu1 %1089  ;;  %v9263_v31 = vld [vmem:[#allocation35_spill] sm:$0xff] }
 0x4f7   : > { %v3308_v52 = vmul.f32 %v7794_v39, %v3307_v19  ;;  %vm1975_vm6 = vweird.f32 %v7832_v43  ;;  %v7977_v56 = vadd.f32 %v3437_v23, %v2746_v1  ;;  %v1277_v26 = vsel %vm7919_vm12, %v7825_v58, %v1272_v15 }
 0x4f8   : > { %v1968_v47 = vsel %vm1965_vm5, %v1967_v17, %v1963_v10  ;;  %v7982_v24 = vpop.eup %4581  ;;  %v2615_v25 = vmul.f32 %v7911_v34, %v2614_v42  ;;  %vm2617_vm7 = vweird.f32 %v7818_v14  ;;  %vm2618_vm8 = vweird.f32 %v7911_v34  ;;  %v8029_v17 = vpop.xlane.xlu0 %2423  ;;  %vm8045_vm15 = vmor %vm1974_vm3, %vm1975_vm6 }
 0x4f9   : > { %v2088_v28 = vmul.f32 %v1968_v47, %v6963_v49  ;;  %v7990_v37 = vpop.eup %4583  ;;  %v9020_v19 = vmax.f32 %v7977_v56, 0.0  ;;  %v1397_v9 = vmul.f32 %v1277_v26, %v9263_v31  ;;  %v3309_v58 = vadd.f32 %v7794_v39, %v3308_v52  ;;  %v3180_v52 = vpop.f32.mrf.mxu2  ;;  %vm8055_vm1 = vmor %vm2617_vm7, %vm2618_vm8 }
 0x4fa   : > { %vm3311_vm10 = vweird.f32 %v7794_v39  ;;  %v7996_v54 = vpop.eup %4585  ;;  %v7999_v55 = vadd.f32 %v7832_v43, %v1972_v40  ;;  %v2621_v48 = vand.u32 2147483647, %v7818_v14  ;;  %v2623_v38 = vand.u32 2147483648, %v7818_v14 }
 0x4fb   : > { %v1279_v49 = vmul.f32 %v7990_v37, %v7939_v59  ;;  %v1303_v33 = vand.u32 2147483648, %v7855_v13  ;;  %v2104_v18 = vadd.f32 %v2088_v28, %v1397_v9  ;;  %vm3310_vm11 = vweird.f32 %v7732_v0  ;;  %4143 = vmatmul.msk.f32.gmra.mxu3 %vm3491_vm9, %v9020_v19 }
 0x4fc   : > { %v3314_v8 = vand.u32 2147483647, %v7732_v0  ;;  %vm8015_vm12 = vcmp.eq.f32.partialorder %v1978_v63, 8.507059e+37  ;;  %v2616_v35 = vadd.f32 %v7911_v34, %v2615_v25  ;;  %v1984_v36 = vmul.f32 %v7982_v24, %v7925_v57  ;;  %vm8024_vm14 = vmor %vm3310_vm11, %vm3311_vm10 }
 0x4fd   : > { %v1280_v42 = vsub.f32 1.0, %v1279_v49  ;;  %v3316_v40 = vand.u32 2147483648, %v7732_v0  ;;  %v1293_v63 = vmul.f32 %v7996_v54, %v7855_v13  ;;  %4587 = vrcp.f32 %v7949_v29 }
 0x4fe   : > { %v1289_v23 = vand.u32 2147483648, %v7939_v59  ;;  %v3313_v15 = vsel %vm8024_vm14, %v7794_v39, %v3309_v58  ;;  %vm1284_vm13 = vweird.f32 %v7990_v37  ;;  %4589 = vrcp.f32 %v8005_v50 }
 0x4ff   : > { %v1281_v10 = vmul.f32 %v7990_v37, %v1280_v42  ;;  %v3317_v26 = vor.u32 1.1754944e-38, %v3316_v40  ;;  %v1287_v47 = vand.u32 2147483647, %v7939_v59  ;;  %4591 = vrcp.f32 %v7987_v16 }
 0x500   : > { %v2747_v39 = vadd.f32 %v2731_v41, %v2104_v18  ;;  %vm3315_vm0 = vcmp.eq.f32.partialorder %v3314_v8, 8.507059e+37  ;;  %v1985_v28 = vsub.f32 1.0, %v1984_v36  ;;  %vm1283_vm2 = vweird.f32 %v7939_v59  ;;  %v8070_v8 = vpop.xlane.xlu1 %3066  ;;  %v8104_v0 = vpop.xlane.xlu0 %1718 }
 0x501   : > { %v1282_v6 = vadd.f32 %v7990_v37, %v1281_v10  ;;  %v3318_v31 = vsel %vm3315_vm0, %v3317_v26, %v3313_v15  ;;  %v2620_v9 = vsel %vm8055_vm1, %v7911_v34, %v2616_v35  ;;  %vm2622_vm4 = vcmp.eq.f32.partialorder %v2621_v48, 8.507059e+37  ;;  %vm8066_vm3 = vmor %vm1283_vm2, %vm1284_vm13 }
 0x502   : > { %v2624_v41 = vor.u32 1.1754944e-38, %v2623_v38  ;;  %v3438_v58 = vmul.f32 %v3318_v31, %v3180_v52  ;;  %v1294_v49 = vsub.f32 1.0, %v1293_v63  ;;  %v1290_v18 = vor.u32 1.1754944e-38, %v1289_v23  ;;  %v8088_v63 = vpop.xlane.xlu2 %2421 }
 0x503   : > { %v1286_v59 = vsel %vm8066_vm3, %v7990_v37, %v1282_v6  ;;  %v1977_v34 = vsel %vm8045_vm15, %v7832_v43, %v7999_v55  ;;  %v8079_v48 = vpop.eup %4587  ;;  %v1301_v38 = vand.u32 2147483647, %v7855_v13  ;;  %v8082_v35 = vor.u32 1.1754944e-38, %v1303_v33 }
 0x504   : > { %vm1288_vm5 = vcmp.eq.f32.partialorder %v1287_v47, 8.507059e+37  ;;  %v8084_v36 = vadd.f32 %v3438_v58, %v2747_v39  ;;  %v4590_v42 = vpop.eup %4589  ;;  %v2625_v27 = vsel %vm2622_vm4, %v2624_v41, %v2620_v9  ;;  %v1986_v40 = vmul.f32 %v7982_v24, %v1985_v28  ;;  %v9274_v39 = vld [vmem:[#allocation46_spill] sm:$0xff]  ;;  %v9275_v28 = vld [vmem:[#allocation52_spill] sm:$0xff]  ;;  %v2476_v9 = vpop.f32.mrf.mxu0 }
 0x505   : > { %vm1988_vm6 = vweird.f32 %v7925_v57  ;;  %v1291_v37 = vsel %vm1288_vm5, %v1290_v18, %v1286_v59  ;;  %v8090_v23 = vpop.eup %4591  ;;  %v1992_v43 = vand.u32 2147483647, %v7925_v57  ;;  %v3320_v33 = vmul.f32 %v4590_v42, %v8005_v50 }
 0x506   : > { %v3470_v55 = vmax.f32 %v8084_v36, 0.0  ;;  %v1982_v15 = vsel %vm8015_vm12, %v7951_v45, %v1977_v34  ;;  %v1295_v10 = vmul.f32 %v7996_v54, %v1294_v49  ;;  %vm1297_vm7 = vweird.f32 %v7855_v13 }
 0x507   : > { %v1994_v52 = vand.u32 2147483648, %v7925_v57  ;;  %v3334_v26 = vmul.f32 %v8079_v48, %v7949_v29  ;;  %4593 = vrcp.f32 %v8029_v17  ;;  %vm1989_vm8 = vweird.f32 %v7982_v24 }
 0x508   : > { %v3321_v47 = vsub.f32 1.0, %v3320_v33  ;;  %v1398_v25 = vmul.f32 %v1291_v37, %v9274_v39  ;;  %4595 = vrcp.f32 %v8088_v63  ;;  %4144 = vmatmul.msk.f32.gmra.mxu3 %vm3491_vm9, %v3470_v55  ;;  %v1987_v45 = vadd.f32 %v7982_v24, %v1986_v40  ;;  %vm8134_vm13 = vmor %vm1988_vm6, %vm1989_vm8  ;;  %v3183_v39 = vpop.f32.mrf.mxu2 }
 0x509   : > { %v8115_v1 = vmul.f32 %v8090_v23, %v7987_v16  ;;  %v2089_v6 = vmul.f32 %v1982_v15, %v9275_v28  ;;  %v3330_v31 = vand.u32 2147483648, %v8005_v50  ;;  %vm3325_vm10 = vweird.f32 %v4590_v42 }
 0x50a   : > { %v3322_v41 = vmul.f32 %v4590_v42, %v3321_v47  ;;  %v3328_v14 = vand.u32 2147483647, %v8005_v50  ;;  %4597 = vrcp.f32 %v8104_v0  ;;  %v2732_v58 = vmul.f32 %v2625_v27, %v2476_v9 }
 0x50b   : > { %vm1298_vm11 = vweird.f32 %v7996_v54  ;;  %vm8122_vm12 = vcmp.eq.f32.partialorder %v1301_v38, 8.507059e+37  ;;  %vm8126_vm14 = vcmp.eq.f32.partialorder %v1992_v43, 8.507059e+37  ;;  %v3335_v59 = vsub.f32 1.0, %v3334_v26  ;;  %v8145_v26 = vpop.xlane.xlu1 %2425 }
 0x50c   : > { %v1995_v27 = vor.u32 1.1754944e-38, %v1994_v52  ;;  %v2105_v40 = vadd.f32 %v2089_v6, %v1398_v25  ;;  %v3323_v37 = vadd.f32 %v4590_v42, %v3322_v41  ;;  %vm3324_vm15 = vweird.f32 %v8005_v50  ;;  %vm8160_vm2 = vmor %vm1297_vm7, %vm1298_vm11 }
 0x50d   : > { %v8139_v38 = vpop.eup %4593  ;;  %v1296_v43 = vadd.f32 %v7996_v54, %v1295_v10  ;;  %v1315_v33 = vand.u32 2147483647, %v7987_v16  ;;  %v1317_v15 = vand.u32 2147483648, %v7987_v16  ;;  %vm3326_vm0 = vmor %vm3324_vm15, %vm3325_vm10  ;;  %v3331_v57 = vor.u32 1.1754944e-38, %v3330_v31 }
 0x50e   : > { %v4596_v47 = vpop.eup %4595  ;;  %v1308_v52 = vsub.f32 1.0, %v8115_v1  ;;  %v3327_v25 = vsel %vm3326_vm0, %v4590_v42, %v3323_v37  ;;  %vm3329_vm1 = vcmp.eq.f32.partialorder %v3328_v14, 8.507059e+37  ;;  %v1991_v50 = vsel %vm8134_vm13, %v7982_v24, %v1987_v45 }
 0x50f   : > { %v2651_v10 = vand.u32 2147483648, %v8029_v17  ;;  %v3332_v28 = vsel %vm3329_vm1, %v3331_v57, %v3327_v25  ;;  %v2627_v6 = vmul.f32 %v4596_v47, %v8088_v63  ;;  %v3336_v9 = vmul.f32 %v8079_v48, %v3335_v59 }
 0x510   : > { %v8154_v31 = vpop.eup %4597  ;;  %v2641_v24 = vmul.f32 %v8139_v38, %v8029_v17  ;;  %4599 = vrcp.f32 %v8070_v8  ;;  %v2748_v45 = vadd.f32 %v2732_v58, %v2105_v40  ;;  %v3439_v1 = vmul.f32 %v3332_v28, %v3183_v39  ;;  %v8181_v39 = vpop.xlane.xlu0 %1093 }
 0x511   : > { %v2628_v41 = vsub.f32 1.0, %v2627_v6  ;;  %vm2631_vm4 = vweird.f32 %v8088_v63  ;;  %v1300_v14 = vsel %vm8160_vm2, %v7996_v54, %v1296_v43  ;;  %v1996_v13 = vsel %vm8126_vm14, %v1995_v27, %v1991_v50  ;;  %v8183_v54 = vpop.xlane.xlu2 %1716 }
 0x512   : > { %v8173_v59 = vadd.f32 %v3439_v1, %v2748_v45  ;;  %vm2632_vm3 = vweird.f32 %v4596_v47  ;;  %v2635_v34 = vand.u32 2147483647, %v8088_v63  ;;  %v2637_v37 = vand.u32 2147483648, %v8088_v63  ;;  %v2479_v45 = vpop.f32.mrf.mxu0 }
 0x513   : > { %v2012_v58 = vmul.f32 %v8154_v31, %v8104_v0  ;;  %v2629_v40 = vmul.f32 %v4596_v47, %v2628_v41  ;;  %v3337_v57 = vadd.f32 %v8079_v48, %v3336_v9  ;;  %vm3339_vm5 = vweird.f32 %v8079_v48  ;;  %vm8193_vm6 = vmor %vm2631_vm4, %vm2632_vm3 }
 0x514   : > { %v3471_v18 = vmax.f32 %v8173_v59, 0.0  ;;  %4601 = vrcp.f32 %v8145_v26  ;;  %v1305_v27 = vsel %vm8122_vm12, %v8082_v35, %v1300_v14  ;;  %v2090_v43 = vmul.f32 %v1996_v13, %v6982_v12  ;;  %v3186_v13 = vpop.f32.mrf.mxu2 }
 0x515   : > { %v2630_v25 = vadd.f32 %v4596_v47, %v2629_v40  ;;  %vm3338_vm7 = vweird.f32 %v7949_v29  ;;  %v3342_v28 = vand.u32 2147483647, %v7949_v29  ;;  %v3344_v6 = vand.u32 2147483648, %v7949_v29 }
 0x516   : > { %v8200_v9 = vpop.eup %4599  ;;  %v2642_v42 = vsub.f32 1.0, %v2641_v24  ;;  %vm2636_vm8 = vcmp.eq.f32.partialorder %v2635_v34, 8.507059e+37  ;;  %v2638_v35 = vor.u32 1.1754944e-38, %v2637_v37  ;;  %vm8204_vm10 = vmor %vm3338_vm7, %vm3339_vm5  ;;  %4603 = vrcp.f32 %v8181_v39  ;;  %4145 = vmatmul.msk.f32.gmra.mxu3 %vm3491_vm9, %v3471_v18  ;;  %v8219_v24 = vpop.xlane.xlu1 %1720 }
 0x517   : > { %v1399_v63 = vmul.f32 %v1305_v27, %v6975_v46  ;;  %v2634_v29 = vsel %vm8193_vm6, %v4596_v47, %v2630_v25  ;;  %v3341_v49 = vsel %vm8204_vm10, %v8079_v48, %v3337_v57  ;;  %4605 = vrcp.f32 %v8183_v54 }
 0x518   : > { %v1309_v1 = vmul.f32 %v8090_v23, %v1308_v52  ;;  %v2013_v41 = vsub.f32 1.0, %v2012_v58  ;;  %v2639_v14 = vsel %vm2636_vm8, %v2638_v35, %v2634_v29  ;;  %v3345_v34 = vor.u32 1.1754944e-38, %v3344_v6 }
 0x519   : > { %v3348_v46 = vmul.f32 %v8200_v9, %v8070_v8  ;;  %v2106_v37 = vadd.f32 %v2090_v43, %v1399_v63  ;;  %v2733_v47 = vmul.f32 %v2639_v14, %v2479_v45  ;;  %vm3343_vm11 = vcmp.eq.f32.partialorder %v3342_v28, 8.507059e+37  ;;  %v8263_v14 = vpop.xlane.xlu0 %3070 }
 0x51a   : > { %v8224_v40 = vpop.eup %4601  ;;  %v2649_v48 = vand.u32 2147483647, %v8029_v17  ;;  %v3346_v57 = vsel %vm3343_vm11, %v3345_v34, %v3341_v49  ;;  %4607 = vrcp.f32 %v8219_v24  ;;  %vm1311_vm12 = vweird.f32 %v7987_v16  ;;  %v2482_v16 = vpop.f32.mrf.mxu0 }
 0x51b   : > { %v2643_v52 = vmul.f32 %v8139_v38, %v2642_v42  ;;  %v2749_v58 = vadd.f32 %v2733_v47, %v2106_v37  ;;  %v3440_v27 = vmul.f32 %v3346_v57, %v3186_v13  ;;  %vm1312_vm14 = vweird.f32 %v8090_v23 }
 0x51c   : > { %v8230_v25 = vpop.eup %4603  ;;  %vm8235_vm13 = vcmp.eq.f32.partialorder %v1315_v33, 8.507059e+37  ;;  %v1318_v50 = vor.u32 1.1754944e-38, %v1317_v15  ;;  %vm2645_vm15 = vweird.f32 %v8029_v17  ;;  %v2014_v28 = vmul.f32 %v8154_v31, %v2013_v41  ;;  %v8248_v33 = vpop.xlane.xlu2 %1091  ;;  %vm8277_vm3 = vmor %vm1311_vm12, %vm1312_vm14 }
 0x51d   : > { %v4606_v6 = vpop.eup %4605  ;;  %v1310_v42 = vadd.f32 %v8090_v23, %v1309_v1  ;;  %v2652_v35 = vor.u32 1.1754944e-38, %v2651_v10  ;;  %v3349_v12 = vsub.f32 1.0, %v3348_v46  ;;  %v8246_v63 = vadd.f32 %v3440_v27, %v2749_v58 }
 0x51e   : > { %vm2646_vm0 = vweird.f32 %v8139_v38  ;;  %vm8251_vm1 = vcmp.eq.f32.partialorder %v2649_v48, 8.507059e+37  ;;  %v2020_v15 = vand.u32 2147483647, %v8104_v0  ;;  %v2022_v49 = vand.u32 2147483648, %v8104_v0 }
 0x51f   : > { %v1998_v45 = vmul.f32 %v4606_v6, %v8183_v54  ;;  %v2644_v1 = vadd.f32 %v8139_v38, %v2643_v52  ;;  %vm2017_vm2 = vweird.f32 %v8154_v31  ;;  %v3472_v10 = vmax.f32 %v8246_v63, 0.0  ;;  %vm8292_vm7 = vmor %vm2645_vm15, %vm2646_vm0 }
 0x520   : > { %v1335_v41 = vmul.f32 %v8230_v25, %v8181_v39  ;;  %v8265_v13 = vpop.eup %4607  ;;  %v8268_v34 = vadd.f32 %v8154_v31, %v2014_v28  ;;  %v2655_v46 = vmul.f32 %v8224_v40, %v8145_v26  ;;  %vm2002_vm4 = vweird.f32 %v8183_v54 }
 0x521   : > { %v1999_v37 = vsub.f32 1.0, %v1998_v45  ;;  %vm2016_vm5 = vweird.f32 %v8104_v0  ;;  %vm2003_vm6 = vweird.f32 %v4606_v6  ;;  %v2006_v48 = vand.u32 2147483647, %v8183_v54  ;;  %4146 = vmatmul.msk.f32.gmra.mxu3 %vm3491_vm9, %v3472_v10 }
 0x522   : > { %v2008_v57 = vand.u32 2147483648, %v8183_v54  ;;  %v3350_v52 = vmul.f32 %v8200_v9, %v3349_v12  ;;  %v2026_v27 = vmul.f32 %v8265_v13, %v8219_v24  ;;  %v1314_v28 = vsel %vm8277_vm3, %v8090_v23, %v1310_v42  ;;  %vm8310_vm10 = vmor %vm2002_vm4, %vm2003_vm6  ;;  %v8317_v42 = vpop.xlane.xlu1 %1095 }
 0x523   : > { %v2000_v58 = vmul.f32 %v4606_v6, %v1999_v37  ;;  %vm3353_vm8 = vweird.f32 %v8200_v9  ;;  %v1336_v12 = vsub.f32 1.0, %v1335_v41  ;;  %v2648_v45 = vsel %vm8292_vm7, %v8139_v38, %v2644_v1 }
 0x524   : > { %v3351_v17 = vadd.f32 %v8200_v9, %v3350_v52  ;;  %v3358_v21 = vand.u32 2147483648, %v8070_v8  ;;  %vm3352_vm11 = vweird.f32 %v8070_v8  ;;  %v3356_v23 = vand.u32 2147483647, %v8070_v8 }
 0x525   : > { %v2001_v51 = vadd.f32 %v4606_v6, %v2000_v58  ;;  %4609 = vrcp.f32 %v8248_v33  ;;  %v2656_v38 = vsub.f32 1.0, %v2655_v46  ;;  %vm2007_vm12 = vcmp.eq.f32.partialorder %v2006_v48, 8.507059e+37  ;;  %vm8323_vm14 = vmor %vm3352_vm11, %vm3353_vm8 }
 0x526   : > { %v2009_v1 = vor.u32 1.1754944e-38, %v2008_v57  ;;  %v1319_v41 = vsel %vm8235_vm13, %v1318_v50, %v1314_v28  ;;  %v2027_v47 = vsub.f32 1.0, %v2026_v27  ;;  %v3355_v52 = vsel %vm8323_vm14, %v8200_v9, %v3351_v17  ;;  %v8336_v57 = vpop.xlane.xlu2 %3068  ;;  %v8347_v27 = vpop.xlane.xlu0 %2429 }
 0x527   : > { %v2005_v8 = vsel %vm8310_vm10, %v4606_v6, %v2001_v51  ;;  %4611 = vrcp.f32 %v8263_v14  ;;  %v1337_v46 = vmul.f32 %v8230_v25, %v1336_v12  ;;  %v2653_v50 = vsel %vm8251_vm1, %v2652_v35, %v2648_v45  ;;  %vm8355_vm1 = vmor %vm2016_vm5, %vm2017_vm2 }
 0x528   : > { %v2010_v43 = vsel %vm2007_vm12, %v2009_v1, %v2005_v8  ;;  %v3359_v48 = vor.u32 1.1754944e-38, %v3358_v21  ;;  %v1400_v58 = vmul.f32 %v1319_v41, %v6988_v20  ;;  %vm3357_vm13 = vcmp.eq.f32.partialorder %v3356_v23, 8.507059e+37  ;;  %v3189_v21 = vpop.f32.mrf.mxu2 }
 0x529   : > { %v2091_v51 = vmul.f32 %v2010_v43, %v6996_v3  ;;  %4613 = vrcp.f32 %v8317_v42  ;;  %vm8341_vm15 = vcmp.eq.f32.partialorder %v2020_v15, 8.507059e+37  ;;  %v2023_v6 = vor.u32 1.1754944e-38, %v2022_v49 }
 0x52a   : > { %vm2659_vm0 = vweird.f32 %v8145_v26  ;;  %v2663_v35 = vand.u32 2147483647, %v8145_v26  ;;  %v3360_v29 = vsel %vm3357_vm13, %v3359_v48, %v3355_v52  ;;  %v2657_v3 = vmul.f32 %v8224_v40, %v2656_v38  ;;  %v8384_v52 = vpop.xlane.xlu1 %3072 }
 0x52b   : > { %v8349_v28 = vpop.eup %4609  ;;  %v2028_v15 = vmul.f32 %v8265_v13, %v2027_v47  ;;  %v2107_v49 = vadd.f32 %v2091_v51, %v1400_v58  ;;  %v2734_v12 = vmul.f32 %v2653_v50, %v2482_v16  ;;  %v2019_v45 = vsel %vm8355_vm1, %v8154_v31, %v8268_v34 }
 0x52c   : > { %vm2660_vm4 = vweird.f32 %v8224_v40  ;;  %v2665_v17 = vand.u32 2147483648, %v8145_v26  ;;  %vm1340_vm2 = vweird.f32 %v8230_v25  ;;  %v1338_v37 = vadd.f32 %v8230_v25, %v1337_v46 }
 0x52d   : > { %v8368_v0 = vpop.eup %4611  ;;  %v2750_v23 = vadd.f32 %v2734_v12, %v2107_v49  ;;  %v3441_v38 = vmul.f32 %v3360_v29, %v3189_v21  ;;  %4615 = vrcp.f32 %v8347_v27  ;;  %vm1339_vm3 = vweird.f32 %v8181_v39  ;;  %vm8423_vm11 = vmor %vm2659_vm0, %vm2660_vm4 }
 0x52e   : > { %v1343_v1 = vand.u32 2147483647, %v8181_v39  ;;  %v1345_v31 = vand.u32 2147483648, %v8181_v39  ;;  %v1321_v34 = vmul.f32 %v8349_v28, %v8248_v33  ;;  %v2658_v54 = vadd.f32 %v8224_v40, %v2657_v3  ;;  %vm8388_vm6 = vmor %vm1339_vm3, %vm1340_vm2  ;;  %v8413_v3 = vpop.xlane.xlu2 %2427 }
 0x52f   : > { %v8377_v41 = vpop.eup %4613  ;;  %v2029_v47 = vadd.f32 %v8265_v13, %v2028_v15  ;;  %vm2031_vm5 = vweird.f32 %v8265_v13  ;;  %v8382_v8 = vadd.f32 %v3441_v38, %v2750_v23  ;;  %vm2030_vm7 = vweird.f32 %v8219_v24 }
 0x530   : > { %v2036_v39 = vand.u32 2147483648, %v8219_v24  ;;  %v3376_v43 = vmul.f32 %v8368_v0, %v8263_v14  ;;  %v1349_v50 = vmul.f32 %v8377_v41, %v8317_v42  ;;  %v1342_v48 = vsel %vm8388_vm6, %v8230_v25, %v1338_v37  ;;  %vm8408_vm10 = vmor %vm2030_vm7, %vm2031_vm5  ;;  %v8475_v29 = vpop.f32.mrf.mxu2 }
 0x531   : > { %v2034_v16 = vand.u32 2147483647, %v8219_v24  ;;  %v3473_v58 = vmax.f32 %v8382_v8, 0.0  ;;  %4617 = vrcp.f32 %v8336_v57  ;;  %vm8404_vm8 = vcmp.eq.f32.partialorder %v2663_v35, 8.507059e+37 }
 0x532   : > { %v1346_v21 = vor.u32 1.1754944e-38, %v1345_v31  ;;  %v1322_v20 = vsub.f32 1.0, %v1321_v34  ;;  %4619 = vrcp.f32 %v8384_v52  ;;  %v2024_v24 = vsel %vm8341_vm15, %v2023_v6, %v2019_v45  ;;  %v8436_v45 = vpop.xlane.xlu0 %1724 }
 0x533   : > { %v8415_v25 = vpop.eup %4615  ;;  %vm1344_vm12 = vcmp.eq.f32.partialorder %v1343_v1, 8.507059e+37  ;;  %v2033_v15 = vsel %vm8408_vm10, %v8265_v13, %v2029_v47  ;;  %v1350_v49 = vsub.f32 1.0, %v1349_v50  ;;  %4147 = vmatmul.msk.f32.gmra.mxu3 %vm3491_vm9, %v3473_v58  ;;  %v2662_v9 = vsel %vm8423_vm11, %v8224_v40, %v2658_v54 }
 0x534   : > { %v1347_v6 = vsel %vm1344_vm12, %v1346_v21, %v1342_v48  ;;  %v2037_v26 = vor.u32 1.1754944e-38, %v2036_v39  ;;  %v3377_v12 = vsub.f32 1.0, %v3376_v43  ;;  %v2666_v37 = vor.u32 1.1754944e-38, %v2665_v17 }
 0x535   : > { %vm2035_vm14 = vcmp.eq.f32.partialorder %v2034_v16, 8.507059e+37  ;;  %v1329_v23 = vand.u32 2147483647, %v8248_v33  ;;  %v1331_v13 = vand.u32 2147483648, %v8248_v33  ;;  %v8441_v38 = vmul.f32 %v2024_v24, %v7008_v7 }
 0x536   : > { %v2038_v1 = vsel %vm2035_vm14, %v2037_v26, %v2033_v15  ;;  %v1323_v31 = vmul.f32 %v8349_v28, %v1322_v20  ;;  %v2683_v40 = vmul.f32 %v8415_v25, %v8347_v27  ;;  %v8450_v54 = vsel %vm8404_vm8, %v2666_v37, %v2662_v9  ;;  %v8490_v9 = vpop.xlane.xlu2 %1722 }
 0x537   : > { %v8446_v34 = vpop.eup %4617  ;;  %v8453_v17 = vmul.f32 %v1347_v6, %v7013_v5  ;;  %v1351_v47 = vmul.f32 %v8377_v41, %v1350_v49  ;;  %4621 = vrcp.f32 %v8436_v45  ;;  %vm1325_vm13 = vweird.f32 %v8248_v33  ;;  %v8488_v49 = vpop.xlane.xlu1 %2431 }
 0x538   : > { %v8457_v7 = vpop.eup %4619  ;;  %v1357_v46 = vand.u32 2147483647, %v8317_v42  ;;  %v1359_v39 = vand.u32 2147483648, %v8317_v42  ;;  %v3378_v43 = vmul.f32 %v8368_v0, %v3377_v12  ;;  %v8464_v50 = vmul.f32 %v2038_v1, %v7025_v32 }
 0x539   : > { %vm8466_vm15 = vcmp.eq.f32.partialorder %v1329_v23, 8.507059e+37  ;;  %v1332_v48 = vor.u32 1.1754944e-38, %v1331_v13  ;;  %vm1353_vm0 = vweird.f32 %v8317_v42  ;;  %v1324_v16 = vadd.f32 %v8349_v28, %v1323_v31 }
 0x53a   : > { %vm1326_vm1 = vweird.f32 %v8349_v28  ;;  %vm1354_vm4 = vweird.f32 %v8377_v41  ;;  %v2684_v51 = vsub.f32 1.0, %v2683_v40  ;;  %v1352_v21 = vadd.f32 %v8377_v41, %v1351_v47 }
 0x53b   : > { %v3362_v32 = vmul.f32 %v8446_v34, %v8336_v57  ;;  %v3390_v20 = vmul.f32 %v8457_v7, %v8384_v52  ;;  %4623 = vrcp.f32 %v8413_v3  ;;  %vm8482_vm2 = vcmp.eq.f32.partialorder %v1357_v46, 8.507059e+37  ;;  %vm8498_vm5 = vmor %vm1325_vm13, %vm1326_vm1 }
 0x53c   : > { %v1360_v35 = vor.u32 1.1754944e-38, %v1359_v39  ;;  %v3379_v15 = vadd.f32 %v8368_v0, %v3378_v43  ;;  %vm3381_vm3 = vweird.f32 %v8368_v0  ;;  %vm2687_vm6 = vweird.f32 %v8347_v27  ;;  %vm8513_vm8 = vmor %vm1353_vm0, %vm1354_vm4 }
 0x53d   : > { %v8492_v6 = vpop.eup %4621  ;;  %v2691_v12 = vand.u32 2147483647, %v8347_v27  ;;  %vm3380_vm7 = vweird.f32 %v8263_v14  ;;  %v3386_v37 = vand.u32 2147483648, %v8263_v14  ;;  %v1328_v23 = vsel %vm8498_vm5, %v8349_v28, %v1324_v16 }
 0x53e   : > { %v2685_v13 = vmul.f32 %v8415_v25, %v2684_v51  ;;  %v3384_v1 = vand.u32 2147483647, %v8263_v14  ;;  %v2054_v31 = vmul.f32 %v8492_v6, %v8436_v45  ;;  %v1356_v40 = vsel %vm8513_vm8, %v8377_v41, %v1352_v21  ;;  %vm8526_vm10 = vmor %vm3380_vm7, %vm3381_vm3 }
 0x53f   : > { %v3363_v28 = vsub.f32 1.0, %v3362_v32  ;;  %v3391_v47 = vsub.f32 1.0, %v3390_v20  ;;  %4625 = vrcp.f32 %v8488_v49  ;;  %v2693_v46 = vand.u32 2147483648, %v8347_v27 }
 0x540   : > { %v3370_v14 = vand.u32 2147483647, %v8336_v57  ;;  %v3372_v39 = vand.u32 2147483648, %v8336_v57  ;;  %v3383_v41 = vsel %vm8526_vm10, %v8368_v0, %v3379_v15  ;;  %v1333_v16 = vsel %vm8466_vm15, %v1332_v48, %v1328_v23  ;;  %v8548_v15 = vpop.xlane.xlu0 %1099 }
 0x541   : > { %v8537_v43 = vpop.eup %4623  ;;  %vm2688_vm11 = vweird.f32 %v8415_v25  ;;  %v3387_v51 = vor.u32 1.1754944e-38, %v3386_v37  ;;  %v2055_v21 = vsub.f32 1.0, %v2054_v31  ;;  %v1361_v32 = vsel %vm8482_vm2, %v1360_v35, %v1356_v40 }
 0x542   : > { %v2686_v20 = vadd.f32 %v8415_v25, %v2685_v13  ;;  %vm3366_vm12 = vweird.f32 %v8336_v57  ;;  %vm3385_vm14 = vcmp.eq.f32.partialorder %v3384_v1, 8.507059e+37  ;;  %v2669_v0 = vmul.f32 %v8537_v43, %v8413_v3  ;;  %v8564_v13 = vpop.f32.mrf.mxu0  ;;  %vm8573_vm0 = vmor %vm2687_vm6, %vm2688_vm11 }
 0x543   : > { %vm8550_vm13 = vcmp.eq.f32.partialorder %v2691_v12, 8.507059e+37  ;;  %v3364_v48 = vmul.f32 %v8446_v34, %v3363_v28  ;;  %v3388_v26 = vsel %vm3385_vm14, %v3387_v51, %v3383_v41  ;;  %v3392_v24 = vmul.f32 %v8457_v7, %v3391_v47  ;;  %v9324_v12 = vld [vmem:[#allocation50_spill] sm:$0xff] }
 0x544   : > { %v8557_v35 = vmul.f32 %v1333_v16, %v7001_v22  ;;  %v2694_v37 = vor.u32 1.1754944e-38, %v2693_v46  ;;  %vm3367_vm15 = vweird.f32 %v8446_v34  ;;  %v8560_v23 = vor.u32 1.1754944e-38, %v3372_v39  ;;  %v3195_v22 = vpop.f32.mrf.mxu2  ;;  %v8586_v39 = vpop.xlane.xlu2 %1097 }
 0x545   : > { %v8562_v33 = vpop.eup %4625  ;;  %v8567_v1 = vmul.f32 %v1361_v32, %v9324_v12  ;;  %v2056_v40 = vmul.f32 %v8492_v6, %v2055_v21  ;;  %vm2058_vm1 = vweird.f32 %v8436_v45  ;;  %v2062_v28 = vand.u32 2147483647, %v8436_v45  ;;  %vm8624_vm8 = vmor %vm3366_vm12, %vm3367_vm15 }
 0x546   : > { %v2690_v47 = vsel %vm8573_vm0, %v8415_v25, %v2686_v20  ;;  %v8583_v42 = vmul.f32 %v3388_v26, %v3195_v22  ;;  %v2064_v46 = vand.u32 2147483648, %v8436_v45  ;;  %v2670_v27 = vsub.f32 1.0, %v2669_v0  ;;  %v8599_v20 = vpop.xlane.xlu1 %1726 }
 0x547   : > { %v8589_v41 = vadd.f32 %v8446_v34, %v3364_v48  ;;  %v2677_v16 = vand.u32 2147483647, %v8413_v3  ;;  %v3393_v51 = vadd.f32 %v8457_v7, %v3392_v24  ;;  %vm3395_vm4 = vweird.f32 %v8457_v7 }
 0x548   : > { %v2679_v21 = vand.u32 2147483648, %v8413_v3  ;;  %v2697_v25 = vmul.f32 %v8562_v33, %v8488_v49  ;;  %v3400_v32 = vand.u32 2147483648, %v8384_v52  ;;  %4627 = vrcp.f32 %v8490_v9 }
 0x549   : > { %v2057_v0 = vadd.f32 %v8492_v6, %v2056_v40  ;;  %vm2059_vm2 = vweird.f32 %v8492_v6  ;;  %vm3394_vm3 = vweird.f32 %v8384_v52  ;;  %v3398_v48 = vand.u32 2147483647, %v8384_v52 }
 0x54a   : > { %vm8605_vm5 = vcmp.eq.f32.partialorder %v2062_v28, 8.507059e+37  ;;  %v2671_v24 = vmul.f32 %v8537_v43, %v2670_v27  ;;  %vm2673_vm6 = vweird.f32 %v8413_v3  ;;  %vm8611_vm7 = vmor %vm3394_vm3, %vm3395_vm4  ;;  %4629 = vrcp.f32 %v8548_v15  ;;  %v8643_v27 = vpop.xlane.xlu0 %3076 }
 0x54b   : > { %v8618_v31 = vsel %vm8550_vm13, %v2694_v37, %v2690_v47  ;;  %v2065_v22 = vor.u32 1.1754944e-38, %v2064_v46  ;;  %v3397_v40 = vsel %vm8611_vm7, %v8457_v7, %v3393_v51  ;;  %4631 = vrcp.f32 %v8599_v20  ;;  %vm8638_vm10 = vmor %vm2058_vm1, %vm2059_vm2 }
 0x54c   : > { %v3369_v5 = vsel %vm8624_vm8, %v8446_v34, %v8589_v41  ;;  %v2698_v28 = vsub.f32 1.0, %v2697_v25  ;;  %v2707_v47 = vand.u32 2147483648, %v8488_v49  ;;  %v3401_v46 = vor.u32 1.1754944e-38, %v3400_v32  ;;  %v3198_v12 = vpop.f32.mrf.mxu2  ;;  %v8673_v52 = vpop.xlane.xlu2 %3074 }
 0x54d   : > { %vm8647_vm11 = vcmp.eq.f32.partialorder %v3370_v14, 8.507059e+37  ;;  %v2061_v45 = vsel %vm8638_vm10, %v8492_v6, %v2057_v0  ;;  %vm8654_vm12 = vcmp.eq.f32.partialorder %v2677_v16, 8.507059e+37  ;;  %v2680_v41 = vor.u32 1.1754944e-38, %v2679_v21  ;;  %v8661_v14 = vpop.f32.mrf.mxu0 }
 0x54e   : > { %vm3399_vm14 = vcmp.eq.f32.partialorder %v3398_v48, 8.507059e+37  ;;  %v4628_v51 = vpop.eup %4627  ;;  %v2672_v25 = vadd.f32 %v8537_v43, %v2671_v24  ;;  %vm2674_vm13 = vweird.f32 %v8537_v43  ;;  %4633 = vrcp.f32 %v8586_v39 }
 0x54f   : > { %v3402_v57 = vsel %vm3399_vm14, %v3401_v46, %v3397_v40  ;;  %v2705_v32 = vand.u32 2147483647, %v8488_v49  ;;  %v1387_v6 = vand.u32 2147483648, %v8548_v15  ;;  %v2040_v16 = vmul.f32 %v4628_v51, %v8490_v9  ;;  %vm8681_vm0 = vmor %vm2673_vm6, %vm2674_vm13 }
 0x550   : > { %4635 = vrcp.f32 %v8643_v27  ;;  %v8667_v21 = vpop.eup %4629  ;;  %v2066_v0 = vsel %vm8605_vm5, %v2065_v22, %v2061_v45  ;;  %v2699_v48 = vmul.f32 %v8562_v33, %v2698_v28  ;;  %vm2701_vm15 = vweird.f32 %v8488_v49 }
 0x551   : > { %v2708_v24 = vor.u32 1.1754944e-38, %v2707_v47  ;;  %v8675_v40 = vpop.eup %4631  ;;  %vm2702_vm1 = vweird.f32 %v8562_v33  ;;  %v8686_v26 = vmul.f32 %v3402_v57, %v3198_v12  ;;  %v1385_v22 = vand.u32 2147483647, %v8548_v15 }
 0x552   : > { %v2041_v28 = vsub.f32 1.0, %v2040_v16  ;;  %v2676_v47 = vsel %vm8681_vm0, %v8537_v43, %v2672_v25  ;;  %v2050_v46 = vand.u32 2147483648, %v8490_v9  ;;  %v2068_v3 = vmul.f32 %v8675_v40, %v8599_v20  ;;  %vm8732_vm6 = vmor %vm2701_vm15, %vm2702_vm1 }
 0x553   : > { %v2108_v45 = vadd.f32 %v8441_v38, %v8557_v35  ;;  %v8698_v30 = vmul.f32 %v2066_v0, %v9341_v2  ;;  %vm8700_vm4 = vcmp.eq.f32.partialorder %v2705_v32, 8.507059e+37  ;;  %v8704_v16 = vor.u32 1.1754944e-38, %v1387_v6 }
 0x554   : > { %v2042_v12 = vmul.f32 %v4628_v51, %v2041_v28  ;;  %vm2045_vm2 = vweird.f32 %v4628_v51  ;;  %v8706_v43 = vpop.eup %4633  ;;  %v2700_v25 = vadd.f32 %v8562_v33, %v2699_v48  ;;  %v1377_v37 = vmul.f32 %v8667_v21, %v8548_v15 }
 0x555   : > { %v2048_v38 = vand.u32 2147483647, %v8490_v9  ;;  %v2735_v2 = vmul.f32 %v8450_v54, %v8564_v13  ;;  %v2681_v32 = vsel %vm8654_vm12, %v2680_v41, %v2676_v47  ;;  %vm2044_vm3 = vweird.f32 %v8490_v9  ;;  %v2491_v7 = vpop.f32.mrf.mxu0 }
 0x556   : > { %v8714_v35 = vpop.eup %4635  ;;  %v2043_v6 = vadd.f32 %v4628_v51, %v2042_v12  ;;  %v1363_v0 = vmul.f32 %v8706_v43, %v8586_v39  ;;  %vm8721_vm5 = vmor %vm2044_vm3, %vm2045_vm2  ;;  %v2051_v28 = vor.u32 1.1754944e-38, %v2050_v46  ;;  %v2069_v44 = vsub.f32 1.0, %v2068_v3 }
 0x557   : > { %v2751_v19 = vadd.f32 %v2735_v2, %v2108_v45  ;;  %v3374_v54 = vsel %vm8647_vm11, %v8560_v23, %v3369_v5  ;;  %4637 = vrcp.f32 %v8673_v52  ;;  %v2704_v23 = vsel %vm8732_vm6, %v8562_v33, %v2700_v25  ;;  %v8755_v45 = vpop.xlane.xlu2 %2433 }
 0x558   : > { %v2047_v13 = vsel %vm8721_vm5, %v4628_v51, %v2043_v6  ;;  %v1364_v34 = vsub.f32 1.0, %v1363_v0  ;;  %v3442_v41 = vmul.f32 %v3374_v54, %v8475_v29  ;;  %v1378_v5 = vsub.f32 1.0, %v1377_v37  ;;  %v9348_v6 = vld [vmem:[#allocation56_spill] sm:$0xff] }
 0x559   : > { %vm2049_vm7 = vcmp.eq.f32.partialorder %v2048_v38, 8.507059e+37  ;;  %v3418_v49 = vmul.f32 %v8714_v35, %v8643_v27  ;;  %vm1382_vm8 = vweird.f32 %v8667_v21  ;;  %vm1368_vm10 = vweird.f32 %v8706_v43 }
 0x55a   : > { %v2052_v47 = vsel %vm2049_vm7, %v2051_v28, %v2047_v13  ;;  %v1365_v51 = vmul.f32 %v8706_v43, %v1364_v34  ;;  %v8748_v29 = vadd.f32 %v3442_v41, %v2751_v19  ;;  %vm2072_vm11 = vweird.f32 %v8599_v20 }
 0x55b   : > { %v2076_v46 = vand.u32 2147483647, %v8599_v20  ;;  %v2078_v33 = vand.u32 2147483648, %v8599_v20  ;;  %vm1367_vm12 = vweird.f32 %v8586_v39  ;;  %v1373_v3 = vand.u32 2147483648, %v8586_v39 }
 0x55c   : > { %vm1381_vm14 = vweird.f32 %v8548_v15  ;;  %v2070_v12 = vmul.f32 %v8675_v40, %v2069_v44  ;;  %v1366_v25 = vadd.f32 %v8706_v43, %v1365_v51  ;;  %v1371_v19 = vand.u32 2147483647, %v8586_v39  ;;  %vm8770_vm13 = vmor %vm1367_vm12, %vm1368_vm10 }
 0x55d   : > { %v3474_v37 = vmax.f32 %v8748_v29, 0.0  ;;  %v8764_v38 = vsel %vm8700_vm4, %v2708_v24, %v2704_v23  ;;  %v1379_v2 = vmul.f32 %v8667_v21, %v1378_v5  ;;  %v2094_v0 = vmul.f32 %v2052_v47, %v9348_v6  ;;  %v4638_v44 = vpop.eup %4637  ;;  %vm8822_vm6 = vmor %vm1381_vm14, %vm1382_vm8 }
 0x55e   : > { %v3419_v48 = vsub.f32 1.0, %v3418_v49  ;;  %v1370_v39 = vsel %vm8770_vm13, %v8706_v43, %v1366_v25  ;;  %v2109_v24 = vadd.f32 %v8464_v50, %v8453_v17  ;;  %v2736_v57 = vmul.f32 %v2681_v32, %v8661_v14 }
 0x55f   : > { %4148 = vmatmul.msk.f32.gmra.mxu3 %vm3491_vm9, %v3474_v37  ;;  %4639 = vrcp.f32 %v8755_v45  ;;  %vm8784_vm15 = vcmp.eq.f32.partialorder %v2076_v46, 8.507059e+37  ;;  %v2079_v9 = vor.u32 1.1754944e-38, %v2078_v33  ;;  %v1374_v13 = vor.u32 1.1754944e-38, %v1373_v3 }
 0x560   : > { %v3404_v34 = vmul.f32 %v4638_v44, %v8673_v52  ;;  %v2071_v43 = vadd.f32 %v8675_v40, %v2070_v12  ;;  %vm2073_vm0 = vweird.f32 %v8675_v40  ;;  %vm1372_vm1 = vcmp.eq.f32.partialorder %v1371_v19, 8.507059e+37  ;;  %v2494_v12 = vpop.f32.mrf.mxu0 }
 0x561   : > { %v2752_v41 = vadd.f32 %v2736_v57, %v2109_v24  ;;  %vm8793_vm4 = vcmp.eq.f32.partialorder %v1385_v22, 8.507059e+37  ;;  %v1375_v50 = vsel %vm1372_vm1, %v1374_v13, %v1370_v39  ;;  %v2110_v32 = vadd.f32 %v2094_v0, %v8567_v1  ;;  %vm8810_vm3 = vmor %vm2072_vm11, %vm2073_vm0 }
 0x562   : > { %v3405_v14 = vsub.f32 1.0, %v3404_v34  ;;  %v2737_v23 = vmul.f32 %v8618_v31, %v2491_v7  ;;  %v1380_v5 = vadd.f32 %v8667_v21, %v1379_v2  ;;  %v3420_v49 = vmul.f32 %v8714_v35, %v3419_v48  ;;  %v9357_v31 = vld [vmem:[#allocation58_spill] sm:$0xff]  ;;  %v3201_v48 = vpop.f32.mrf.mxu2 }
 0x563   : > { %v3414_v47 = vand.u32 2147483648, %v8673_v52  ;;  %v8803_v51 = vadd.f32 %v8583_v42, %v2752_v41  ;;  %vm3409_vm2 = vweird.f32 %v4638_v44  ;;  %v3412_v22 = vand.u32 2147483647, %v8673_v52 }
 0x564   : > { %v3406_v46 = vmul.f32 %v4638_v44, %v3405_v14  ;;  %v2753_v33 = vadd.f32 %v2737_v23, %v2110_v32  ;;  %v1404_v7 = vmul.f32 %v1375_v50, %v9357_v31  ;;  %vm3422_vm5 = vweird.f32 %v8643_v27  ;;  %v9362_v50 = vld [vmem:[#allocation44_spill] sm:$0xff] }
 0x565   : > { %v4640_v3 = vpop.eup %4639  ;;  %v3428_v42 = vand.u32 2147483648, %v8643_v27  ;;  %v3475_v25 = vmax.f32 %v8803_v51, 0.0  ;;  %v2075_v20 = vsel %vm8810_vm3, %v8675_v40, %v2071_v43  ;;  %vm3408_vm7 = vweird.f32 %v8673_v52 }
 0x566   : > { %v3407_v2 = vadd.f32 %v4638_v44, %v3406_v46  ;;  %v2711_v6 = vmul.f32 %v4640_v3, %v8755_v45  ;;  %v1384_v0 = vsel %vm8822_vm6, %v8667_v21, %v1380_v5  ;;  %vm3423_vm10 = vweird.f32 %v8714_v35  ;;  %vm3410_vm8 = vmor %vm3408_vm7, %vm3409_vm2  ;;  %v9363_v5 = vld [vmem:[#allocation60_spill] sm:$0xff] }
 0x567   : > { %v3415_v15 = vor.u32 1.1754944e-38, %v3414_v47  ;;  %4149 = vmatmul.msk.f32.gmra.mxu3 %vm3491_vm9, %v3475_v25  ;;  %v3460_v28 = vadd.f32 %v8686_v26, %v2753_v33  ;;  %v3421_v40 = vadd.f32 %v8714_v35, %v3420_v49  ;;  %vm3413_vm11 = vcmp.eq.f32.partialorder %v3412_v22, 8.507059e+37  ;;  %vm8852_vm14 = vmor %vm3422_vm5, %vm3423_vm10 }
 0x568   : > { %v3411_v39 = vsel %vm3410_vm8, %v4638_v44, %v3407_v2  ;;  %v2712_v52 = vsub.f32 1.0, %v2711_v6  ;;  %v2080_v24 = vsel %vm8784_vm15, %v2079_v9, %v2075_v20  ;;  %v2721_v21 = vand.u32 2147483648, %v8755_v45 }
 0x569   : > { %v2111_v57 = vadd.f32 %v8698_v30, %v1404_v7  ;;  %v3416_v13 = vsel %vm3413_vm11, %v3415_v15, %v3411_v39  ;;  %v3426_v34 = vand.u32 2147483647, %v8643_v27  ;;  %vm2716_vm12 = vweird.f32 %v4640_v3 }
 0x56a   : > { %v2713_v43 = vmul.f32 %v4640_v3, %v2712_v52  ;;  %v2719_v41 = vand.u32 2147483647, %v8755_v45  ;;  %v1389_v26 = vsel %vm8793_vm4, %v8704_v16, %v1384_v0  ;;  %v3476_v30 = vmax.f32 %v3460_v28, 0.0 }
 0x56b   : > { %v2738_v54 = vmul.f32 %v8764_v38, %v2494_v12  ;;  %v3445_v9 = vmul.f32 %v3416_v13, %v3201_v48  ;;  %v2096_v14 = vmul.f32 %v2080_v24, %v9362_v50  ;;  %v3425_v32 = vsel %vm8852_vm14, %v8714_v35, %v3421_v40  ;;  %v2497_v38 = vpop.f32.mrf.mxu0  ;;  %v3204_v12 = vpop.f32.mrf.mxu2 }
 0x56c   : > { %v2714_v17 = vadd.f32 %v4640_v3, %v2713_v43  ;;  %vm2715_vm13 = vweird.f32 %v8755_v45  ;;  %v3429_v16 = vor.u32 1.1754944e-38, %v3428_v42  ;;  %v2722_v27 = vor.u32 1.1754944e-38, %v2721_v21 }
 0x56d   : > { %vm2717_vm15 = vmor %vm2715_vm13, %vm2716_vm12  ;;  %v2754_v23 = vadd.f32 %v2738_v54, %v2111_v57  ;;  %v1405_v49 = vmul.f32 %v1389_v26, %v9363_v5  ;;  %vm3427_vm0 = vcmp.eq.f32.partialorder %v3426_v34, 8.507059e+37  ;;  %vm2720_vm1 = vcmp.eq.f32.partialorder %v2719_v41, 8.507059e+37 }
 0x56e   : > { %v2718_v47 = vsel %vm2717_vm15, %v4640_v3, %v2714_v17  ;;  %v3430_v51 = vsel %vm3427_vm0, %v3429_v16, %v3425_v32  ;;  %v8876_v3 = vpop.f32.mrf.mxu3  ;;  %v9365_v29 = vmax.f32 %v7822_v4, 0.0  ;;  %v9366_v8 = vmax.f32 %v7703_v61, 0.0 }
 0x56f   : > { %v2723_v46 = vsel %vm2720_vm1, %v2722_v27, %v2718_v47  ;;  %4150 = vmatmul.msk.f32.gmra.mxu3 %vm3491_vm9, %v3476_v30  ;;  %v3461_v22 = vadd.f32 %v3445_v9, %v2754_v23  ;;  %v2112_v33 = vadd.f32 %v2096_v14, %v1405_v49  ;;  %v3446_v1 = vmul.f32 %v3430_v51, %v3204_v12  ;;  %v3693_v12 = vld [vmem:[%s5229_s28] sm:$0xff] }
 0x570   : > { %v2739_v35 = vmul.f32 %v2723_v46, %v2497_v38  ;;  %v9367_v63 = vmax.f32 %v7657_v60, 0.0  ;;  %v9368_v59 = vmax.f32 %v7564_v53, 0.0  ;;  %v9369_v36 = vmax.f32 %v7312_v62, 0.0  ;;  %v4384_v62 = vld [vmem:[%s8962_s7] ss:$0 sm:$0xff] }
 0x571   : > { %v3477_v31 = vmax.f32 %v3461_v22, 0.0  ;;  %v3558_v38 = vadd.f32 %v4384_v62, %v8876_v3 }
 0x572   : > { %v2755_v45 = vadd.f32 %v2739_v35, %v2112_v33  ;;  %v3621_v33 = vld [vmem:[#allocation13] sm:$0xff] }
 0x574   : > { %v3462_v7 = vadd.f32 %v3446_v1, %v2755_v45  ;;  %v3694_v1 = vld [vmem:[%s5229_s28 + $0x8] sm:$0xff]  ;;  %s4905_s28 = sshra.s32 %s3783_s1, 4  ;;  %s4906_s28 = int_to_ptr.hbm [resolvable:$true] %s4905_s28 }
 0x575   : > { %s4907_s18 = scalar_lea.hbm %s4906_s28, 16  ;;  %p4912_p8 = scmp.lt.s32.totalorder %s4906_s28, %s9371_s25 }
 0x576   : > { %v3478_v42 = vmax.f32 %v3462_v7, 0.0  ;;  %p4908_p12 = scmp.ne.s32.totalorder %s4906_s28, %s4907_s18  ;;  %p4913_p6 = scmp.lt.s32.totalorder %s4911_s13, %s4907_s18 }
 0x577   : > { %4151 = vmatmul.msk.f32.gmra.mxu3 %vm3491_vm9, %v3477_v31 }
 0x578   : > { %3712 = vmatpush.msrb.mxu1 %v3478_v42  ;;  %p4909_p2 = pnand %p4908_p12, %p5119_p4  ;;  %p4914_p10 = por %p4913_p6, %p4912_p8 }
 0x57a   : > { %3713 = vmatpush.msrb.mxu1 %v3477_v31  ;;  %p4910_p1 = pneg %p4909_p2 }
 0x57c   : > { %3714 = vmatpush.msrb.mxu1 %v3476_v30  ;;  %p4915_p11 = pnand %p4914_p10, %p4910_p1 }
 0x57e   : > { %3715 = vmatpush.msrb.mxu1 %v3475_v25  ;;  %v9364_v25 = vmax.f32 %v7977_v56, 0.0  ;;  %v9370_v56 = vmax.f32 %v7221_v11, 0.0 }
 0x57f   : > { %4152 = vmatmul.msk.f32.gmra.mxu3 %vm3491_vm9, %v3478_v42 }
 0x580   : > { %3716 = vmatpush.msrb.mxu1 %v3474_v37 }
 0x582   : > { %3717 = vmatpush.msrb.mxu1 %v3473_v58 }
 0x584   : > { %3718 = vmatpush.msrb.mxu1 %v3472_v10  ;;  %v8886_v10 = vpop.f32.mrf.mxu3 }
 0x585   : > { %v3561_v49 = vadd.f32 %v4384_v62, %v8886_v10 }
 0x586   : > { %3719 = vmatpush.msrb.mxu1 %v3471_v18 }
 0x588   : > { %3720 = vmatpush.msrb.mxu1 %v3470_v55 }
 0x58a   : > { %3721 = vmatpush.msrb.mxu1 %v9364_v25 }
 0x58c   : > { %3722 = vmatpush.msrb.mxu1 %v9365_v29  ;;  %v3563_v55 = vpop.f32.mrf.mxu3 }
 0x58d   : > { %v3564_v23 = vadd.f32 %v4384_v62, %v3563_v55 }
 0x58e   : > { %3723 = vmatpush.msrb.mxu1 %v9366_v8 }
 0x590   : > { %3724 = vmatpush.msrb.mxu1 %v9367_v63 }
 0x592   : > { %3725 = vmatpush.msrb.mxu1 %v9368_v59 }
 0x594   : > { %3726 = vmatpush.msrb.mxu1 %v9369_v36  ;;  %v3566_v4 = vpop.f32.mrf.mxu3 }
 0x595   : > { %v3567_v16 = vadd.f32 %v4384_v62, %v3566_v4 }
 0x596   : > { %3727 = vmatpush.msrb.mxu1 %v9370_v56 }
 0x59c   : > { %v3569_v18 = vpop.f32.mrf.mxu3 }
 0x59d   : > { %v3570_v32 = vadd.f32 %v4384_v62, %v3569_v18 }
 0x5a4   : > { %v3572_v58 = vpop.f32.mrf.mxu3 }
 0x5a5   : > { %v3573_v50 = vadd.f32 %v4384_v62, %v3572_v58 }
 0x5ac   : > { %v3575_v61 = vpop.f32.mrf.mxu3 }
 0x5ad   : > { %v3576_v54 = vadd.f32 %v4384_v62, %v3575_v61 }
 0x5b4   : > { %v3578_v37 = vpop.f32.mrf.mxu3 }
 0x5b5   : > { %v3579_v44 = vadd.f32 %v4384_v62, %v3578_v37 }
 0x5bc   : > { %v3581_v19 = vpop.f32.mrf.mxu3 }
 0x5bd   : > { %v3582_v41 = vadd.f32 %v4384_v62, %v3581_v19 }
 0x5c4   : > { %v3584_v60 = vpop.f32.mrf.mxu3 }
 0x5c5   : > { %v3585_v34 = vadd.f32 %v4384_v62, %v3584_v60 }
 0x5cc   : > { %v3587_v20 = vpop.f32.mrf.mxu3 }
 0x5cd   : > { %v3588_v57 = vadd.f32 %v4384_v62, %v3587_v20 }
 0x5e2   : > { %v3590_v2 = vpop.f32.mrf.mxu3 }
 0x5e3   : > { %v3591_v24 = vadd.f32 %v4384_v62, %v3590_v2 }
 0x5ea   : > { %v3593_v6 = vpop.f32.mrf.mxu3 }
 0x5eb   : > { %v3594_v39 = vadd.f32 %v4384_v62, %v3593_v6 }
 0x5f2   : > { %v3596_v0 = vpop.f32.mrf.mxu3 }
 0x5f3   : > { %v3597_v28 = vadd.f32 %v4384_v62, %v3596_v0 }
 0x5fa   : > { %v3599_v53 = vpop.f32.mrf.mxu3 }
 0x5fb   : > { %v3600_v15 = vadd.f32 %v4384_v62, %v3599_v53 }
 0x602   : > { %v3602_v48 = vpop.f32.mrf.mxu3 }
 0x603   : > { %v3603_v11 = vadd.f32 %v4384_v62, %v3602_v48 }
 0x605   : > { %4641 = vtanh.f32 %v3603_v11 }
 0x606   : > { %4643 = vtanh.f32 %v3600_v15 }
 0x607   : > { %4645 = vtanh.f32 %v3597_v28 }
 0x608   : > { %4647 = vtanh.f32 %v3594_v39 }
 0x609   : > { %4649 = vtanh.f32 %v3591_v24 }
 0x60a   : > { %4651 = vtanh.f32 %v3588_v57 }
 0x60b   : > { %v4642_v40 = vpop.eup %4641  ;;  %4653 = vtanh.f32 %v3585_v34 }
 0x60c   : > { %4153 = vmatpush.xpose.msk.msrb.mxu0 %vm3491_vm9, %v4642_v40  ;;  %v4644_v52 = vpop.eup %4643  ;;  %4655 = vtanh.f32 %v3582_v41 }
 0x60d   : > { %v4646_v21 = vpop.eup %4645  ;;  %4657 = vtanh.f32 %v3579_v44 }
 0x60e   : > { %v4648_v13 = vpop.eup %4647  ;;  %4659 = vtanh.f32 %v3576_v54 }
 0x60f   : > { %v4650_v43 = vpop.eup %4649  ;;  %4661 = vtanh.f32 %v3573_v50 }
 0x610   : > { %4154 = vmatpush.xpose.msk.msrb.mxu0 %vm3491_vm9, %v4644_v52  ;;  %v4652_v26 = vpop.eup %4651  ;;  %4663 = vtanh.f32 %v3570_v32 }
 0x611   : > { %v4654_v30 = vpop.eup %4653  ;;  %4665 = vtanh.f32 %v3567_v16 }
 0x612   : > { %v4656_v9 = vpop.eup %4655  ;;  %4667 = vtanh.f32 %v3564_v23 }
 0x613   : > { %v4658_v14 = vpop.eup %4657  ;;  %4669 = vtanh.f32 %v3561_v49 }
 0x614   : > { %4155 = vmatpush.xpose.msk.msrb.mxu0 %vm3491_vm9, %v4646_v21  ;;  %v4660_v17 = vpop.eup %4659  ;;  %4671 = vtanh.f32 %v3558_v38 }
 0x615   : > { %v4662_v27 = vpop.eup %4661 }
 0x616   : > { %v4664_v5 = vpop.eup %4663 }
 0x617   : > { %v4666_v47 = vpop.eup %4665 }
 0x618   : > { %4156 = vmatpush.xpose.msk.msrb.mxu0 %vm3491_vm9, %v4648_v13  ;;  %v4668_v51 = vpop.eup %4667 }
 0x619   : > { %v4670_v46 = vpop.eup %4669 }
 0x61a   : > { %v4672_v22 = vpop.eup %4671 }
 0x61c   : > { %4157 = vmatpush.xpose.msk.msrb.mxu0 %vm3491_vm9, %v4650_v43 }
 0x620   : > { %4158 = vmatpush.xpose.msk.msrb.mxu0 %vm3491_vm9, %v4652_v26 }
 0x624   : > { %4159 = vmatpush.xpose.msk.msrb.mxu0 %vm3491_vm9, %v4654_v30 }
 0x628   : > { %4160 = vmatpush.xpose.msk.msrb.mxu0 %vm3491_vm9, %v4656_v9 }
 0x62c   : > { %4161 = vmatpush.xpose.msk.msrb.mxu0 %vm3491_vm9, %v4658_v14 }
 0x630   : > { %4162 = vmatpush.xpose.msk.msrb.mxu0 %vm3491_vm9, %v4660_v17 }
 0x634   : > { %4163 = vmatpush.xpose.msk.msrb.mxu0 %vm3491_vm9, %v4662_v27 }
 0x638   : > { %4164 = vmatpush.xpose.msk.msrb.mxu0 %vm3491_vm9, %v4664_v5 }
 0x63c   : > { %4165 = vmatpush.xpose.msk.msrb.mxu0 %vm3491_vm9, %v4666_v47 }
 0x640   : > { %4166 = vmatpush.xpose.msk.msrb.mxu0 %vm3491_vm9, %v4668_v51 }
 0x644   : > { %4167 = vmatpush.xpose.msk.msrb.mxu0 %vm3491_vm9, %v4670_v46 }
 0x648   : > { %4168 = vmatpush.xpose.msk.msrb.mxu0 %vm3491_vm9, %v4672_v22 }
 0x64b   : > { %4169 = vmatmul.msk.f32.vlgmr.msrb.gmra.mxu0 %vm3491_vm9, %v3621_v33 }
 0x6c8   : > { %v3690_v35 = vpop.f32.mrf.mxu0 }
 0x6c9   : > { %v3695_v45 = vperm.slane %v3690_v35, 0 }
 0x6cb   : > { %v3696_v31 = vadd.f32 %v3695_v45, %v3693_v12  ;;  %v3697_v7 = vadd.f32 %v3695_v45, %v3694_v1 }
 0x6cd   : > { %3700 = vmax.xlane.f32.xlu2 %v3697_v7  ;;  %3698 = vmax.xlane.f32.xlu1 %v3696_v31 }
 0x740   : > { %v3701_v42 = vpop.xlane.xlu2 %3700  ;;  %v3699_v3 = vpop.xlane.xlu1 %3698 }
 0x741   : > { %v3703_v25 = vsub.f32 %v3697_v7, %v3701_v42  ;;  %v3702_v29 = vsub.f32 %v3696_v31, %v3699_v3 }
 0x743   : > { %v3706_v8 = vmul.f32 1.442695, %v3703_v25  ;;  %v3704_v63 = vmul.f32 1.442695, %v3702_v29 }
 0x745   : > { %4673 = vpow2.f32 %v3706_v8 }
 0x746   : > { %4675 = vpow2.f32 %v3704_v63 }
 0x74b   : > { %v4674_v10 = vpop.eup %4673 }
 0x74c   : > { %v4676_v59 = vpop.eup %4675  ;;  %3710 = vadd.xlane.f32.xlu1 %v4674_v10 }
 0x74d   : > { %3708 = vadd.xlane.f32.xlu0 %v4676_v59  ;;  %3728 = vmatmul.f32.vlgmr.msrb.gmra.mxu1 %v4676_v59 }
 0x755   : > { %3731 = vmatmul.f32.gmra.mxu1 %v4674_v10 }
 0x7bf   : > { %v3711_v36 = vpop.xlane.xlu1 %3710 }
 0x7c0   : > { %v3709_v56 = vpop.xlane.xlu0 %3708  ;;  %4677 = vrcp.f32 %v3711_v36  ;;  %v3760_v19 = vand.u32 2147483648, %v3711_v36  ;;  %v3758_v6 = vand.u32 2147483647, %v3711_v36  ;;  %vm3754_vm3 = vweird.f32 %v3711_v36 }
 0x7c1   : > { %4679 = vrcp.f32 %v3709_v56  ;;  %v3746_v20 = vand.u32 2147483648, %v3709_v56  ;;  %v3744_v53 = vand.u32 2147483647, %v3709_v56  ;;  %vm3740_vm5 = vweird.f32 %v3709_v56 }
 0x7c2   : > { %v3761_v11 = vor.u32 1.1754944e-38, %v3760_v19  ;;  %vm3759_vm10 = vcmp.eq.f32.partialorder %v3758_v6, 8.507059e+37 }
 0x7c3   : > { %v3747_v15 = vor.u32 1.1754944e-38, %v3746_v20  ;;  %vm3745_vm8 = vcmp.eq.f32.partialorder %v3744_v53, 8.507059e+37 }
 0x7c6   : > { %v4678_v55 = vpop.eup %4677 }
 0x7c7   : > { %v4680_v4 = vpop.eup %4679  ;;  %v3750_v18 = vmul.f32 %v4678_v55, %v3711_v36  ;;  %vm3755_vm4 = vweird.f32 %v4678_v55 }
 0x7c8   : > { %v3736_v58 = vmul.f32 %v4680_v4, %v3709_v56  ;;  %vm3741_vm2 = vweird.f32 %v4680_v4  ;;  %vm3756_vm6 = vmor %vm3754_vm3, %vm3755_vm4 }
 0x7c9   : > { %v3751_v61 = vsub.f32 1.0, %v3750_v18  ;;  %vm3742_vm7 = vmor %vm3740_vm5, %vm3741_vm2 }
 0x7ca   : > { %v3737_v37 = vsub.f32 1.0, %v3736_v58  ;;  %v3729_v60 = vpop.f32.mrf.mxu1 }
 0x7cb   : > { %v3752_v2 = vmul.f32 %v4678_v55, %v3751_v61 }
 0x7cc   : > { %v3738_v0 = vmul.f32 %v4680_v4, %v3737_v37 }
 0x7cd   : > { %v3753_v62 = vadd.f32 %v4678_v55, %v3752_v2 }
 0x7ce   : > { %v3739_v48 = vadd.f32 %v4680_v4, %v3738_v0 }
 0x7cf   : > { %v3757_v28 = vsel %vm3756_vm6, %v4678_v55, %v3753_v62 }
 0x7d0   : > { %v3743_v40 = vsel %vm3742_vm7, %v4680_v4, %v3739_v48  ;;  %v3762_v39 = vsel %vm3759_vm10, %v3761_v11, %v3757_v28 }
 0x7d1   : > { %v3748_v52 = vsel %vm3745_vm8, %v3747_v15, %v3743_v40 }
 0x7d2   : > { %v3763_v24 = vmul.f32 %v3748_v52, %v3729_v60  ;;  %v3732_v21 = vpop.f32.mrf.mxu1 }
 0x7d3   : > { %v3764_v57 = vmul.f32 %v3762_v39, %v3732_v21 }
 0x7d4   : > { %3765 = vst.msk [vmem:[%s494_s17] sm:$0xff] %vm3491_vm9, %v3763_v24 }
 0x7d5   : > { %3766 = vst.msk [vmem:[%s494_s17 + $0x8] sm:$0xff] %vm3491_vm9, %v3764_v57 }
 0x7d6   : > { %4918 = shalt.err (!%p4915_p11)
}
 0x7d7   : > { %s4986_s19 = smov 128   ;;  %s4987_s20 = smov 8  }
 0x7d8   : > { %4216 = dma.vmem_to_hbm [thread:$0]  (%p5119_p4), %s3781_s22, 256, %s3783_s1, %s3768_s27, %s4986_s19, %s4986_s19, %s4987_s20  }
 0x7d9 PF: > { %s9373_s15 = sld [smem:[#allocation20_spill]]  ;;  %p9375_p13 = scmp.ge.s32.totalorder %s4969_s12, 2 }
 0x7db   : > { %p4242_p3 = pnand %p9375_p13, %p5123_p5 }
 0x7dd   : > { %p4243_p7 = pneg %p4242_p3 }
 0x7df   : > { %s3797_s29 = sand.u32 1, %s9373_s15  }
 0x7e0   : > { %s3798_s26 = scalar_lea.sflag [#allocation4], %s3797_s29 }
 0x7e1   : > { %4952 = dma.done.wait (%p4243_p7), %s3798_s26, 256  }
 0x7e2   : > { %4954 = vsyncadd (%p4243_p7), %s3798_s26, 4294967040  ;;  %s9376_s12 = sld [smem:[#allocation22_spill]]  ;;  %s9379_s30 = smov %s4961_s10 }
 0x7e3   : > { %s9377_s3 = sld [smem:[#allocation21_spill]] }
 0x7e4   : > { %s9378_s11 = sld [smem:[#allocation23_spill]] }
 0x7e8   : > { %p27_p9 = scmp.ge.s32.totalorder %s9376_s12, 4  }
 0x7e9   : > { %s9380_s10 = smov %s9377_s3 }
 0x7ea   :  { %29 = sbr.rel (!%p27_p9) target bundleno = 14 (0xe), region = 141 }
 0x7ef   :  { %3804 = vsyncpa [#allocation3], 1 }
 0x7f0   :  { %3806 = vsyncpa [#allocation3 + $0x1], 1 }
 0x7f1   :  { %3807 = vsyncpa [#allocation6], 1 }
 0x7f2   :  { %3809 = vsyncpa [#allocation6 + $0x1], 1 }
 0x7f3   :  { %3810 = vsyncpa [#allocation9], 1 }
 0x7f4   :  { %3811 = vsyncpa [#allocation12], 1 }
 0x7f5   :  { %3812 = vsyncpa [#allocation4], 1 }
 0x7f6   :  { %3814 = vsyncpa [#allocation4 + $0x1], 1 }

</bundles_post_ra>
